<compile_context>
chip_gen: v7x
topology: tpu7x:2x2x1
jax: 0.10.0
libtpu: 0.0.40
codegen_flags: <defaults>
</compile_context>

<pallas_src>
import functools

import jax
import jax.numpy as jnp
import numpy as np
from jax.experimental import pallas as pl
from jax.experimental.pallas import tpu as pltpu


# ----------------------------------------------------------------------------
# Pallas kernel: one grid step == one batch element
# ----------------------------------------------------------------------------
def _loss_kernel(samples_ref, closest_ref, planes_ref, axes_ref, out_ref, *,
                 bound, gsize, n_valid, nbatch, chunk):
    """Per-batch symmetry loss.

    samples_ref : (3, NP)    f32   xyz on sublanes, points on lanes (lane-padded)
    closest_ref : (6, G3P)   bf16  rows 0-2 = bf16(closest), rows 3-5 = residual
    planes_ref  : (3*B*4,)   f32   SMEM flat plane params  (k, b, c) -> (k*B+b)*4+c
    axes_ref    : (3*B*4,)   f32   SMEM flat quaternion params
    out_ref     : (1, 1, 8)  f32   [d2_ref0..2, d2_rot0..2, reg_sum, 0] raw sums
    """
    f32 = jnp.float32
    bf16 = jnp.bfloat16
    b = pl.program_id(0)
    NP = samples_ref.shape[1]
    G3P = closest_ref.shape[1]
    NSYM = 6
    SIXN = NSYM * NP
    nchunks = G3P // chunk

    # ---- hoisted constants (JAX does not CSE iota/broadcast; build once) ----
    chunk_iota = jax.lax.broadcasted_iota(jnp.int32, (chunk, 1), 0)   # (chunk, 1)

    def pval(ref, k, c):                      # flat SMEM read of (3, B, 4) params
        return ref[(k * nbatch + b) * 4 + c]

    sx = samples_ref[0:1, :]                                           # (1, NP)
    sy = samples_ref[1:2, :]
    sz = samples_ref[2:3, :]

    xs, ys, zs = [], [], []

    # ---------------- reflect (plane symmetry) transforms ----------------
    for k in range(3):
        nx = pval(planes_ref, k, 0)
        ny = pval(planes_ref, k, 1)
        nz = pval(planes_ref, k, 2)
        d = pval(planes_ref, k, 3)
        nn = nx * nx + ny * ny + nz * nz + 1e-12
        dst = (sx * nx + sy * ny + sz * nz + d) * 2.0 / nn             # (1, NP)
        xs.append(sx - dst * nx)
        ys.append(sy - dst * ny)
        zs.append(sz - dst * nz)

    # ---------------- rotate (axis symmetry) transforms ----------------
    for k in range(3):
        q0 = pval(axes_ref, k, 0)
        q1 = pval(axes_ref, k, 1)
        q2 = pval(axes_ref, k, 2)
        q3 = pval(axes_ref, k, 3)
        # t1 = q * (0, p)
        r1 = -(q1 * sx + q2 * sy + q3 * sz)
        v1x = q0 * sx + (q2 * sz - q3 * sy)
        v1y = q0 * sy + (q3 * sx - q1 * sz)
        v1z = q0 * sz + (q1 * sy - q2 * sx)
        # rotated point = imag(t1 * q_inv), q_inv = (q0, -q1, -q2, -q3)
        xs.append(-r1 * q1 + q0 * v1x + (-v1y * q3 + v1z * q2))
        ys.append(-r1 * q2 + q0 * v1y + (-v1z * q1 + v1x * q3))
        zs.append(-r1 * q3 + q0 * v1z + (-v1x * q2 + v1y * q1))

    # pack the 6 transforms lane-wise: three (1, 6*NP) rows (lane-aligned segments)
    px = jnp.concatenate(xs, axis=1)
    py = jnp.concatenate(ys, axis=1)
    pz = jnp.concatenate(zs, axis=1)

    # ---------------- voxel flat indices for all 6 transforms ----------------
    def vox(p):
        v = jnp.floor((p + bound) * gsize)
        v = jnp.clip(v, 0.0, float(gsize - 1))
        return v.astype(jnp.int32)

    flat_all = (vox(px) * gsize + vox(py)) * gsize + vox(pz)           # (1, 6NP)

    # ------- fused gather: chunked one-hot + bf16 MXU matmul, single accum ----
    def gather_chunk(c0, acc):
        lhs = closest_ref[:, pl.ds(c0, chunk)]                         # (6, chunk) bf16
        onehot = ((chunk_iota + c0) == flat_all).astype(bf16)          # (chunk, 6NP)
        return acc + jnp.dot(lhs, onehot, preferred_element_type=f32)  # (6, 6NP)

    acc0 = jnp.zeros((6, SIXN), f32)
    if nchunks <= 8:
        acc = acc0
        for ci in range(nchunks):                 # small: static unroll
            acc = gather_chunk(ci * chunk, acc)
    else:
        def body(ci, a):
            c0 = pl.multiple_of(ci * chunk, chunk)
            return gather_chunk(c0, a)
        acc = jax.lax.fori_loop(0, nchunks, body, acc0)

    gx = acc[0:1, :] + acc[3:4, :]                # hi + lo -> (near-)exact f32
    gy = acc[1:2, :] + acc[4:5, :]
    gz = acc[2:3, :] + acc[5:6, :]

    # ---------------- squared distances, one pass over (1, 6NP) ----------------
    d2 = (px - gx) ** 2 + (py - gy) ** 2 + (pz - gz) ** 2              # (1, 6NP)
    if n_valid != NP:                            # mask the lane padding
        lane = jax.lax.broadcasted_iota(jnp.int32, (1, NP), 1)
        valid = (lane < n_valid).astype(f32)
        d2 = d2 * jnp.concatenate([valid] * NSYM, axis=1)

    sums = [jnp.sum(d2[:, k * NP:(k + 1) * NP], keepdims=True)         # (1, 1)
            for k in range(NSYM)]

    # -------- regular (orthogonality) loss: scalar path, no sqrt needed -----
    #   (n̂_i·n̂_i - 1)^2 == 0 exactly; (n̂_i·n̂_j)^2 == (n_i·n_j)^2/(nn_i nn_j)
    reg_vec = jnp.zeros((1, 1), f32)
    reg_sc = 0.0
    n = [(pval(planes_ref, i, 0), pval(planes_ref, i, 1), pval(planes_ref, i, 2))
         for i in range(3)]
    u = [(pval(axes_ref, i, 1), pval(axes_ref, i, 2), pval(axes_ref, i, 3))
         for i in range(3)]
    nn = [n[i][0] * n[i][0] + n[i][1] * n[i][1] + n[i][2] * n[i][2] for i in range(3)]
    inv_nn = [1.0 / jnp.full((1, 1), nn[i], f32) for i in range(3)]
    for i in range(3):
        for j in range(3):
            if i != j:
                dij = (n[i][0] * n[j][0] + n[i][1] * n[j][1] + n[i][2] * n[j][2])
                reg_vec = reg_vec + (dij * dij) * inv_nn[i] * inv_nn[j]
            delta = 1.0 if i == j else 0.0
            uij = u[i][0] * u[j][0] + u[i][1] * u[j][1] + u[i][2] * u[j][2]
            db = uij - delta
            reg_sc = reg_sc + db * db

    # ---------------- single (1, 1, 8) per-batch store ----------------
    vals = sums + [reg_vec + reg_sc]
    lane8 = jax.lax.broadcasted_iota(jnp.int32, (1, 8), 1)
    row = jnp.zeros((1, 8), f32)
    for k, v in enumerate(vals):
        row = jnp.where(lane8 == k, v, row)
    out_ref[...] = row.reshape(1, 1, 8)


# ----------------------------------------------------------------------------
# Wrapper (mirrors LossFn.forward)
# ----------------------------------------------------------------------------
def loss_fn_pallas(polygon, planes, axes, weight):
    samples = jnp.asarray(polygon['sample_points'], jnp.float32)            # (B, N, 3)
    B, N, _ = samples.shape
    G = int(polygon['grid_size'][0])
    bound = float(polygon['bound'][0])
    G3 = G ** 3
    closest = jnp.asarray(polygon['closest_points'],
                          jnp.float32).reshape(B, G3, 3)                     # (B, G^3, 3)

    # lane-dense layouts, lane-padded to multiples of 128
    NP = ((N + 127) // 128) * 128
    samples_t = jnp.transpose(samples, (0, 2, 1))                            # (B, 3, N)
    if NP != N:
        samples_t = jnp.pad(samples_t, ((0, 0), (0, 0), (0, NP - N)))

    # chunk size from a VMEM budget for the bf16 one-hot slab (chunk * 6NP * 2 B)
    budget = 4 << 20
    chunk = max(128, min((budget // (6 * NP * 2)) // 128 * 128,
                         ((G3 + 127) // 128) * 128))
    G3P = ((G3 + chunk - 1) // chunk) * chunk

    closest_t = jnp.transpose(closest, (0, 2, 1))                            # (B, 3, G^3)
    if G3P != G3:
        closest_t = jnp.pad(closest_t, ((0, 0), (0, 0), (0, G3P - G3)))
    # exact bf16 hi/lo split: hi + lo reproduces f32 closest to ~2^-17 relative
    hi = closest_t.astype(jnp.bfloat16)
    lo = (closest_t - hi.astype(jnp.float32)).astype(jnp.bfloat16)
    closest_packed = jnp.concatenate([hi, lo], axis=1)                       # (B, 6, G3P)

    planes_arr = jnp.stack([jnp.asarray(p, jnp.float32) for p in planes], 0)  # (3, B, 4)
    axes_arr = jnp.stack([jnp.asarray(a, jnp.float32) for a in axes], 0)      # (3, B, 4)

    # rotation-angle reciprocal penalty (tiny scalar work; acos in plain JAX)
    theta = jnp.arccos(axes_arr[:, :, 0]) * 2.0 * 180.0 / jnp.pi              # (3, B)
    theta = jnp.where(theta > 180.0, 360.0 - theta, theta)
    recip_theta = jnp.mean(1.0 / theta, axis=1).astype(jnp.float32)           # (3,)

    # explicit VMEM limit: per-batch slabs (double-buffered) + onehot chunk + slack
    est = (2 * 3 * NP * 4 + 2 * 6 * G3P * 2 + chunk * 6 * NP * 2
           + 24 * 6 * NP * 4 + (2 << 20))
    vmem_limit = int(min(max(est * 2, 32 << 20), 100 << 20))

    kernel = functools.partial(_loss_kernel, bound=bound, gsize=G,
                               n_valid=N, nbatch=B, chunk=chunk)
    out = pl.pallas_call(
        kernel,
        out_shape=jax.ShapeDtypeStruct((B, 1, 8), jnp.float32),
        grid=(B,),
        in_specs=[
            pl.BlockSpec((None, 3, NP), lambda b: (b, 0, 0)),     # samples  (per batch)
            pl.BlockSpec((None, 6, G3P), lambda b: (b, 0, 0)),    # closest  (per batch)
            pl.BlockSpec(memory_space=pltpu.MemorySpace.SMEM),    # planes (flat scalars)
            pl.BlockSpec(memory_space=pltpu.MemorySpace.SMEM),    # axes   (flat scalars)
        ],
        out_specs=pl.BlockSpec((1, 1, 8), lambda b: (b, 0, 0)),
        compiler_params=pltpu.CompilerParams(
            dimension_semantics=("parallel",),                    # megacore on v7x
            vmem_limit_bytes=vmem_limit),
    )(samples_t, closest_packed, planes_arr.reshape(-1), axes_arr.reshape(-1))

    per_batch = out[:, 0, :]                                      # (B, 8) raw sums
    totals = per_batch.sum(axis=0)                                # (8,)
    inv = 1.0 / (B * 3.0)        # DistCount: mean over (batch, xyz) of point sums
    ref_loss = totals[0:3] * inv
    rot_loss = totals[3:6] * inv + recip_theta
    reg_loss = totals[6] * (weight / B)
    return {'reflect': ref_loss, 'rotate': rot_loss, 'regular': reg_loss,
            'all': ref_loss.sum() + rot_loss.sum() + reg_loss}


# ----------------------------------------------------------------------------
# Pure-JAX reference (direct transcription of the PyTorch code) for validation
# ----------------------------------------------------------------------------
def _quat_mul_ref(q1, q2):
    qr = q1[..., 0] * q2[..., 0] - jnp.sum(q1[..., 1:] * q2[..., 1:], axis=-1)
    qi = (q1[..., 0:1] * q2[..., 1:] + q2[..., 0:1] * q1[..., 1:]
          + jnp.cross(q1[..., 1:], q2[..., 1:]))
    return jnp.concatenate([qr[..., None], qi], axis=-1)


def _dist_count_ref(points, closest_flat, bound, G):
    idx = jnp.floor((points + bound) * G).astype(jnp.int32)
    idx = jnp.clip(idx, 0, G - 1)
    flat = (idx[..., 0] * G + idx[..., 1]) * G + idx[..., 2]
    Bn, Nn, _ = points.shape
    gathered = jnp.take_along_axis(
        closest_flat, jnp.broadcast_to(flat[..., None], (Bn, Nn, 3)), axis=1)
    dist = points - gathered
    return jnp.mean(jnp.sum(dist ** 2, axis=1))


def loss_fn_ref(polygon, planes, axes, weight):
    samples = jnp.asarray(polygon['sample_points'], jnp.float32)
    Bn, Nn, _ = samples.shape
    G = int(polygon['grid_size'][0])
    bound = float(polygon['bound'][0])
    closest = jnp.asarray(polygon['closest_points'], jnp.float32).reshape(Bn, G ** 3, 3)

    ref_losses = []
    for p in planes:
        n = p[:, None, :3]
        d = p[:, None, 3]
        dst = 2.0 * (jnp.sum(samples * n, axis=2) + d) / (
            jnp.linalg.norm(n, axis=2) ** 2 + 1e-12)
        pts = samples - dst[..., None] * n
        ref_losses.append(_dist_count_ref(pts, closest, bound, G))

    rot_losses = []
    for q in axes:
        pts0 = jnp.concatenate([jnp.zeros((Bn, Nn, 1), jnp.float32), samples], axis=2)
        qu = q[:, None, :]
        qinv = qu * jnp.array([1., -1., -1., -1.], jnp.float32)
        pt = _quat_mul_ref(qu, pts0)
        pt = _quat_mul_ref(pt, qinv)
        pt = pt[:, :, 1:]
        theta = jnp.arccos(qu[:, :, 0]) * 2.0 * 180.0 / jnp.pi
        theta = jnp.where(theta > 180.0, 360.0 - theta, theta)
        rot_losses.append(_dist_count_ref(pt, closest, bound, G) + jnp.mean(1.0 / theta))

    P = jnp.stack(planes, axis=1)   # (B, 3, 4)
    A = jnp.stack(axes, axis=1)     # (B, 3, 4)
    n = P[:, :, :3]
    n = n / jnp.linalg.norm(n, axis=2, keepdims=True)
    I3 = jnp.eye(3, dtype=jnp.float32)
    Am = n @ jnp.swapaxes(n, 1, 2) - I3
    u = A[:, :, 1:]
    Bm = u @ jnp.swapaxes(u, 1, 2) - I3
    reg = jnp.mean(jnp.sum(Am ** 2, axis=(1, 2)) + jnp.sum(Bm ** 2, axis=(1, 2))) * weight

    ref_l = jnp.stack(ref_losses)
    rot_l = jnp.stack(rot_losses)
    return {'reflect': ref_l, 'rotate': rot_l, 'regular': reg,
            'all': ref_l.sum() + rot_l.sum() + reg}


# ----------------------------------------------------------------------------
if __name__ == "__main__":
    key = jax.random.PRNGKey(0)
    B, N, G = 2, 128, 8
    bound = 0.5
    weight = 0.1
    ks = jax.random.split(key, 8)

    samples = jax.random.uniform(ks[0], (B, N, 3), jnp.float32,
                                 minval=-0.45, maxval=0.45)
    # synthetic "closest point" field: centre of each voxel, row-major (ix, iy, iz)
    gi = jnp.stack(jnp.meshgrid(jnp.arange(G), jnp.arange(G), jnp.arange(G),
                                indexing='ij'), axis=-1).reshape(-1, 3).astype(jnp.float32)
    centers = (gi + 0.5) / G - bound                                   # (G^3, 3)
    closest = jnp.tile(centers[None], (B, 1, 1)).astype(jnp.float32)   # (B, G^3, 3)

    planes = [jax.random.normal(ks[1 + i], (B, 4), jnp.float32) for i in range(3)]
    raw_axes = [jax.random.normal(ks[4 + i], (B, 4), jnp.float32) for i in range(3)]
    axes = [a / jnp.linalg.norm(a, axis=1, keepdims=True) for a in raw_axes]

    polygon = {
        'sample_points': samples,
        'closest_points': closest,
        'bound': jnp.array([bound], jnp.float32),
        'grid_size': jnp.array([G], jnp.int32),
    }

    result = loss_fn_pallas(polygon, planes, axes, weight)
    jax.block_until_ready(result)

    expected = loss_fn_ref(polygon, planes, axes, weight)
    for name in ('reflect', 'rotate', 'regular', 'all'):
        np.testing.assert_allclose(np.asarray(result[name]), np.asarray(expected[name]),
                                   rtol=1e-3, atol=1e-4)
    print("KERNEL_OK")
</pallas_src>

<mosaic_0001>
module attributes {stable_mosaic.version = 11 : i64} {
  func.func @_loss_kernel(%arg0: i32, %arg1: memref<1x3x128xf32, #tpu.memory_space<vmem>>, %arg2: memref<1x6x512xbf16, #tpu.memory_space<vmem>>, %arg3: memref<24xf32, #tpu.memory_space<smem>>, %arg4: memref<24xf32, #tpu.memory_space<smem>>, %arg5: memref<1x1x8xf32, #tpu.memory_space<vmem>>) attributes {dimension_semantics = [#tpu.dimension_semantics<parallel>], iteration_bounds = array<i64: 2>, scalar_prefetch = 0 : i64, scratch_operands = 0 : i64, tpu.core_type = #tpu.core_type<tc>, window_params = [{transform_indices = @transform_0, window_bounds = array<i64: 1, 3, 128>}, {transform_indices = @transform_1, window_bounds = array<i64: 1, 6, 512>}, {transform_indices = @transform_2, window_bounds = array<i64: 24>}, {transform_indices = @transform_3, window_bounds = array<i64: 24>}, {transform_indices = @transform_4, window_bounds = array<i64: 1, 1, 8>}]} {
    %0 = tpu.iota {dimensions = array<i32: 0>} : vector<512x1xi32>
    %c0 = arith.constant 0 : index
    %c0_0 = arith.constant 0 : index
    %c0_1 = arith.constant 0 : index
    %1 = vector.load %arg1[%c0, %c0_0, %c0_1] : memref<1x3x128xf32, #tpu.memory_space<vmem>>, vector<1x1x128xf32>
    %2 = vector.shape_cast %1 : vector<1x1x128xf32> to vector<1x128xf32>
    %c0_2 = arith.constant 0 : index
    %c1 = arith.constant 1 : index
    %c0_3 = arith.constant 0 : index
    %3 = vector.load %arg1[%c0_2, %c1, %c0_3] : memref<1x3x128xf32, #tpu.memory_space<vmem>>, vector<1x1x128xf32>
    %4 = vector.shape_cast %3 : vector<1x1x128xf32> to vector<1x128xf32>
    %c0_4 = arith.constant 0 : index
    %c2 = arith.constant 2 : index
    %c0_5 = arith.constant 0 : index
    %5 = vector.load %arg1[%c0_4, %c2, %c0_5] : memref<1x3x128xf32, #tpu.memory_space<vmem>>, vector<1x1x128xf32>
    %6 = vector.shape_cast %5 : vector<1x1x128xf32> to vector<1x128xf32>
    %c0_i32 = arith.constant 0 : i32
    %7 = arith.addi %c0_i32, %arg0 : i32
    %c4_i32 = arith.constant 4 : i32
    %8 = arith.muli %7, %c4_i32 : i32
    %c0_i32_6 = arith.constant 0 : i32
    %9 = arith.addi %8, %c0_i32_6 : i32
    %10 = arith.index_cast %9 : i32 to index
    %11 = memref.load %arg3[%10] : memref<24xf32, #tpu.memory_space<smem>>
    %c0_i32_7 = arith.constant 0 : i32
    %12 = arith.addi %c0_i32_7, %arg0 : i32
    %c4_i32_8 = arith.constant 4 : i32
    %13 = arith.muli %12, %c4_i32_8 : i32
    %c1_i32 = arith.constant 1 : i32
    %14 = arith.addi %13, %c1_i32 : i32
    %15 = arith.index_cast %14 : i32 to index
    %16 = memref.load %arg3[%15] : memref<24xf32, #tpu.memory_space<smem>>
    %c0_i32_9 = arith.constant 0 : i32
    %17 = arith.addi %c0_i32_9, %arg0 : i32
    %c4_i32_10 = arith.constant 4 : i32
    %18 = arith.muli %17, %c4_i32_10 : i32
    %c2_i32 = arith.constant 2 : i32
    %19 = arith.addi %18, %c2_i32 : i32
    %20 = arith.index_cast %19 : i32 to index
    %21 = memref.load %arg3[%20] : memref<24xf32, #tpu.memory_space<smem>>
    %c0_i32_11 = arith.constant 0 : i32
    %22 = arith.addi %c0_i32_11, %arg0 : i32
    %c4_i32_12 = arith.constant 4 : i32
    %23 = arith.muli %22, %c4_i32_12 : i32
    %c3_i32 = arith.constant 3 : i32
    %24 = arith.addi %23, %c3_i32 : i32
    %25 = arith.index_cast %24 : i32 to index
    %26 = memref.load %arg3[%25] : memref<24xf32, #tpu.memory_space<smem>>
    %27 = arith.mulf %11, %11 : f32
    %28 = arith.mulf %16, %16 : f32
    %29 = arith.addf %27, %28 : f32
    %30 = arith.mulf %21, %21 : f32
    %31 = arith.addf %29, %30 : f32
    %cst = arith.constant 9.99999996E-13 : f32
    %32 = arith.addf %31, %cst : f32
    %33 = vector.broadcast %11 : f32 to vector<1x128xf32>
    %34 = arith.mulf %2, %33 : vector<1x128xf32>
    %35 = vector.broadcast %16 : f32 to vector<1x128xf32>
    %36 = arith.mulf %4, %35 : vector<1x128xf32>
    %37 = arith.addf %34, %36 : vector<1x128xf32>
    %38 = vector.broadcast %21 : f32 to vector<1x128xf32>
    %39 = arith.mulf %6, %38 : vector<1x128xf32>
    %40 = arith.addf %37, %39 : vector<1x128xf32>
    %41 = vector.broadcast %26 : f32 to vector<1x128xf32>
    %42 = arith.addf %40, %41 : vector<1x128xf32>
    %cst_13 = arith.constant 2.000000e+00 : f32
    %43 = vector.broadcast %cst_13 : f32 to vector<1x128xf32>
    %44 = arith.mulf %42, %43 : vector<1x128xf32>
    %45 = vector.broadcast %32 : f32 to vector<1x128xf32>
    %46 = arith.divf %44, %45 : vector<1x128xf32>
    %47 = vector.broadcast %11 : f32 to vector<1x128xf32>
    %48 = arith.mulf %46, %47 : vector<1x128xf32>
    %49 = arith.subf %2, %48 : vector<1x128xf32>
    %50 = vector.broadcast %16 : f32 to vector<1x128xf32>
    %51 = arith.mulf %46, %50 : vector<1x128xf32>
    %52 = arith.subf %4, %51 : vector<1x128xf32>
    %53 = vector.broadcast %21 : f32 to vector<1x128xf32>
    %54 = arith.mulf %46, %53 : vector<1x128xf32>
    %55 = arith.subf %6, %54 : vector<1x128xf32>
    %c2_i32_14 = arith.constant 2 : i32
    %56 = arith.addi %c2_i32_14, %arg0 : i32
    %c4_i32_15 = arith.constant 4 : i32
    %57 = arith.muli %56, %c4_i32_15 : i32
    %c0_i32_16 = arith.constant 0 : i32
    %58 = arith.addi %57, %c0_i32_16 : i32
    %59 = arith.index_cast %58 : i32 to index
    %60 = memref.load %arg3[%59] : memref<24xf32, #tpu.memory_space<smem>>
    %c2_i32_17 = arith.constant 2 : i32
    %61 = arith.addi %c2_i32_17, %arg0 : i32
    %c4_i32_18 = arith.constant 4 : i32
    %62 = arith.muli %61, %c4_i32_18 : i32
    %c1_i32_19 = arith.constant 1 : i32
    %63 = arith.addi %62, %c1_i32_19 : i32
    %64 = arith.index_cast %63 : i32 to index
    %65 = memref.load %arg3[%64] : memref<24xf32, #tpu.memory_space<smem>>
    %c2_i32_20 = arith.constant 2 : i32
    %66 = arith.addi %c2_i32_20, %arg0 : i32
    %c4_i32_21 = arith.constant 4 : i32
    %67 = arith.muli %66, %c4_i32_21 : i32
    %c2_i32_22 = arith.constant 2 : i32
    %68 = arith.addi %67, %c2_i32_22 : i32
    %69 = arith.index_cast %68 : i32 to index
    %70 = memref.load %arg3[%69] : memref<24xf32, #tpu.memory_space<smem>>
    %c2_i32_23 = arith.constant 2 : i32
    %71 = arith.addi %c2_i32_23, %arg0 : i32
    %c4_i32_24 = arith.constant 4 : i32
    %72 = arith.muli %71, %c4_i32_24 : i32
    %c3_i32_25 = arith.constant 3 : i32
    %73 = arith.addi %72, %c3_i32_25 : i32
    %74 = arith.index_cast %73 : i32 to index
    %75 = memref.load %arg3[%74] : memref<24xf32, #tpu.memory_space<smem>>
    %76 = arith.mulf %60, %60 : f32
    %77 = arith.mulf %65, %65 : f32
    %78 = arith.addf %76, %77 : f32
    %79 = arith.mulf %70, %70 : f32
    %80 = arith.addf %78, %79 : f32
    %cst_26 = arith.constant 9.99999996E-13 : f32
    %81 = arith.addf %80, %cst_26 : f32
    %82 = vector.broadcast %60 : f32 to vector<1x128xf32>
    %83 = arith.mulf %2, %82 : vector<1x128xf32>
    %84 = vector.broadcast %65 : f32 to vector<1x128xf32>
    %85 = arith.mulf %4, %84 : vector<1x128xf32>
    %86 = arith.addf %83, %85 : vector<1x128xf32>
    %87 = vector.broadcast %70 : f32 to vector<1x128xf32>
    %88 = arith.mulf %6, %87 : vector<1x128xf32>
    %89 = arith.addf %86, %88 : vector<1x128xf32>
    %90 = vector.broadcast %75 : f32 to vector<1x128xf32>
    %91 = arith.addf %89, %90 : vector<1x128xf32>
    %cst_27 = arith.constant 2.000000e+00 : f32
    %92 = vector.broadcast %cst_27 : f32 to vector<1x128xf32>
    %93 = arith.mulf %91, %92 : vector<1x128xf32>
    %94 = vector.broadcast %81 : f32 to vector<1x128xf32>
    %95 = arith.divf %93, %94 : vector<1x128xf32>
    %96 = vector.broadcast %60 : f32 to vector<1x128xf32>
    %97 = arith.mulf %95, %96 : vector<1x128xf32>
    %98 = arith.subf %2, %97 : vector<1x128xf32>
    %99 = vector.broadcast %65 : f32 to vector<1x128xf32>
    %100 = arith.mulf %95, %99 : vector<1x128xf32>
    %101 = arith.subf %4, %100 : vector<1x128xf32>
    %102 = vector.broadcast %70 : f32 to vector<1x128xf32>
    %103 = arith.mulf %95, %102 : vector<1x128xf32>
    %104 = arith.subf %6, %103 : vector<1x128xf32>
    %c4_i32_28 = arith.constant 4 : i32
    %105 = arith.addi %c4_i32_28, %arg0 : i32
    %c4_i32_29 = arith.constant 4 : i32
    %106 = arith.muli %105, %c4_i32_29 : i32
    %c0_i32_30 = arith.constant 0 : i32
    %107 = arith.addi %106, %c0_i32_30 : i32
    %108 = arith.index_cast %107 : i32 to index
    %109 = memref.load %arg3[%108] : memref<24xf32, #tpu.memory_space<smem>>
    %c4_i32_31 = arith.constant 4 : i32
    %110 = arith.addi %c4_i32_31, %arg0 : i32
    %c4_i32_32 = arith.constant 4 : i32
    %111 = arith.muli %110, %c4_i32_32 : i32
    %c1_i32_33 = arith.constant 1 : i32
    %112 = arith.addi %111, %c1_i32_33 : i32
    %113 = arith.index_cast %112 : i32 to index
    %114 = memref.load %arg3[%113] : memref<24xf32, #tpu.memory_space<smem>>
    %c4_i32_34 = arith.constant 4 : i32
    %115 = arith.addi %c4_i32_34, %arg0 : i32
    %c4_i32_35 = arith.constant 4 : i32
    %116 = arith.muli %115, %c4_i32_35 : i32
    %c2_i32_36 = arith.constant 2 : i32
    %117 = arith.addi %116, %c2_i32_36 : i32
    %118 = arith.index_cast %117 : i32 to index
    %119 = memref.load %arg3[%118] : memref<24xf32, #tpu.memory_space<smem>>
    %c4_i32_37 = arith.constant 4 : i32
    %120 = arith.addi %c4_i32_37, %arg0 : i32
    %c4_i32_38 = arith.constant 4 : i32
    %121 = arith.muli %120, %c4_i32_38 : i32
    %c3_i32_39 = arith.constant 3 : i32
    %122 = arith.addi %121, %c3_i32_39 : i32
    %123 = arith.index_cast %122 : i32 to index
    %124 = memref.load %arg3[%123] : memref<24xf32, #tpu.memory_space<smem>>
    %125 = arith.mulf %109, %109 : f32
    %126 = arith.mulf %114, %114 : f32
    %127 = arith.addf %125, %126 : f32
    %128 = arith.mulf %119, %119 : f32
    %129 = arith.addf %127, %128 : f32
    %cst_40 = arith.constant 9.99999996E-13 : f32
    %130 = arith.addf %129, %cst_40 : f32
    %131 = vector.broadcast %109 : f32 to vector<1x128xf32>
    %132 = arith.mulf %2, %131 : vector<1x128xf32>
    %133 = vector.broadcast %114 : f32 to vector<1x128xf32>
    %134 = arith.mulf %4, %133 : vector<1x128xf32>
    %135 = arith.addf %132, %134 : vector<1x128xf32>
    %136 = vector.broadcast %119 : f32 to vector<1x128xf32>
    %137 = arith.mulf %6, %136 : vector<1x128xf32>
    %138 = arith.addf %135, %137 : vector<1x128xf32>
    %139 = vector.broadcast %124 : f32 to vector<1x128xf32>
    %140 = arith.addf %138, %139 : vector<1x128xf32>
    %cst_41 = arith.constant 2.000000e+00 : f32
    %141 = vector.broadcast %cst_41 : f32 to vector<1x128xf32>
    %142 = arith.mulf %140, %141 : vector<1x128xf32>
    %143 = vector.broadcast %130 : f32 to vector<1x128xf32>
    %144 = arith.divf %142, %143 : vector<1x128xf32>
    %145 = vector.broadcast %109 : f32 to vector<1x128xf32>
    %146 = arith.mulf %144, %145 : vector<1x128xf32>
    %147 = arith.subf %2, %146 : vector<1x128xf32>
    %148 = vector.broadcast %114 : f32 to vector<1x128xf32>
    %149 = arith.mulf %144, %148 : vector<1x128xf32>
    %150 = arith.subf %4, %149 : vector<1x128xf32>
    %151 = vector.broadcast %119 : f32 to vector<1x128xf32>
    %152 = arith.mulf %144, %151 : vector<1x128xf32>
    %153 = arith.subf %6, %152 : vector<1x128xf32>
    %c0_i32_42 = arith.constant 0 : i32
    %154 = arith.addi %c0_i32_42, %arg0 : i32
    %c4_i32_43 = arith.constant 4 : i32
    %155 = arith.muli %154, %c4_i32_43 : i32
    %c0_i32_44 = arith.constant 0 : i32
    %156 = arith.addi %155, %c0_i32_44 : i32
    %157 = arith.index_cast %156 : i32 to index
    %158 = memref.load %arg4[%157] : memref<24xf32, #tpu.memory_space<smem>>
    %c0_i32_45 = arith.constant 0 : i32
    %159 = arith.addi %c0_i32_45, %arg0 : i32
    %c4_i32_46 = arith.constant 4 : i32
    %160 = arith.muli %159, %c4_i32_46 : i32
    %c1_i32_47 = arith.constant 1 : i32
    %161 = arith.addi %160, %c1_i32_47 : i32
    %162 = arith.index_cast %161 : i32 to index
    %163 = memref.load %arg4[%162] : memref<24xf32, #tpu.memory_space<smem>>
    %c0_i32_48 = arith.constant 0 : i32
    %164 = arith.addi %c0_i32_48, %arg0 : i32
    %c4_i32_49 = arith.constant 4 : i32
    %165 = arith.muli %164, %c4_i32_49 : i32
    %c2_i32_50 = arith.constant 2 : i32
    %166 = arith.addi %165, %c2_i32_50 : i32
    %167 = arith.index_cast %166 : i32 to index
    %168 = memref.load %arg4[%167] : memref<24xf32, #tpu.memory_space<smem>>
    %c0_i32_51 = arith.constant 0 : i32
    %169 = arith.addi %c0_i32_51, %arg0 : i32
    %c4_i32_52 = arith.constant 4 : i32
    %170 = arith.muli %169, %c4_i32_52 : i32
    %c3_i32_53 = arith.constant 3 : i32
    %171 = arith.addi %170, %c3_i32_53 : i32
    %172 = arith.index_cast %171 : i32 to index
    %173 = memref.load %arg4[%172] : memref<24xf32, #tpu.memory_space<smem>>
    %174 = vector.broadcast %163 : f32 to vector<1x128xf32>
    %175 = arith.mulf %174, %2 : vector<1x128xf32>
    %176 = vector.broadcast %168 : f32 to vector<1x128xf32>
    %177 = arith.mulf %176, %4 : vector<1x128xf32>
    %178 = arith.addf %175, %177 : vector<1x128xf32>
    %179 = vector.broadcast %173 : f32 to vector<1x128xf32>
    %180 = arith.mulf %179, %6 : vector<1x128xf32>
    %181 = arith.addf %178, %180 : vector<1x128xf32>
    %cst_54 = arith.constant 0.000000e+00 : f32
    %182 = vector.broadcast %cst_54 : f32 to vector<1x128xf32>
    %183 = arith.subf %182, %181 : vector<1x128xf32>
    %184 = vector.broadcast %158 : f32 to vector<1x128xf32>
    %185 = arith.mulf %184, %2 : vector<1x128xf32>
    %186 = vector.broadcast %168 : f32 to vector<1x128xf32>
    %187 = arith.mulf %186, %6 : vector<1x128xf32>
    %188 = vector.broadcast %173 : f32 to vector<1x128xf32>
    %189 = arith.mulf %188, %4 : vector<1x128xf32>
    %190 = arith.subf %187, %189 : vector<1x128xf32>
    %191 = arith.addf %185, %190 : vector<1x128xf32>
    %192 = vector.broadcast %158 : f32 to vector<1x128xf32>
    %193 = arith.mulf %192, %4 : vector<1x128xf32>
    %194 = vector.broadcast %173 : f32 to vector<1x128xf32>
    %195 = arith.mulf %194, %2 : vector<1x128xf32>
    %196 = vector.broadcast %163 : f32 to vector<1x128xf32>
    %197 = arith.mulf %196, %6 : vector<1x128xf32>
    %198 = arith.subf %195, %197 : vector<1x128xf32>
    %199 = arith.addf %193, %198 : vector<1x128xf32>
    %200 = vector.broadcast %158 : f32 to vector<1x128xf32>
    %201 = arith.mulf %200, %6 : vector<1x128xf32>
    %202 = vector.broadcast %163 : f32 to vector<1x128xf32>
    %203 = arith.mulf %202, %4 : vector<1x128xf32>
    %204 = vector.broadcast %168 : f32 to vector<1x128xf32>
    %205 = arith.mulf %204, %2 : vector<1x128xf32>
    %206 = arith.subf %203, %205 : vector<1x128xf32>
    %207 = arith.addf %201, %206 : vector<1x128xf32>
    %cst_55 = arith.constant 0.000000e+00 : f32
    %208 = vector.broadcast %cst_55 : f32 to vector<1x128xf32>
    %209 = arith.subf %208, %183 : vector<1x128xf32>
    %210 = vector.broadcast %163 : f32 to vector<1x128xf32>
    %211 = arith.mulf %209, %210 : vector<1x128xf32>
    %212 = vector.broadcast %158 : f32 to vector<1x128xf32>
    %213 = arith.mulf %212, %191 : vector<1x128xf32>
    %214 = arith.addf %211, %213 : vector<1x128xf32>
    %cst_56 = arith.constant 0.000000e+00 : f32
    %215 = vector.broadcast %cst_56 : f32 to vector<1x128xf32>
    %216 = arith.subf %215, %199 : vector<1x128xf32>
    %217 = vector.broadcast %173 : f32 to vector<1x128xf32>
    %218 = arith.mulf %216, %217 : vector<1x128xf32>
    %219 = vector.broadcast %168 : f32 to vector<1x128xf32>
    %220 = arith.mulf %207, %219 : vector<1x128xf32>
    %221 = arith.addf %218, %220 : vector<1x128xf32>
    %222 = arith.addf %214, %221 : vector<1x128xf32>
    %cst_57 = arith.constant 0.000000e+00 : f32
    %223 = vector.broadcast %cst_57 : f32 to vector<1x128xf32>
    %224 = arith.subf %223, %183 : vector<1x128xf32>
    %225 = vector.broadcast %168 : f32 to vector<1x128xf32>
    %226 = arith.mulf %224, %225 : vector<1x128xf32>
    %227 = vector.broadcast %158 : f32 to vector<1x128xf32>
    %228 = arith.mulf %227, %199 : vector<1x128xf32>
    %229 = arith.addf %226, %228 : vector<1x128xf32>
    %cst_58 = arith.constant 0.000000e+00 : f32
    %230 = vector.broadcast %cst_58 : f32 to vector<1x128xf32>
    %231 = arith.subf %230, %207 : vector<1x128xf32>
    %232 = vector.broadcast %163 : f32 to vector<1x128xf32>
    %233 = arith.mulf %231, %232 : vector<1x128xf32>
    %234 = vector.broadcast %173 : f32 to vector<1x128xf32>
    %235 = arith.mulf %191, %234 : vector<1x128xf32>
    %236 = arith.addf %233, %235 : vector<1x128xf32>
    %237 = arith.addf %229, %236 : vector<1x128xf32>
    %cst_59 = arith.constant 0.000000e+00 : f32
    %238 = vector.broadcast %cst_59 : f32 to vector<1x128xf32>
    %239 = arith.subf %238, %183 : vector<1x128xf32>
    %240 = vector.broadcast %173 : f32 to vector<1x128xf32>
    %241 = arith.mulf %239, %240 : vector<1x128xf32>
    %242 = vector.broadcast %158 : f32 to vector<1x128xf32>
    %243 = arith.mulf %242, %207 : vector<1x128xf32>
    %244 = arith.addf %241, %243 : vector<1x128xf32>
    %cst_60 = arith.constant 0.000000e+00 : f32
    %245 = vector.broadcast %cst_60 : f32 to vector<1x128xf32>
    %246 = arith.subf %245, %191 : vector<1x128xf32>
    %247 = vector.broadcast %168 : f32 to vector<1x128xf32>
    %248 = arith.mulf %246, %247 : vector<1x128xf32>
    %249 = vector.broadcast %163 : f32 to vector<1x128xf32>
    %250 = arith.mulf %199, %249 : vector<1x128xf32>
    %251 = arith.addf %248, %250 : vector<1x128xf32>
    %252 = arith.addf %244, %251 : vector<1x128xf32>
    %c2_i32_61 = arith.constant 2 : i32
    %253 = arith.addi %c2_i32_61, %arg0 : i32
    %c4_i32_62 = arith.constant 4 : i32
    %254 = arith.muli %253, %c4_i32_62 : i32
    %c0_i32_63 = arith.constant 0 : i32
    %255 = arith.addi %254, %c0_i32_63 : i32
    %256 = arith.index_cast %255 : i32 to index
    %257 = memref.load %arg4[%256] : memref<24xf32, #tpu.memory_space<smem>>
    %c2_i32_64 = arith.constant 2 : i32
    %258 = arith.addi %c2_i32_64, %arg0 : i32
    %c4_i32_65 = arith.constant 4 : i32
    %259 = arith.muli %258, %c4_i32_65 : i32
    %c1_i32_66 = arith.constant 1 : i32
    %260 = arith.addi %259, %c1_i32_66 : i32
    %261 = arith.index_cast %260 : i32 to index
    %262 = memref.load %arg4[%261] : memref<24xf32, #tpu.memory_space<smem>>
    %c2_i32_67 = arith.constant 2 : i32
    %263 = arith.addi %c2_i32_67, %arg0 : i32
    %c4_i32_68 = arith.constant 4 : i32
    %264 = arith.muli %263, %c4_i32_68 : i32
    %c2_i32_69 = arith.constant 2 : i32
    %265 = arith.addi %264, %c2_i32_69 : i32
    %266 = arith.index_cast %265 : i32 to index
    %267 = memref.load %arg4[%266] : memref<24xf32, #tpu.memory_space<smem>>
    %c2_i32_70 = arith.constant 2 : i32
    %268 = arith.addi %c2_i32_70, %arg0 : i32
    %c4_i32_71 = arith.constant 4 : i32
    %269 = arith.muli %268, %c4_i32_71 : i32
    %c3_i32_72 = arith.constant 3 : i32
    %270 = arith.addi %269, %c3_i32_72 : i32
    %271 = arith.index_cast %270 : i32 to index
    %272 = memref.load %arg4[%271] : memref<24xf32, #tpu.memory_space<smem>>
    %273 = vector.broadcast %262 : f32 to vector<1x128xf32>
    %274 = arith.mulf %273, %2 : vector<1x128xf32>
    %275 = vector.broadcast %267 : f32 to vector<1x128xf32>
    %276 = arith.mulf %275, %4 : vector<1x128xf32>
    %277 = arith.addf %274, %276 : vector<1x128xf32>
    %278 = vector.broadcast %272 : f32 to vector<1x128xf32>
    %279 = arith.mulf %278, %6 : vector<1x128xf32>
    %280 = arith.addf %277, %279 : vector<1x128xf32>
    %cst_73 = arith.constant 0.000000e+00 : f32
    %281 = vector.broadcast %cst_73 : f32 to vector<1x128xf32>
    %282 = arith.subf %281, %280 : vector<1x128xf32>
    %283 = vector.broadcast %257 : f32 to vector<1x128xf32>
    %284 = arith.mulf %283, %2 : vector<1x128xf32>
    %285 = vector.broadcast %267 : f32 to vector<1x128xf32>
    %286 = arith.mulf %285, %6 : vector<1x128xf32>
    %287 = vector.broadcast %272 : f32 to vector<1x128xf32>
    %288 = arith.mulf %287, %4 : vector<1x128xf32>
    %289 = arith.subf %286, %288 : vector<1x128xf32>
    %290 = arith.addf %284, %289 : vector<1x128xf32>
    %291 = vector.broadcast %257 : f32 to vector<1x128xf32>
    %292 = arith.mulf %291, %4 : vector<1x128xf32>
    %293 = vector.broadcast %272 : f32 to vector<1x128xf32>
    %294 = arith.mulf %293, %2 : vector<1x128xf32>
    %295 = vector.broadcast %262 : f32 to vector<1x128xf32>
    %296 = arith.mulf %295, %6 : vector<1x128xf32>
    %297 = arith.subf %294, %296 : vector<1x128xf32>
    %298 = arith.addf %292, %297 : vector<1x128xf32>
    %299 = vector.broadcast %257 : f32 to vector<1x128xf32>
    %300 = arith.mulf %299, %6 : vector<1x128xf32>
    %301 = vector.broadcast %262 : f32 to vector<1x128xf32>
    %302 = arith.mulf %301, %4 : vector<1x128xf32>
    %303 = vector.broadcast %267 : f32 to vector<1x128xf32>
    %304 = arith.mulf %303, %2 : vector<1x128xf32>
    %305 = arith.subf %302, %304 : vector<1x128xf32>
    %306 = arith.addf %300, %305 : vector<1x128xf32>
    %cst_74 = arith.constant 0.000000e+00 : f32
    %307 = vector.broadcast %cst_74 : f32 to vector<1x128xf32>
    %308 = arith.subf %307, %282 : vector<1x128xf32>
    %309 = vector.broadcast %262 : f32 to vector<1x128xf32>
    %310 = arith.mulf %308, %309 : vector<1x128xf32>
    %311 = vector.broadcast %257 : f32 to vector<1x128xf32>
    %312 = arith.mulf %311, %290 : vector<1x128xf32>
    %313 = arith.addf %310, %312 : vector<1x128xf32>
    %cst_75 = arith.constant 0.000000e+00 : f32
    %314 = vector.broadcast %cst_75 : f32 to vector<1x128xf32>
    %315 = arith.subf %314, %298 : vector<1x128xf32>
    %316 = vector.broadcast %272 : f32 to vector<1x128xf32>
    %317 = arith.mulf %315, %316 : vector<1x128xf32>
    %318 = vector.broadcast %267 : f32 to vector<1x128xf32>
    %319 = arith.mulf %306, %318 : vector<1x128xf32>
    %320 = arith.addf %317, %319 : vector<1x128xf32>
    %321 = arith.addf %313, %320 : vector<1x128xf32>
    %cst_76 = arith.constant 0.000000e+00 : f32
    %322 = vector.broadcast %cst_76 : f32 to vector<1x128xf32>
    %323 = arith.subf %322, %282 : vector<1x128xf32>
    %324 = vector.broadcast %267 : f32 to vector<1x128xf32>
    %325 = arith.mulf %323, %324 : vector<1x128xf32>
    %326 = vector.broadcast %257 : f32 to vector<1x128xf32>
    %327 = arith.mulf %326, %298 : vector<1x128xf32>
    %328 = arith.addf %325, %327 : vector<1x128xf32>
    %cst_77 = arith.constant 0.000000e+00 : f32
    %329 = vector.broadcast %cst_77 : f32 to vector<1x128xf32>
    %330 = arith.subf %329, %306 : vector<1x128xf32>
    %331 = vector.broadcast %262 : f32 to vector<1x128xf32>
    %332 = arith.mulf %330, %331 : vector<1x128xf32>
    %333 = vector.broadcast %272 : f32 to vector<1x128xf32>
    %334 = arith.mulf %290, %333 : vector<1x128xf32>
    %335 = arith.addf %332, %334 : vector<1x128xf32>
    %336 = arith.addf %328, %335 : vector<1x128xf32>
    %cst_78 = arith.constant 0.000000e+00 : f32
    %337 = vector.broadcast %cst_78 : f32 to vector<1x128xf32>
    %338 = arith.subf %337, %282 : vector<1x128xf32>
    %339 = vector.broadcast %272 : f32 to vector<1x128xf32>
    %340 = arith.mulf %338, %339 : vector<1x128xf32>
    %341 = vector.broadcast %257 : f32 to vector<1x128xf32>
    %342 = arith.mulf %341, %306 : vector<1x128xf32>
    %343 = arith.addf %340, %342 : vector<1x128xf32>
    %cst_79 = arith.constant 0.000000e+00 : f32
    %344 = vector.broadcast %cst_79 : f32 to vector<1x128xf32>
    %345 = arith.subf %344, %290 : vector<1x128xf32>
    %346 = vector.broadcast %267 : f32 to vector<1x128xf32>
    %347 = arith.mulf %345, %346 : vector<1x128xf32>
    %348 = vector.broadcast %262 : f32 to vector<1x128xf32>
    %349 = arith.mulf %298, %348 : vector<1x128xf32>
    %350 = arith.addf %347, %349 : vector<1x128xf32>
    %351 = arith.addf %343, %350 : vector<1x128xf32>
    %c4_i32_80 = arith.constant 4 : i32
    %352 = arith.addi %c4_i32_80, %arg0 : i32
    %c4_i32_81 = arith.constant 4 : i32
    %353 = arith.muli %352, %c4_i32_81 : i32
    %c0_i32_82 = arith.constant 0 : i32
    %354 = arith.addi %353, %c0_i32_82 : i32
    %355 = arith.index_cast %354 : i32 to index
    %356 = memref.load %arg4[%355] : memref<24xf32, #tpu.memory_space<smem>>
    %c4_i32_83 = arith.constant 4 : i32
    %357 = arith.addi %c4_i32_83, %arg0 : i32
    %c4_i32_84 = arith.constant 4 : i32
    %358 = arith.muli %357, %c4_i32_84 : i32
    %c1_i32_85 = arith.constant 1 : i32
    %359 = arith.addi %358, %c1_i32_85 : i32
    %360 = arith.index_cast %359 : i32 to index
    %361 = memref.load %arg4[%360] : memref<24xf32, #tpu.memory_space<smem>>
    %c4_i32_86 = arith.constant 4 : i32
    %362 = arith.addi %c4_i32_86, %arg0 : i32
    %c4_i32_87 = arith.constant 4 : i32
    %363 = arith.muli %362, %c4_i32_87 : i32
    %c2_i32_88 = arith.constant 2 : i32
    %364 = arith.addi %363, %c2_i32_88 : i32
    %365 = arith.index_cast %364 : i32 to index
    %366 = memref.load %arg4[%365] : memref<24xf32, #tpu.memory_space<smem>>
    %c4_i32_89 = arith.constant 4 : i32
    %367 = arith.addi %c4_i32_89, %arg0 : i32
    %c4_i32_90 = arith.constant 4 : i32
    %368 = arith.muli %367, %c4_i32_90 : i32
    %c3_i32_91 = arith.constant 3 : i32
    %369 = arith.addi %368, %c3_i32_91 : i32
    %370 = arith.index_cast %369 : i32 to index
    %371 = memref.load %arg4[%370] : memref<24xf32, #tpu.memory_space<smem>>
    %372 = vector.broadcast %361 : f32 to vector<1x128xf32>
    %373 = arith.mulf %372, %2 : vector<1x128xf32>
    %374 = vector.broadcast %366 : f32 to vector<1x128xf32>
    %375 = arith.mulf %374, %4 : vector<1x128xf32>
    %376 = arith.addf %373, %375 : vector<1x128xf32>
    %377 = vector.broadcast %371 : f32 to vector<1x128xf32>
    %378 = arith.mulf %377, %6 : vector<1x128xf32>
    %379 = arith.addf %376, %378 : vector<1x128xf32>
    %cst_92 = arith.constant 0.000000e+00 : f32
    %380 = vector.broadcast %cst_92 : f32 to vector<1x128xf32>
    %381 = arith.subf %380, %379 : vector<1x128xf32>
    %382 = vector.broadcast %356 : f32 to vector<1x128xf32>
    %383 = arith.mulf %382, %2 : vector<1x128xf32>
    %384 = vector.broadcast %366 : f32 to vector<1x128xf32>
    %385 = arith.mulf %384, %6 : vector<1x128xf32>
    %386 = vector.broadcast %371 : f32 to vector<1x128xf32>
    %387 = arith.mulf %386, %4 : vector<1x128xf32>
    %388 = arith.subf %385, %387 : vector<1x128xf32>
    %389 = arith.addf %383, %388 : vector<1x128xf32>
    %390 = vector.broadcast %356 : f32 to vector<1x128xf32>
    %391 = arith.mulf %390, %4 : vector<1x128xf32>
    %392 = vector.broadcast %371 : f32 to vector<1x128xf32>
    %393 = arith.mulf %392, %2 : vector<1x128xf32>
    %394 = vector.broadcast %361 : f32 to vector<1x128xf32>
    %395 = arith.mulf %394, %6 : vector<1x128xf32>
    %396 = arith.subf %393, %395 : vector<1x128xf32>
    %397 = arith.addf %391, %396 : vector<1x128xf32>
    %398 = vector.broadcast %356 : f32 to vector<1x128xf32>
    %399 = arith.mulf %398, %6 : vector<1x128xf32>
    %400 = vector.broadcast %361 : f32 to vector<1x128xf32>
    %401 = arith.mulf %400, %4 : vector<1x128xf32>
    %402 = vector.broadcast %366 : f32 to vector<1x128xf32>
    %403 = arith.mulf %402, %2 : vector<1x128xf32>
    %404 = arith.subf %401, %403 : vector<1x128xf32>
    %405 = arith.addf %399, %404 : vector<1x128xf32>
    %cst_93 = arith.constant 0.000000e+00 : f32
    %406 = vector.broadcast %cst_93 : f32 to vector<1x128xf32>
    %407 = arith.subf %406, %381 : vector<1x128xf32>
    %408 = vector.broadcast %361 : f32 to vector<1x128xf32>
    %409 = arith.mulf %407, %408 : vector<1x128xf32>
    %410 = vector.broadcast %356 : f32 to vector<1x128xf32>
    %411 = arith.mulf %410, %389 : vector<1x128xf32>
    %412 = arith.addf %409, %411 : vector<1x128xf32>
    %cst_94 = arith.constant 0.000000e+00 : f32
    %413 = vector.broadcast %cst_94 : f32 to vector<1x128xf32>
    %414 = arith.subf %413, %397 : vector<1x128xf32>
    %415 = vector.broadcast %371 : f32 to vector<1x128xf32>
    %416 = arith.mulf %414, %415 : vector<1x128xf32>
    %417 = vector.broadcast %366 : f32 to vector<1x128xf32>
    %418 = arith.mulf %405, %417 : vector<1x128xf32>
    %419 = arith.addf %416, %418 : vector<1x128xf32>
    %420 = arith.addf %412, %419 : vector<1x128xf32>
    %cst_95 = arith.constant 0.000000e+00 : f32
    %421 = vector.broadcast %cst_95 : f32 to vector<1x128xf32>
    %422 = arith.subf %421, %381 : vector<1x128xf32>
    %423 = vector.broadcast %366 : f32 to vector<1x128xf32>
    %424 = arith.mulf %422, %423 : vector<1x128xf32>
    %425 = vector.broadcast %356 : f32 to vector<1x128xf32>
    %426 = arith.mulf %425, %397 : vector<1x128xf32>
    %427 = arith.addf %424, %426 : vector<1x128xf32>
    %cst_96 = arith.constant 0.000000e+00 : f32
    %428 = vector.broadcast %cst_96 : f32 to vector<1x128xf32>
    %429 = arith.subf %428, %405 : vector<1x128xf32>
    %430 = vector.broadcast %361 : f32 to vector<1x128xf32>
    %431 = arith.mulf %429, %430 : vector<1x128xf32>
    %432 = vector.broadcast %371 : f32 to vector<1x128xf32>
    %433 = arith.mulf %389, %432 : vector<1x128xf32>
    %434 = arith.addf %431, %433 : vector<1x128xf32>
    %435 = arith.addf %427, %434 : vector<1x128xf32>
    %cst_97 = arith.constant 0.000000e+00 : f32
    %436 = vector.broadcast %cst_97 : f32 to vector<1x128xf32>
    %437 = arith.subf %436, %381 : vector<1x128xf32>
    %438 = vector.broadcast %371 : f32 to vector<1x128xf32>
    %439 = arith.mulf %437, %438 : vector<1x128xf32>
    %440 = vector.broadcast %356 : f32 to vector<1x128xf32>
    %441 = arith.mulf %440, %405 : vector<1x128xf32>
    %442 = arith.addf %439, %441 : vector<1x128xf32>
    %cst_98 = arith.constant 0.000000e+00 : f32
    %443 = vector.broadcast %cst_98 : f32 to vector<1x128xf32>
    %444 = arith.subf %443, %389 : vector<1x128xf32>
    %445 = vector.broadcast %366 : f32 to vector<1x128xf32>
    %446 = arith.mulf %444, %445 : vector<1x128xf32>
    %447 = vector.broadcast %361 : f32 to vector<1x128xf32>
    %448 = arith.mulf %397, %447 : vector<1x128xf32>
    %449 = arith.addf %446, %448 : vector<1x128xf32>
    %450 = arith.addf %442, %449 : vector<1x128xf32>
    %451 = tpu.concatenate %49, %98, %147, %222, %321, %420 in 1 : vector<1x128xf32>, vector<1x128xf32>, vector<1x128xf32>, vector<1x128xf32>, vector<1x128xf32>, vector<1x128xf32> -> vector<1x768xf32>
    %452 = tpu.concatenate %52, %101, %150, %237, %336, %435 in 1 : vector<1x128xf32>, vector<1x128xf32>, vector<1x128xf32>, vector<1x128xf32>, vector<1x128xf32>, vector<1x128xf32> -> vector<1x768xf32>
    %453 = tpu.concatenate %55, %104, %153, %252, %351, %450 in 1 : vector<1x128xf32>, vector<1x128xf32>, vector<1x128xf32>, vector<1x128xf32>, vector<1x128xf32>, vector<1x128xf32> -> vector<1x768xf32>
    %cst_99 = arith.constant 5.000000e-01 : f32
    %454 = vector.broadcast %cst_99 : f32 to vector<1x768xf32>
    %455 = arith.addf %451, %454 : vector<1x768xf32>
    %cst_100 = arith.constant 8.000000e+00 : f32
    %456 = vector.broadcast %cst_100 : f32 to vector<1x768xf32>
    %457 = arith.mulf %455, %456 : vector<1x768xf32>
    %458 = math.floor %457 : vector<1x768xf32>
    %cst_101 = arith.constant 0.000000e+00 : f32
    %cst_102 = arith.constant 7.000000e+00 : f32
    %459 = vector.broadcast %cst_101 : f32 to vector<1x768xf32>
    %460 = arith.maximumf %459, %458 : vector<1x768xf32>
    %461 = vector.broadcast %cst_102 : f32 to vector<1x768xf32>
    %462 = arith.minimumf %461, %460 : vector<1x768xf32>
    %463 = arith.fptosi %462 : vector<1x768xf32> to vector<1x768xi32>
    %c8_i32 = arith.constant 8 : i32
    %464 = vector.broadcast %c8_i32 : i32 to vector<1x768xi32>
    %465 = arith.muli %463, %464 : vector<1x768xi32>
    %cst_103 = arith.constant 5.000000e-01 : f32
    %466 = vector.broadcast %cst_103 : f32 to vector<1x768xf32>
    %467 = arith.addf %452, %466 : vector<1x768xf32>
    %cst_104 = arith.constant 8.000000e+00 : f32
    %468 = vector.broadcast %cst_104 : f32 to vector<1x768xf32>
    %469 = arith.mulf %467, %468 : vector<1x768xf32>
    %470 = math.floor %469 : vector<1x768xf32>
    %cst_105 = arith.constant 0.000000e+00 : f32
    %cst_106 = arith.constant 7.000000e+00 : f32
    %471 = vector.broadcast %cst_105 : f32 to vector<1x768xf32>
    %472 = arith.maximumf %471, %470 : vector<1x768xf32>
    %473 = vector.broadcast %cst_106 : f32 to vector<1x768xf32>
    %474 = arith.minimumf %473, %472 : vector<1x768xf32>
    %475 = arith.fptosi %474 : vector<1x768xf32> to vector<1x768xi32>
    %476 = arith.addi %465, %475 : vector<1x768xi32>
    %c8_i32_107 = arith.constant 8 : i32
    %477 = vector.broadcast %c8_i32_107 : i32 to vector<1x768xi32>
    %478 = arith.muli %476, %477 : vector<1x768xi32>
    %cst_108 = arith.constant 5.000000e-01 : f32
    %479 = vector.broadcast %cst_108 : f32 to vector<1x768xf32>
    %480 = arith.addf %453, %479 : vector<1x768xf32>
    %cst_109 = arith.constant 8.000000e+00 : f32
    %481 = vector.broadcast %cst_109 : f32 to vector<1x768xf32>
    %482 = arith.mulf %480, %481 : vector<1x768xf32>
    %483 = math.floor %482 : vector<1x768xf32>
    %cst_110 = arith.constant 0.000000e+00 : f32
    %cst_111 = arith.constant 7.000000e+00 : f32
    %484 = vector.broadcast %cst_110 : f32 to vector<1x768xf32>
    %485 = arith.maximumf %484, %483 : vector<1x768xf32>
    %486 = vector.broadcast %cst_111 : f32 to vector<1x768xf32>
    %487 = arith.minimumf %486, %485 : vector<1x768xf32>
    %488 = arith.fptosi %487 : vector<1x768xf32> to vector<1x768xi32>
    %489 = arith.addi %478, %488 : vector<1x768xi32>
    %cst_112 = arith.constant 0.000000e+00 : f32
    %490 = vector.broadcast %cst_112 : f32 to vector<6x768xf32>
    %c0_113 = arith.constant 0 : index
    %c0_114 = arith.constant 0 : index
    %c0_115 = arith.constant 0 : index
    %491 = vector.load %arg2[%c0_113, %c0_114, %c0_115] : memref<1x6x512xbf16, #tpu.memory_space<vmem>>, vector<1x6x512xbf16>
    %492 = vector.shape_cast %491 : vector<1x6x512xbf16> to vector<6x512xbf16>
    %c0_i32_116 = arith.constant 0 : i32
    %493 = vector.broadcast %c0_i32_116 : i32 to vector<512x1xi32>
    %494 = arith.addi %0, %493 : vector<512x1xi32>
    %495 = vector.broadcast %494 : vector<512x1xi32> to vector<512x768xi32>
    %496 = vector.broadcast %489 : vector<1x768xi32> to vector<512x768xi32>
    %497 = arith.cmpi eq, %495, %496 : vector<512x768xi32>
    %498 = arith.extui %497 : vector<512x768xi1> to vector<512x768xi32>
    %499 = arith.sitofp %498 : vector<512x768xi32> to vector<512x768xf32>
    %500 = arith.truncf %499 : vector<512x768xf32> to vector<512x768xbf16>
    %cst_117 = arith.constant dense<0.000000e+00> : vector<6x768xf32>
    %501 = tpu.matmul %492, %500, %cst_117 {dimension_numbers = #tpu.dot_dimension_numbers<[1], [0], [0], [1], [0, 0, 1, 1], [], []>} : vector<6x512xbf16>, vector<512x768xbf16>, vector<6x768xf32> -> vector<6x768xf32>
    %502 = arith.addf %490, %501 : vector<6x768xf32>
    %503 = vector.extract_strided_slice %502 {offsets = [0, 0], sizes = [1, 768], strides = [1, 1]} : vector<6x768xf32> to vector<1x768xf32>
    %504 = vector.extract_strided_slice %502 {offsets = [3, 0], sizes = [1, 768], strides = [1, 1]} : vector<6x768xf32> to vector<1x768xf32>
    %505 = arith.addf %503, %504 : vector<1x768xf32>
    %506 = vector.extract_strided_slice %502 {offsets = [1, 0], sizes = [1, 768], strides = [1, 1]} : vector<6x768xf32> to vector<1x768xf32>
    %507 = vector.extract_strided_slice %502 {offsets = [4, 0], sizes = [1, 768], strides = [1, 1]} : vector<6x768xf32> to vector<1x768xf32>
    %508 = arith.addf %506, %507 : vector<1x768xf32>
    %509 = vector.extract_strided_slice %502 {offsets = [2, 0], sizes = [1, 768], strides = [1, 1]} : vector<6x768xf32> to vector<1x768xf32>
    %510 = vector.extract_strided_slice %502 {offsets = [5, 0], sizes = [1, 768], strides = [1, 1]} : vector<6x768xf32> to vector<1x768xf32>
    %511 = arith.addf %509, %510 : vector<1x768xf32>
    %512 = arith.subf %451, %505 : vector<1x768xf32>
    %513 = arith.mulf %512, %512 : vector<1x768xf32>
    %514 = arith.subf %452, %508 : vector<1x768xf32>
    %515 = arith.mulf %514, %514 : vector<1x768xf32>
    %516 = arith.addf %513, %515 : vector<1x768xf32>
    %517 = arith.subf %453, %511 : vector<1x768xf32>
    %518 = arith.mulf %517, %517 : vector<1x768xf32>
    %519 = arith.addf %516, %518 : vector<1x768xf32>
    %520 = vector.extract_strided_slice %519 {offsets = [0, 0], sizes = [1, 128], strides = [1, 1]} : vector<1x768xf32> to vector<1x128xf32>
    %521 = vector.shape_cast %520 : vector<1x128xf32> to vector<1x1x128xf32>
    %cst_118 = arith.constant dense<0.000000e+00> : vector<1xf32>
    %522 = vector.multi_reduction <add>, %521, %cst_118 [1, 2] : vector<1x1x128xf32> to vector<1xf32>
    %523 = vector.shape_cast %522 : vector<1xf32> to vector<1x1x1xf32>
    %524 = vector.extract %523[0, 0, 0] : f32 from vector<1x1x1xf32>
    %525 = vector.broadcast %524 : f32 to vector<1x1xf32>
    %526 = vector.extract_strided_slice %519 {offsets = [0, 128], sizes = [1, 128], strides = [1, 1]} : vector<1x768xf32> to vector<1x128xf32>
    %527 = vector.shape_cast %526 : vector<1x128xf32> to vector<1x1x128xf32>
    %cst_119 = arith.constant dense<0.000000e+00> : vector<1xf32>
    %528 = vector.multi_reduction <add>, %527, %cst_119 [1, 2] : vector<1x1x128xf32> to vector<1xf32>
    %529 = vector.shape_cast %528 : vector<1xf32> to vector<1x1x1xf32>
    %530 = vector.extract %529[0, 0, 0] : f32 from vector<1x1x1xf32>
    %531 = vector.broadcast %530 : f32 to vector<1x1xf32>
    %532 = vector.extract_strided_slice %519 {offsets = [0, 256], sizes = [1, 128], strides = [1, 1]} : vector<1x768xf32> to vector<1x128xf32>
    %533 = vector.shape_cast %532 : vector<1x128xf32> to vector<1x1x128xf32>
    %cst_120 = arith.constant dense<0.000000e+00> : vector<1xf32>
    %534 = vector.multi_reduction <add>, %533, %cst_120 [1, 2] : vector<1x1x128xf32> to vector<1xf32>
    %535 = vector.shape_cast %534 : vector<1xf32> to vector<1x1x1xf32>
    %536 = vector.extract %535[0, 0, 0] : f32 from vector<1x1x1xf32>
    %537 = vector.broadcast %536 : f32 to vector<1x1xf32>
    %538 = vector.extract_strided_slice %519 {offsets = [0, 384], sizes = [1, 128], strides = [1, 1]} : vector<1x768xf32> to vector<1x128xf32>
    %539 = vector.shape_cast %538 : vector<1x128xf32> to vector<1x1x128xf32>
    %cst_121 = arith.constant dense<0.000000e+00> : vector<1xf32>
    %540 = vector.multi_reduction <add>, %539, %cst_121 [1, 2] : vector<1x1x128xf32> to vector<1xf32>
    %541 = vector.shape_cast %540 : vector<1xf32> to vector<1x1x1xf32>
    %542 = vector.extract %541[0, 0, 0] : f32 from vector<1x1x1xf32>
    %543 = vector.broadcast %542 : f32 to vector<1x1xf32>
    %544 = vector.extract_strided_slice %519 {offsets = [0, 512], sizes = [1, 128], strides = [1, 1]} : vector<1x768xf32> to vector<1x128xf32>
    %545 = vector.shape_cast %544 : vector<1x128xf32> to vector<1x1x128xf32>
    %cst_122 = arith.constant dense<0.000000e+00> : vector<1xf32>
    %546 = vector.multi_reduction <add>, %545, %cst_122 [1, 2] : vector<1x1x128xf32> to vector<1xf32>
    %547 = vector.shape_cast %546 : vector<1xf32> to vector<1x1x1xf32>
    %548 = vector.extract %547[0, 0, 0] : f32 from vector<1x1x1xf32>
    %549 = vector.broadcast %548 : f32 to vector<1x1xf32>
    %550 = vector.extract_strided_slice %519 {offsets = [0, 640], sizes = [1, 128], strides = [1, 1]} : vector<1x768xf32> to vector<1x128xf32>
    %551 = vector.shape_cast %550 : vector<1x128xf32> to vector<1x1x128xf32>
    %cst_123 = arith.constant dense<0.000000e+00> : vector<1xf32>
    %552 = vector.multi_reduction <add>, %551, %cst_123 [1, 2] : vector<1x1x128xf32> to vector<1xf32>
    %553 = vector.shape_cast %552 : vector<1xf32> to vector<1x1x1xf32>
    %554 = vector.extract %553[0, 0, 0] : f32 from vector<1x1x1xf32>
    %555 = vector.broadcast %554 : f32 to vector<1x1xf32>
    %cst_124 = arith.constant 0.000000e+00 : f32
    %556 = vector.broadcast %cst_124 : f32 to vector<1x1xf32>
    %c0_i32_125 = arith.constant 0 : i32
    %557 = arith.addi %c0_i32_125, %arg0 : i32
    %c4_i32_126 = arith.constant 4 : i32
    %558 = arith.muli %557, %c4_i32_126 : i32
    %c0_i32_127 = arith.constant 0 : i32
    %559 = arith.addi %558, %c0_i32_127 : i32
    %560 = arith.index_cast %559 : i32 to index
    %561 = memref.load %arg3[%560] : memref<24xf32, #tpu.memory_space<smem>>
    %c0_i32_128 = arith.constant 0 : i32
    %562 = arith.addi %c0_i32_128, %arg0 : i32
    %c4_i32_129 = arith.constant 4 : i32
    %563 = arith.muli %562, %c4_i32_129 : i32
    %c1_i32_130 = arith.constant 1 : i32
    %564 = arith.addi %563, %c1_i32_130 : i32
    %565 = arith.index_cast %564 : i32 to index
    %566 = memref.load %arg3[%565] : memref<24xf32, #tpu.memory_space<smem>>
    %c0_i32_131 = arith.constant 0 : i32
    %567 = arith.addi %c0_i32_131, %arg0 : i32
    %c4_i32_132 = arith.constant 4 : i32
    %568 = arith.muli %567, %c4_i32_132 : i32
    %c2_i32_133 = arith.constant 2 : i32
    %569 = arith.addi %568, %c2_i32_133 : i32
    %570 = arith.index_cast %569 : i32 to index
    %571 = memref.load %arg3[%570] : memref<24xf32, #tpu.memory_space<smem>>
    %c2_i32_134 = arith.constant 2 : i32
    %572 = arith.addi %c2_i32_134, %arg0 : i32
    %c4_i32_135 = arith.constant 4 : i32
    %573 = arith.muli %572, %c4_i32_135 : i32
    %c0_i32_136 = arith.constant 0 : i32
    %574 = arith.addi %573, %c0_i32_136 : i32
    %575 = arith.index_cast %574 : i32 to index
    %576 = memref.load %arg3[%575] : memref<24xf32, #tpu.memory_space<smem>>
    %c2_i32_137 = arith.constant 2 : i32
    %577 = arith.addi %c2_i32_137, %arg0 : i32
    %c4_i32_138 = arith.constant 4 : i32
    %578 = arith.muli %577, %c4_i32_138 : i32
    %c1_i32_139 = arith.constant 1 : i32
    %579 = arith.addi %578, %c1_i32_139 : i32
    %580 = arith.index_cast %579 : i32 to index
    %581 = memref.load %arg3[%580] : memref<24xf32, #tpu.memory_space<smem>>
    %c2_i32_140 = arith.constant 2 : i32
    %582 = arith.addi %c2_i32_140, %arg0 : i32
    %c4_i32_141 = arith.constant 4 : i32
    %583 = arith.muli %582, %c4_i32_141 : i32
    %c2_i32_142 = arith.constant 2 : i32
    %584 = arith.addi %583, %c2_i32_142 : i32
    %585 = arith.index_cast %584 : i32 to index
    %586 = memref.load %arg3[%585] : memref<24xf32, #tpu.memory_space<smem>>
    %c4_i32_143 = arith.constant 4 : i32
    %587 = arith.addi %c4_i32_143, %arg0 : i32
    %c4_i32_144 = arith.constant 4 : i32
    %588 = arith.muli %587, %c4_i32_144 : i32
    %c0_i32_145 = arith.constant 0 : i32
    %589 = arith.addi %588, %c0_i32_145 : i32
    %590 = arith.index_cast %589 : i32 to index
    %591 = memref.load %arg3[%590] : memref<24xf32, #tpu.memory_space<smem>>
    %c4_i32_146 = arith.constant 4 : i32
    %592 = arith.addi %c4_i32_146, %arg0 : i32
    %c4_i32_147 = arith.constant 4 : i32
    %593 = arith.muli %592, %c4_i32_147 : i32
    %c1_i32_148 = arith.constant 1 : i32
    %594 = arith.addi %593, %c1_i32_148 : i32
    %595 = arith.index_cast %594 : i32 to index
    %596 = memref.load %arg3[%595] : memref<24xf32, #tpu.memory_space<smem>>
    %c4_i32_149 = arith.constant 4 : i32
    %597 = arith.addi %c4_i32_149, %arg0 : i32
    %c4_i32_150 = arith.constant 4 : i32
    %598 = arith.muli %597, %c4_i32_150 : i32
    %c2_i32_151 = arith.constant 2 : i32
    %599 = arith.addi %598, %c2_i32_151 : i32
    %600 = arith.index_cast %599 : i32 to index
    %601 = memref.load %arg3[%600] : memref<24xf32, #tpu.memory_space<smem>>
    %c0_i32_152 = arith.constant 0 : i32
    %602 = arith.addi %c0_i32_152, %arg0 : i32
    %c4_i32_153 = arith.constant 4 : i32
    %603 = arith.muli %602, %c4_i32_153 : i32
    %c1_i32_154 = arith.constant 1 : i32
    %604 = arith.addi %603, %c1_i32_154 : i32
    %605 = arith.index_cast %604 : i32 to index
    %606 = memref.load %arg4[%605] : memref<24xf32, #tpu.memory_space<smem>>
    %c0_i32_155 = arith.constant 0 : i32
    %607 = arith.addi %c0_i32_155, %arg0 : i32
    %c4_i32_156 = arith.constant 4 : i32
    %608 = arith.muli %607, %c4_i32_156 : i32
    %c2_i32_157 = arith.constant 2 : i32
    %609 = arith.addi %608, %c2_i32_157 : i32
    %610 = arith.index_cast %609 : i32 to index
    %611 = memref.load %arg4[%610] : memref<24xf32, #tpu.memory_space<smem>>
    %c0_i32_158 = arith.constant 0 : i32
    %612 = arith.addi %c0_i32_158, %arg0 : i32
    %c4_i32_159 = arith.constant 4 : i32
    %613 = arith.muli %612, %c4_i32_159 : i32
    %c3_i32_160 = arith.constant 3 : i32
    %614 = arith.addi %613, %c3_i32_160 : i32
    %615 = arith.index_cast %614 : i32 to index
    %616 = memref.load %arg4[%615] : memref<24xf32, #tpu.memory_space<smem>>
    %c2_i32_161 = arith.constant 2 : i32
    %617 = arith.addi %c2_i32_161, %arg0 : i32
    %c4_i32_162 = arith.constant 4 : i32
    %618 = arith.muli %617, %c4_i32_162 : i32
    %c1_i32_163 = arith.constant 1 : i32
    %619 = arith.addi %618, %c1_i32_163 : i32
    %620 = arith.index_cast %619 : i32 to index
    %621 = memref.load %arg4[%620] : memref<24xf32, #tpu.memory_space<smem>>
    %c2_i32_164 = arith.constant 2 : i32
    %622 = arith.addi %c2_i32_164, %arg0 : i32
    %c4_i32_165 = arith.constant 4 : i32
    %623 = arith.muli %622, %c4_i32_165 : i32
    %c2_i32_166 = arith.constant 2 : i32
    %624 = arith.addi %623, %c2_i32_166 : i32
    %625 = arith.index_cast %624 : i32 to index
    %626 = memref.load %arg4[%625] : memref<24xf32, #tpu.memory_space<smem>>
    %c2_i32_167 = arith.constant 2 : i32
    %627 = arith.addi %c2_i32_167, %arg0 : i32
    %c4_i32_168 = arith.constant 4 : i32
    %628 = arith.muli %627, %c4_i32_168 : i32
    %c3_i32_169 = arith.constant 3 : i32
    %629 = arith.addi %628, %c3_i32_169 : i32
    %630 = arith.index_cast %629 : i32 to index
    %631 = memref.load %arg4[%630] : memref<24xf32, #tpu.memory_space<smem>>
    %c4_i32_170 = arith.constant 4 : i32
    %632 = arith.addi %c4_i32_170, %arg0 : i32
    %c4_i32_171 = arith.constant 4 : i32
    %633 = arith.muli %632, %c4_i32_171 : i32
    %c1_i32_172 = arith.constant 1 : i32
    %634 = arith.addi %633, %c1_i32_172 : i32
    %635 = arith.index_cast %634 : i32 to index
    %636 = memref.load %arg4[%635] : memref<24xf32, #tpu.memory_space<smem>>
    %c4_i32_173 = arith.constant 4 : i32
    %637 = arith.addi %c4_i32_173, %arg0 : i32
    %c4_i32_174 = arith.constant 4 : i32
    %638 = arith.muli %637, %c4_i32_174 : i32
    %c2_i32_175 = arith.constant 2 : i32
    %639 = arith.addi %638, %c2_i32_175 : i32
    %640 = arith.index_cast %639 : i32 to index
    %641 = memref.load %arg4[%640] : memref<24xf32, #tpu.memory_space<smem>>
    %c4_i32_176 = arith.constant 4 : i32
    %642 = arith.addi %c4_i32_176, %arg0 : i32
    %c4_i32_177 = arith.constant 4 : i32
    %643 = arith.muli %642, %c4_i32_177 : i32
    %c3_i32_178 = arith.constant 3 : i32
    %644 = arith.addi %643, %c3_i32_178 : i32
    %645 = arith.index_cast %644 : i32 to index
    %646 = memref.load %arg4[%645] : memref<24xf32, #tpu.memory_space<smem>>
    %647 = arith.mulf %561, %561 : f32
    %648 = arith.mulf %566, %566 : f32
    %649 = arith.addf %647, %648 : f32
    %650 = arith.mulf %571, %571 : f32
    %651 = arith.addf %649, %650 : f32
    %652 = arith.mulf %576, %576 : f32
    %653 = arith.mulf %581, %581 : f32
    %654 = arith.addf %652, %653 : f32
    %655 = arith.mulf %586, %586 : f32
    %656 = arith.addf %654, %655 : f32
    %657 = arith.mulf %591, %591 : f32
    %658 = arith.mulf %596, %596 : f32
    %659 = arith.addf %657, %658 : f32
    %660 = arith.mulf %601, %601 : f32
    %661 = arith.addf %659, %660 : f32
    %662 = vector.broadcast %651 : f32 to vector<1x1xf32>
    %cst_179 = arith.constant 1.000000e+00 : f32
    %663 = vector.broadcast %cst_179 : f32 to vector<1x1xf32>
    %664 = arith.divf %663, %662 : vector<1x1xf32>
    %665 = vector.broadcast %656 : f32 to vector<1x1xf32>
    %cst_180 = arith.constant 1.000000e+00 : f32
    %666 = vector.broadcast %cst_180 : f32 to vector<1x1xf32>
    %667 = arith.divf %666, %665 : vector<1x1xf32>
    %668 = vector.broadcast %661 : f32 to vector<1x1xf32>
    %cst_181 = arith.constant 1.000000e+00 : f32
    %669 = vector.broadcast %cst_181 : f32 to vector<1x1xf32>
    %670 = arith.divf %669, %668 : vector<1x1xf32>
    %671 = arith.mulf %606, %606 : f32
    %672 = arith.mulf %611, %611 : f32
    %673 = arith.addf %671, %672 : f32
    %674 = arith.mulf %616, %616 : f32
    %675 = arith.addf %673, %674 : f32
    %cst_182 = arith.constant 1.000000e+00 : f32
    %676 = arith.subf %675, %cst_182 : f32
    %677 = arith.mulf %676, %676 : f32
    %cst_183 = arith.constant 0.000000e+00 : f32
    %678 = arith.addf %cst_183, %677 : f32
    %679 = arith.mulf %561, %576 : f32
    %680 = arith.mulf %566, %581 : f32
    %681 = arith.addf %679, %680 : f32
    %682 = arith.mulf %571, %586 : f32
    %683 = arith.addf %681, %682 : f32
    %684 = arith.mulf %683, %683 : f32
    %685 = vector.broadcast %684 : f32 to vector<1x1xf32>
    %686 = arith.mulf %685, %664 : vector<1x1xf32>
    %687 = arith.mulf %686, %667 : vector<1x1xf32>
    %688 = arith.addf %556, %687 : vector<1x1xf32>
    %689 = arith.mulf %606, %621 : f32
    %690 = arith.mulf %611, %626 : f32
    %691 = arith.addf %689, %690 : f32
    %692 = arith.mulf %616, %631 : f32
    %693 = arith.addf %691, %692 : f32
    %cst_184 = arith.constant 0.000000e+00 : f32
    %694 = arith.subf %693, %cst_184 : f32
    %695 = arith.mulf %694, %694 : f32
    %696 = arith.addf %678, %695 : f32
    %697 = arith.mulf %561, %591 : f32
    %698 = arith.mulf %566, %596 : f32
    %699 = arith.addf %697, %698 : f32
    %700 = arith.mulf %571, %601 : f32
    %701 = arith.addf %699, %700 : f32
    %702 = arith.mulf %701, %701 : f32
    %703 = vector.broadcast %702 : f32 to vector<1x1xf32>
    %704 = arith.mulf %703, %664 : vector<1x1xf32>
    %705 = arith.mulf %704, %670 : vector<1x1xf32>
    %706 = arith.addf %688, %705 : vector<1x1xf32>
    %707 = arith.mulf %606, %636 : f32
    %708 = arith.mulf %611, %641 : f32
    %709 = arith.addf %707, %708 : f32
    %710 = arith.mulf %616, %646 : f32
    %711 = arith.addf %709, %710 : f32
    %cst_185 = arith.constant 0.000000e+00 : f32
    %712 = arith.subf %711, %cst_185 : f32
    %713 = arith.mulf %712, %712 : f32
    %714 = arith.addf %696, %713 : f32
    %715 = arith.mulf %576, %561 : f32
    %716 = arith.mulf %581, %566 : f32
    %717 = arith.addf %715, %716 : f32
    %718 = arith.mulf %586, %571 : f32
    %719 = arith.addf %717, %718 : f32
    %720 = arith.mulf %719, %719 : f32
    %721 = vector.broadcast %720 : f32 to vector<1x1xf32>
    %722 = arith.mulf %721, %667 : vector<1x1xf32>
    %723 = arith.mulf %722, %664 : vector<1x1xf32>
    %724 = arith.addf %706, %723 : vector<1x1xf32>
    %725 = arith.mulf %621, %606 : f32
    %726 = arith.mulf %626, %611 : f32
    %727 = arith.addf %725, %726 : f32
    %728 = arith.mulf %631, %616 : f32
    %729 = arith.addf %727, %728 : f32
    %cst_186 = arith.constant 0.000000e+00 : f32
    %730 = arith.subf %729, %cst_186 : f32
    %731 = arith.mulf %730, %730 : f32
    %732 = arith.addf %714, %731 : f32
    %733 = arith.mulf %621, %621 : f32
    %734 = arith.mulf %626, %626 : f32
    %735 = arith.addf %733, %734 : f32
    %736 = arith.mulf %631, %631 : f32
    %737 = arith.addf %735, %736 : f32
    %cst_187 = arith.constant 1.000000e+00 : f32
    %738 = arith.subf %737, %cst_187 : f32
    %739 = arith.mulf %738, %738 : f32
    %740 = arith.addf %732, %739 : f32
    %741 = arith.mulf %576, %591 : f32
    %742 = arith.mulf %581, %596 : f32
    %743 = arith.addf %741, %742 : f32
    %744 = arith.mulf %586, %601 : f32
    %745 = arith.addf %743, %744 : f32
    %746 = arith.mulf %745, %745 : f32
    %747 = vector.broadcast %746 : f32 to vector<1x1xf32>
    %748 = arith.mulf %747, %667 : vector<1x1xf32>
    %749 = arith.mulf %748, %670 : vector<1x1xf32>
    %750 = arith.addf %724, %749 : vector<1x1xf32>
    %751 = arith.mulf %621, %636 : f32
    %752 = arith.mulf %626, %641 : f32
    %753 = arith.addf %751, %752 : f32
    %754 = arith.mulf %631, %646 : f32
    %755 = arith.addf %753, %754 : f32
    %cst_188 = arith.constant 0.000000e+00 : f32
    %756 = arith.subf %755, %cst_188 : f32
    %757 = arith.mulf %756, %756 : f32
    %758 = arith.addf %740, %757 : f32
    %759 = arith.mulf %591, %561 : f32
    %760 = arith.mulf %596, %566 : f32
    %761 = arith.addf %759, %760 : f32
    %762 = arith.mulf %601, %571 : f32
    %763 = arith.addf %761, %762 : f32
    %764 = arith.mulf %763, %763 : f32
    %765 = vector.broadcast %764 : f32 to vector<1x1xf32>
    %766 = arith.mulf %765, %670 : vector<1x1xf32>
    %767 = arith.mulf %766, %664 : vector<1x1xf32>
    %768 = arith.addf %750, %767 : vector<1x1xf32>
    %769 = arith.mulf %636, %606 : f32
    %770 = arith.mulf %641, %611 : f32
    %771 = arith.addf %769, %770 : f32
    %772 = arith.mulf %646, %616 : f32
    %773 = arith.addf %771, %772 : f32
    %cst_189 = arith.constant 0.000000e+00 : f32
    %774 = arith.subf %773, %cst_189 : f32
    %775 = arith.mulf %774, %774 : f32
    %776 = arith.addf %758, %775 : f32
    %777 = arith.mulf %591, %576 : f32
    %778 = arith.mulf %596, %581 : f32
    %779 = arith.addf %777, %778 : f32
    %780 = arith.mulf %601, %586 : f32
    %781 = arith.addf %779, %780 : f32
    %782 = arith.mulf %781, %781 : f32
    %783 = vector.broadcast %782 : f32 to vector<1x1xf32>
    %784 = arith.mulf %783, %670 : vector<1x1xf32>
    %785 = arith.mulf %784, %667 : vector<1x1xf32>
    %786 = arith.addf %768, %785 : vector<1x1xf32>
    %787 = arith.mulf %636, %621 : f32
    %788 = arith.mulf %641, %626 : f32
    %789 = arith.addf %787, %788 : f32
    %790 = arith.mulf %646, %631 : f32
    %791 = arith.addf %789, %790 : f32
    %cst_190 = arith.constant 0.000000e+00 : f32
    %792 = arith.subf %791, %cst_190 : f32
    %793 = arith.mulf %792, %792 : f32
    %794 = arith.addf %776, %793 : f32
    %795 = arith.mulf %636, %636 : f32
    %796 = arith.mulf %641, %641 : f32
    %797 = arith.addf %795, %796 : f32
    %798 = arith.mulf %646, %646 : f32
    %799 = arith.addf %797, %798 : f32
    %cst_191 = arith.constant 1.000000e+00 : f32
    %800 = arith.subf %799, %cst_191 : f32
    %801 = arith.mulf %800, %800 : f32
    %802 = arith.addf %794, %801 : f32
    %803 = vector.broadcast %802 : f32 to vector<1x1xf32>
    %804 = arith.addf %786, %803 : vector<1x1xf32>
    %805 = tpu.iota {dimensions = array<i32: 1>} : vector<1x8xi32>
    %cst_192 = arith.constant 0.000000e+00 : f32
    %806 = vector.broadcast %cst_192 : f32 to vector<1x8xf32>
    %c0_i32_193 = arith.constant 0 : i32
    %807 = vector.broadcast %c0_i32_193 : i32 to vector<1x8xi32>
    %808 = arith.cmpi eq, %805, %807 : vector<1x8xi32>
    %809 = vector.shape_cast %525 : vector<1x1xf32> to vector<1x1xf32>
    %810 = vector.broadcast %809 : vector<1x1xf32> to vector<1x8xf32>
    %811 = arith.select %808, %810, %806 : vector<1x8xi1>, vector<1x8xf32>
    %c1_i32_194 = arith.constant 1 : i32
    %812 = vector.broadcast %c1_i32_194 : i32 to vector<1x8xi32>
    %813 = arith.cmpi eq, %805, %812 : vector<1x8xi32>
    %814 = vector.shape_cast %531 : vector<1x1xf32> to vector<1x1xf32>
    %815 = vector.broadcast %814 : vector<1x1xf32> to vector<1x8xf32>
    %816 = arith.select %813, %815, %811 : vector<1x8xi1>, vector<1x8xf32>
    %c2_i32_195 = arith.constant 2 : i32
    %817 = vector.broadcast %c2_i32_195 : i32 to vector<1x8xi32>
    %818 = arith.cmpi eq, %805, %817 : vector<1x8xi32>
    %819 = vector.shape_cast %537 : vector<1x1xf32> to vector<1x1xf32>
    %820 = vector.broadcast %819 : vector<1x1xf32> to vector<1x8xf32>
    %821 = arith.select %818, %820, %816 : vector<1x8xi1>, vector<1x8xf32>
    %c3_i32_196 = arith.constant 3 : i32
    %822 = vector.broadcast %c3_i32_196 : i32 to vector<1x8xi32>
    %823 = arith.cmpi eq, %805, %822 : vector<1x8xi32>
    %824 = vector.shape_cast %543 : vector<1x1xf32> to vector<1x1xf32>
    %825 = vector.broadcast %824 : vector<1x1xf32> to vector<1x8xf32>
    %826 = arith.select %823, %825, %821 : vector<1x8xi1>, vector<1x8xf32>
    %c4_i32_197 = arith.constant 4 : i32
    %827 = vector.broadcast %c4_i32_197 : i32 to vector<1x8xi32>
    %828 = arith.cmpi eq, %805, %827 : vector<1x8xi32>
    %829 = vector.shape_cast %549 : vector<1x1xf32> to vector<1x1xf32>
    %830 = vector.broadcast %829 : vector<1x1xf32> to vector<1x8xf32>
    %831 = arith.select %828, %830, %826 : vector<1x8xi1>, vector<1x8xf32>
    %c5_i32 = arith.constant 5 : i32
    %832 = vector.broadcast %c5_i32 : i32 to vector<1x8xi32>
    %833 = arith.cmpi eq, %805, %832 : vector<1x8xi32>
    %834 = vector.shape_cast %555 : vector<1x1xf32> to vector<1x1xf32>
    %835 = vector.broadcast %834 : vector<1x1xf32> to vector<1x8xf32>
    %836 = arith.select %833, %835, %831 : vector<1x8xi1>, vector<1x8xf32>
    %c6_i32 = arith.constant 6 : i32
    %837 = vector.broadcast %c6_i32 : i32 to vector<1x8xi32>
    %838 = arith.cmpi eq, %805, %837 : vector<1x8xi32>
    %839 = vector.shape_cast %804 : vector<1x1xf32> to vector<1x1xf32>
    %840 = vector.broadcast %839 : vector<1x1xf32> to vector<1x8xf32>
    %841 = arith.select %838, %840, %836 : vector<1x8xi1>, vector<1x8xf32>
    %842 = vector.shape_cast %841 : vector<1x8xf32> to vector<1x1x8xf32>
    %c0_198 = arith.constant 0 : index
    %c0_199 = arith.constant 0 : index
    %c0_200 = arith.constant 0 : index
    %843 = vector.load %arg5[%c0_198, %c0_199, %c0_200] : memref<1x1x8xf32, #tpu.memory_space<vmem>>, vector<1x1x8xf32>
    tpu.vector_store %arg5[%c0_198, %c0_199, %c0_200], %842 {strides = array<i32>} : memref<1x1x8xf32, #tpu.memory_space<vmem>>, vector<1x1x8xf32>,
    return
  }
  func.func @transform_0(%arg0: i32) -> (i32, i32, i32) {
    %c0_i32 = arith.constant 0 : i32
    %c0_i32_0 = arith.constant 0 : i32
    %c0_i32_1 = arith.constant 0 : i32
    return %arg0, %c0_i32, %c0_i32_0 : i32, i32, i32
  }
  func.func @transform_1(%arg0: i32) -> (i32, i32, i32) {
    %c0_i32 = arith.constant 0 : i32
    %c0_i32_0 = arith.constant 0 : i32
    %c0_i32_1 = arith.constant 0 : i32
    return %arg0, %c0_i32, %c0_i32_0 : i32, i32, i32
  }
  func.func @transform_2(%arg0: i32) -> i32 {
    %c0_i32 = arith.constant 0 : i32
    %c0_i32_0 = arith.constant 0 : i32
    return %c0_i32 : i32
  }
  func.func @transform_3(%arg0: i32) -> i32 {
    %c0_i32 = arith.constant 0 : i32
    %c0_i32_0 = arith.constant 0 : i32
    return %c0_i32 : i32
  }
  func.func @transform_4(%arg0: i32) -> (i32, i32, i32) {
    %c0_i32 = arith.constant 0 : i32
    %c0_i32_0 = arith.constant 0 : i32
    %c0_i32_1 = arith.constant 0 : i32
    return %arg0, %c0_i32, %c0_i32_0 : i32, i32, i32
  }
}

</mosaic_0001>

<bundles_post_ra>
// kernel: tpu_custom_call.1
= control target key start
LH: loop header
LB: loop body
LE: loop exit
PB: predicated region body
PF: predicated region fallthrough
CT: control target
= control target key end

     0   :  { %s6604_s0 = inlined_call_operand.vmem [shape: f32[2,3,128], index: 0, kind: input, shape index: {}]   ;;  %s6605_s1 = inlined_call_operand.vmem [shape: bf16[2,6,512], index: 1, kind: input, shape index: {}]   ;;  %s6606_s2 = inlined_call_operand.vmem [shape: f32[24], index: 2, kind: input, shape index: {}]   ;;  %s6607_s3 = inlined_call_operand.vmem [shape: f32[24], index: 3, kind: input, shape index: {}]   ;;  %s6608_s4 = inlined_call_operand.hbm [shape: f32[2,1,8], index: 4, kind: output, shape index: {}]  }
   0x1   :  { %6751 = sst [smem:[#allocation85_spill]] %s6604_s0 }
   0x2   :  { %6752 = sst [smem:[#allocation86_spill]] %s6605_s1 }
   0x3   :  { %6753 = sst [smem:[#allocation87_spill]] %s6606_s2 }
   0x4   :  { %6754 = sst [smem:[#allocation88_spill]] %s6607_s3 }
   0x5   :  { %6755 = sst [smem:[#allocation89_spill]] %s6608_s4 }
   0x6   :  { %9 = vsyncpa [#allocation4], 0 }
   0x7   :  { %10 = vsyncpa [#allocation6], 0 }
   0x8   :  { %11 = vsyncpa [#allocation3], 0 }
   0x9   :  { %13 = vsyncpa [#allocation3 + $0x1], 0  ;;  %s3788_s15 = smov 0   ;;  %s3790_s16 = smov 0  }
   0xa   :  { %s3792_s17 = smov 0   ;;  %s3794_s18 = smov 0  }
   0xb LB: > { %6756 = sst [smem:[#allocation11_spill]] %s3745_s15  ;;  %s3809_s19 = sadd.s32 4294967295, %s3757_s18   ;;  %s3757_s18 = sphi %s3794_s18, %s7208_s18   ;;  %s3753_s17 = sphi %s3792_s17, %s7211_s17   ;;  %s3749_s16 = sphi %s3790_s16, %s7210_s16   ;;  %s3745_s15 = sphi %s3788_s15, %s7209_s15  }
   0xc   : > { %6757 = sst [smem:[#allocation12_spill]] %s3749_s16  ;;  %s2722_s20 = sadd.s32 4294967294, %s3757_s18  }
   0xd   : > { %6758 = sst [smem:[#allocation13_spill]] %s3753_s17  ;;  %s3813_s21 = sadd.s32 1, %s3757_s18  }
   0xe   : > { %6759 = sst [smem:[#allocation14_spill]] %s3757_s18  ;;  %s120_s22 = sadd.s32 1, %s3753_s17 }
   0xf   : > { %6760 = sst [smem:[#allocation15_spill]] %s3809_s19  ;;  %s117_s23 = ssub.s32 %s3757_s18, %s3813_s21 }
  0x10   : > { %6761 = sst [smem:[#allocation16_spill]] %s3813_s21  ;;  %p130_p0 = scmp.ne.s32.totalorder %s3753_s17, %s3749_s16 }
  0x11   : > { %p118_p1 = scmp.eq.s32.totalorder %s117_s23, 0  ;;  %p131_p2 = scmp.eq.s32.totalorder %s3809_s19, 1 }
  0x12   : > { %p136_p3 = scmp.ne.s32.totalorder %s3749_s16, %s3745_s15  ;;  %p137_p4 = scmp.eq.s32.totalorder %s2722_s20, 1 }
  0x13   : > { %s3824_s24 = scalar_select %p118_p1, %s3753_s17, %s120_s22  }
  0x14   : > { %p3826_p5 = por %p131_p2, %p130_p0  ;;  %p3830_p6 = por %p137_p4, %p136_p3 }
  0x15   : > { %6762 = sst [smem:[#allocation17_spill]] %s3824_s24  ;;  %p2723_p7 = scmp.ge.s32.totalorder %s3757_s18, 1 }
  0x16   : > { %s6763_s25 = scalar_select %p3826_p5, 1, 0 }
  0x17   : > { %s6765_s26 = scalar_select %p3830_p6, 1, 0 }
  0x18   : > { %6764 = sst [smem:[#allocation18_spill]] %s6763_s25  ;;  %p144_p8 = scmp.lt.s32.totalorder %s3757_s18, 3 }
  0x19   : > { %6766 = sst [smem:[#allocation19_spill]] %s6765_s26  ;;  %p6609_p9 = scmp.eq.s32.totalorder %s3809_s19, 0 }
  0x1a   : > { %p3837_p10 = pnand %p2723_p7, %p144_p8  ;;  %s6768_s2 = sld [smem:[#allocation87_spill]] }
  0x1b   : > { %s6769_s3 = sld [smem:[#allocation88_spill]] }
  0x1c   : > { %s6767_s27 = scalar_select %p3837_p10, 1, 0 }
  0x1d   : > { %p3587_p11 = pneg %p3837_p10 }
  0x1f   : > { %p3851_p12 = pnand %p6609_p9, %p3587_p11 }
  0x20   : > { %s157_s30 = sshll.u32 %s6768_s2, 4  ;;  %s158_s30 = int_to_ptr.vmem [resolvable:$true] %s157_s30 }
  0x21   : > { %s168_s7 = sshll.u32 %s6769_s3, 4  ;;  %s3657_s9 = scalar_lea.vmem %s158_s30, 16  ;;  %s169_s7 = int_to_ptr.vmem [resolvable:$true] %s168_s7 }
  0x22   : > { %p3658_p13 = scmp.ne.s32.totalorder %s158_s30, %s3657_s9  ;;  %p3659_p0 = pneg %p3851_p12 }
  0x23   : > { %p3665_p3 = scmp.lt.s32.totalorder %s158_s30, %s158_s30  ;;  %p3666_p4 = scmp.lt.s32.totalorder %s3657_s9, %s3657_s9 }
  0x24   : > { %p3660_p1 = pnand %p3659_p0, %p3658_p13 }
  0x25   : > { %p3667_p7 = por %p3666_p4, %p3665_p3 }
  0x26   : > { %p3661_p2 = pneg %p3660_p1 }
  0x28   : > { %p3668_p8 = pnand %p3667_p7, %p3661_p2 }
  0x2a   : > { %3671 = shalt.err (!%p3668_p8)
}
  0x2b   : > { %s3759_s10 = smov [#allocation2]   ;;  %s3672_s11 = scalar_lea.vmem %s169_s7, 16 }
  0x2c   : > { %3590 = dma.vmem_to_smem (!%p3851_p12), %s158_s30, 16, %s3759_s10, [#allocation4]  }
  0x2d   : > { %p3673_p11 = scmp.ne.s32.totalorder %s169_s7, %s3672_s11  ;;  %p3680_p5 = scmp.lt.s32.totalorder %s169_s7, %s169_s7 }
  0x2e   : > { %p3681_p10 = scmp.lt.s32.totalorder %s3672_s11, %s3672_s11 }
  0x2f   : > { %p3675_p9 = pnand %p3673_p11, %p3659_p0 }
  0x30   : > { %p3682_p13 = por %p3681_p10, %p3680_p5 }
  0x31   : > { %p3676_p6 = pneg %p3675_p9 }
  0x33   : > { %p3683_p1 = pnand %p3682_p13, %p3676_p6 }
  0x35   : > { %3686 = shalt.err (!%p3683_p1)
}
  0x36   : > { %s3760_s12 = smov [#allocation5]   ;;  %p6771_p2 = scmp.ne.s32.totalorder %s6767_s27, 0 }
  0x37   : > { %3593 = dma.vmem_to_smem (!%p3851_p12), %s169_s7, 16, %s3760_s12, [#allocation6]  }
  0x38   : > { %196 = sbr.rel (%p6771_p2) target bundleno = 823 (0x337), region = 36 }
  0x3f   : > { %p6772_p3 = scmp.eq.s32.totalorder %s3809_s19, 0 }
  0x41   : > { %3732 = dma.done.wait (%p6772_p3), [#allocation4], 16   ;;  %p6773_p4 = pmov %p6772_p3 }
  0x42   : > { %p6774_p9 = pmov %p6772_p3 }
  0x43   : > { %3734 = vsyncadd (%p6773_p4), [#allocation4], 4294967280 }
  0x44   : > { %3736 = dma.done.wait (%p6774_p9), [#allocation6], 16   ;;  %p6775_p5 = pmov %p6772_p3 }
  0x46   : > { %3738 = vsyncadd (%p6775_p5), [#allocation6], 4294967280 }
  0x47   : > { %206 = sfence }
  0x48   : > { %p230_p6 = scmp.lt.s32.totalorder %s3809_s19, 1  ;;  %s3873_s13 = sshll.u32 %s3809_s19, 2  ;;  %v6618_v2 = vlaneseq }
  0x49   : > { %s3876_s14 = sadd.s32 8, %s3873_s13  ;;  %s6778_s0 = sld [smem:[#allocation85_spill]] }
  0x4a   : > { %s3879_s20 = scalar_select %p230_p6, %s3809_s19, 1  ;;  %v3936_v8 = vshrl.u32 %v6618_v2, 7 }
  0x4b   : > { %s3882_s22 = sld [smem:[#allocation2 + %s3876_s14]]  ;;  %s6614_s23 = sadd.s32 1, %s3876_s14 }
  0x4c   : > { %s2730_s27 = sshll.u32 %s3879_s20, 2  ;;  %s3888_s28 = sld [smem:[#allocation2 + %s6614_s23]]  ;;  %v3955_v13 = vadd.s32 8, %v3936_v8  ;;  %v3959_v14 = vsub.s32 0, %v3936_v8  ;;  %v3962_v15 = vadd.s32 256, %v3936_v8  ;;  %v3965_v16 = vadd.s32 264, %v3936_v8 }
  0x4d   : > { %s6613_s6 = sadd.s32 2, %s3876_s14  ;;  %s6612_s8 = sadd.s32 3, %s3876_s14  ;;  %v3974_v19 = vadd.s32 16, %v3936_v8  ;;  %v3989_v25 = vadd.s32 24, %v3936_v8  ;;  %v3992_v26 = vadd.s32 272, %v3936_v8  ;;  %v3999_v27 = vadd.s32 280, %v3936_v8 }
  0x4e   : > { %s3898_s7 = sld [smem:[#allocation2 + %s6613_s6]]  ;;  %s6615_s29 = sadd.s32 2, %s3873_s13  ;;  %6782 = vst [vmem:[#allocation25_spill] sm:$0xff] %v3959_v14  ;;  %6783 = vst [vmem:[#allocation26_spill] sm:$0xff] %v3962_v15  ;;  %v4002_v28 = vadd.s32 32, %v3936_v8  ;;  %v4005_v29 = vadd.s32 40, %v3936_v8 }
  0x4f   : > { %s3893_s5 = scalar_lea.vmem %s6778_s0, %s2730_s27  ;;  %s3908_s9 = sld [smem:[#allocation2 + %s3873_s13]]  ;;  %6784 = vst [vmem:[#allocation27_spill] sm:$0xff] %v3965_v16  ;;  %6785 = vst [vmem:[#allocation28_spill] sm:$0xff] %v3992_v26  ;;  %v4008_v30 = vadd.s32 288, %v3936_v8  ;;  %v4023_v33 = vadd.s32 296, %v3936_v8  ;;  %v4026_v34 = vadd.s32 48, %v3936_v8 }
  0x50   : > { %v3902_v0 = vld [vmem:[%s3893_s5] sm:$0x1]  ;;  %v3905_v1 = vld [vmem:[%s3893_s5 + $0x1] sm:$0x1]  ;;  %s3915_s11 = sld [smem:[#allocation2 + %s6612_s8]]  ;;  %s6616_s27 = sadd.s32 1, %s3873_s13 }
  0x51   : > { %6776 = sst [smem:[#allocation20_spill]] %s3882_s22  ;;  %s350_s10 = smul.f32 %s3882_s22, %s3882_s22  ;;  %v356_v3 = vstv %s3882_s22  ;;  %v3929_v7 = vld [vmem:[%s3893_s5 + $0x2] sm:$0x1]  ;;  %6787 = vst [vmem:[#allocation29_spill] sm:$0xff] %v3999_v27  ;;  %6788 = vst [vmem:[#allocation30_spill] sm:$0xff] %v4008_v30  ;;  %v4033_v36 = vadd.s32 56, %v3936_v8 }
  0x52   : > { %6777 = sst [smem:[#allocation21_spill]] %s3888_s28  ;;  %s351_s12 = smul.f32 %s3888_s28, %s3888_s28  ;;  %v358_v4 = vstv %s3888_s28  ;;  %v357_v5 = vmul.f32 %v356_v3, %v3902_v0  ;;  %6780 = vst [vmem:[#allocation23_spill] sm:$0xff] %v3929_v7  ;;  %6791 = vst [vmem:[#allocation31_spill] sm:$0xff] %v4023_v33  ;;  %v4036_v37 = vadd.s32 304, %v3936_v8  ;;  %v4039_v38 = vadd.s32 312, %v3936_v8 }
  0x53   : > { %v359_v6 = vmul.f32 %v358_v4, %v3905_v1  ;;  %s3933_s8 = sld [smem:[#allocation2 + %s6616_s27]]  ;;  %v4043_v39 = vadd.s32 64, %v3936_v8  ;;  %v4051_v41 = vadd.s32 72, %v3936_v8  ;;  %v4054_v42 = vadd.s32 320, %v3936_v8  ;;  %s6962_s18 = sadd.s32 3, %s3876_s14 }
  0x54   : > { %6779 = sst [smem:[#allocation22_spill]] %s3898_s7  ;;  %s353_s6 = smul.f32 %s3898_s7, %s3898_s7  ;;  %v361_v9 = vstv %s3898_s7  ;;  %6793 = vst [vmem:[#allocation32_spill] sm:$0xff] %v4036_v37  ;;  %6794 = vst [vmem:[#allocation33_spill] sm:$0xff] %v4039_v38  ;;  %v4057_v43 = vadd.s32 328, %v3936_v8  ;;  %v4060_v44 = vadd.s32 80, %v3936_v8  ;;  %v4065_v48 = vadd.s32 88, %v3936_v8 }
  0x55   : > { %s352_s30 = sadd.f32 %s351_s12, %s350_s10  ;;  %s3943_s23 = sld [smem:[#allocation2 + %s6615_s29]]  ;;  %v360_v10 = vadd.f32 %v359_v6, %v357_v5  ;;  %v362_v11 = vmul.f32 %v361_v9, %v3929_v7  ;;  %v6621_v12 = vstv %s3908_s9  ;;  %6795 = vst [vmem:[#allocation34_spill] sm:$0xff] %v4051_v41  ;;  %6796 = vst [vmem:[#allocation35_spill] sm:$0xff] %v4054_v42  ;;  %v4068_v49 = vadd.s32 336, %v3936_v8 }
  0x56   : > { %s6617_s10 = sadd.s32 3, %s3873_s13  ;;  %s315_s12 = smul.f32 %s3908_s9, %s3908_s9  ;;  %v322_v17 = vmul.f32 %v6621_v12, %v3902_v0  ;;  %v364_v24 = vstv %s3915_s11  ;;  %6797 = vst [vmem:[#allocation36_spill] sm:$0xff] %v4057_v43  ;;  %6798 = vst [vmem:[#allocation37_spill] sm:$0xff] %v4060_v44  ;;  %v4076_v53 = vadd.s32 344, %v3936_v8  ;;  %v4079_v54 = vadd.s32 96, %v3936_v8 }
  0x57   : > { %s3945_s0 = sadd.f32 %s353_s6, %s352_s30  ;;  %s3514_s30 = sshll.u32 %s3879_s20, 4  ;;  %v363_v20 = vadd.f32 %v362_v11, %v360_v10  ;;  %6799 = vst [vmem:[#allocation38_spill] sm:$0xff] %v4065_v48  ;;  %6800 = vst [vmem:[#allocation39_spill] sm:$0xff] %v4068_v49  ;;  %v4082_v55 = vadd.s32 104, %v3936_v8  ;;  %v4089_v57 = vadd.s32 352, %v3936_v8  ;;  %v4092_v58 = vadd.s32 360, %v3936_v8 }
  0x58   : > { %s3979_s27 = sld [smem:[#allocation2 + %s6617_s10]]  ;;  %s6786_s20 = sadd.s32 1, %s3873_s13  ;;  %6802 = vst [vmem:[#allocation41_spill] sm:$0xff] %v4076_v53  ;;  %6803 = vst [vmem:[#allocation42_spill] sm:$0xff] %v4079_v54  ;;  %v4095_v59 = vadd.s32 112, %v3936_v8  ;;  %v4102_v63 = vadd.s32 120, %v3936_v8 }
  0x59   : > { %6781 = sst [smem:[#allocation24_spill]] %s3945_s0  ;;  %s316_s6 = smul.f32 %s3933_s8, %s3933_s8  ;;  %v6620_v18 = vstv %s3933_s8  ;;  %v365_v35 = vadd.f32 %v364_v24, %v363_v20  ;;  %6804 = vst [vmem:[#allocation43_spill] sm:$0xff] %v4082_v55  ;;  %6806 = vst [vmem:[#allocation45_spill] sm:$0xff] %v4089_v57  ;;  %v4105_v5 = vadd.s32 368, %v3936_v8  ;;  %v4112_v11 = vadd.s32 376, %v3936_v8 }
  0x5a   : > { %s355_s29 = sadd.f32 1e-12, %s3945_s0  ;;  %v324_v22 = vmul.f32 %v6620_v18, %v3905_v1  ;;  %s6789_s1 = sld [smem:[#allocation86_spill]]  ;;  %6807 = vst [vmem:[#allocation46_spill] sm:$0xff] %v4092_v58  ;;  %6808 = vst [vmem:[#allocation47_spill] sm:$0xff] %v4095_v59  ;;  %v4118_v20 = vadd.s32 136, %v3936_v8 }
  0x5b   : > { %s318_s2 = smul.f32 %s3943_s23, %s3943_s23  ;;  %v6619_v23 = vstv %s3943_s23  ;;  %s317_s3 = sadd.f32 %s316_s6, %s315_s12  ;;  %v366_v50 = vmul.f32 2.0, %v365_v35  ;;  %6809 = vst [vmem:[#allocation48_spill] sm:$0xff] %v4102_v63  ;;  %6810 = vst [vmem:[#allocation49_spill] sm:$0xff] %v4105_v5  ;;  %v4146_v2 = vadd.s32 152, %v3936_v8 }
  0x5c   : > { %v367_v21 = vstv %s355_s29  ;;  %s3996_s29 = sld [smem:[#allocation5 + %s6786_s20]]  ;;  %v325_v31 = vadd.f32 %v324_v22, %v322_v17  ;;  %v327_v32 = vmul.f32 %v6619_v23, %v3929_v7  ;;  %s6790_s20 = sadd.s32 2, %s3873_s13  ;;  %6811 = vst [vmem:[#allocation50_spill] sm:$0xff] %v4112_v11  ;;  %v4115_v17 = vadd.s32 128, %v3936_v8  ;;  %6813 = vst [vmem:[#allocation52_spill] sm:$0xff] %v4118_v20 }
  0x5d   : > { %3642 = vrcp.f32 %v367_v21  ;;  %s4013_s10 = sadd.f32 %s318_s2, %s317_s3  ;;  %s4020_s24 = sld [smem:[#allocation5 + %s6790_s20]]  ;;  %v4121_v21 = vadd.s32 384, %v3936_v8  ;;  %6817 = vst [vmem:[#allocation56_spill] sm:$0xff] %v4146_v2 }
  0x5e   : > { %s6792_s11 = sadd.s32 3, %s3873_s13  ;;  %s4048_s3 = sld [smem:[#allocation5 + %s3873_s13]]  ;;  %v328_v46 = vadd.f32 %v327_v32, %v325_v31  ;;  %v329_v51 = vstv %s3979_s27  ;;  %6812 = vst [vmem:[#allocation51_spill] sm:$0xff] %v4115_v17 }
  0x5f   : > { %s4030_s12 = sld [smem:[#allocation5 + %s6792_s11]]  ;;  %s320_s2 = sadd.f32 1e-12, %s4013_s10  ;;  %6814 = vst [vmem:[#allocation53_spill] sm:$0xff] %v4121_v21 }
  0x60   : > { %s238_s6 = scalar_lea.vmem %s6789_s1, %s3514_s30  ;;  %v330_v62 = vadd.f32 %v329_v51, %v328_v46  ;;  %v4140_v51 = vadd.s32 392, %v3936_v8  ;;  %s6827_s27 = sadd.s32 1, %s3876_s14 }
  0x61   : > { %v4045_v40 = vld [vmem:[%s238_s6] sm:$0x77]  ;;  %v4062_v45 = vld [vmem:[%s238_s6 + $0x8] sm:$0x77]  ;;  %v332_v47 = vstv %s320_s2  ;;  %s4197_s30 = sld [smem:[#allocation5 + %s6827_s27]]  ;;  %s4296_s6 = sadd.s32 16, %s3873_s13 }
  0x62   : > { %3644 = vrcp.f32 %v332_v47  ;;  %v4073_v52 = vcombine.high %v4045_v40, %v4045_v40  ;;  %v4086_v56 = vcombine.high %v4062_v45, %v4062_v45  ;;  %v4099_v60 = vstv %s3996_s29  ;;  %6815 = vst [vmem:[#allocation54_spill] sm:$0xff] %v4140_v51  ;;  %s379_s13 = sadd.s32 1, %s4296_s6  ;;  %s6670_s20 = sadd.s32 2, %s4296_s6 }
  0x63   : > { %v4109_v6 = vstv %s4020_s24  ;;  %v416_v22 = vmul.f32 %v4099_v60, %v3902_v0  ;;  %v432_v51 = vmul.f32 %v4099_v60, %v3929_v7  ;;  %s4343_s11 = sld [smem:[#allocation5 + %s379_s13]]  ;;  %s2518_s25 = smul.f32 %s3898_s7, %s3943_s23 }
  0x64   : > { %6801 = vst [vmem:[#allocation40_spill] sm:$0xff] %v4073_v52  ;;  %6805 = vst [vmem:[#allocation44_spill] sm:$0xff] %v4086_v56  ;;  %2121 = vmatprep.mubr.bf16.mxu1 %v4073_v52  ;;  %2162 = vmatprep.mubr.bf16.mxu0 %v4086_v56  ;;  %v4129_v31 = vstv %s4048_s3  ;;  %v418_v47 = vmul.f32 %v4109_v6, %v3905_v1  ;;  %v437_v5 = vmul.f32 %v4109_v6, %v3902_v0  ;;  %s4365_s2 = sld [smem:[#allocation5 + %s6670_s20]]  ;;  %s6660_s3 = sadd.s32 3, %s4296_s6 }
  0x65   : > { %v4126_v24 = vstv %s4030_s12  ;;  %v435_v21 = vmul.f32 %v4129_v31, %v3929_v7  ;;  %s4443_s27 = sld [smem:[#allocation5 + %s6660_s3]] }
  0x66   : > { %v419_v52 = vadd.f32 %v418_v47, %v416_v22  ;;  %v6822_v22 = vstv %s3933_s8  ;;  %s4463_s3 = sld [smem:[#allocation5 + %s4296_s6]] }
  0x67   : > { %v3643_v61 = vpop.eup %3642  ;;  %s4704_s20 = sld [smem:[#allocation2 + %s379_s13]]  ;;  %s6905_s13 = sadd.s32 2, %s4296_s6 }
  0x68   : > { %v369_v10 = vmul.f32 %v3643_v61, %v366_v50  ;;  %v331_v50 = vmul.f32 2.0, %v330_v62  ;;  %v4143_v61 = vadd.s32 144, %v3936_v8  ;;  %v425_v62 = vmul.f32 %v4129_v31, %v3902_v0  ;;  %s4794_s1 = sld [smem:[#allocation2 + %s6905_s13]] }
  0x69   : > { %6847 = sst [smem:[#allocation78_spill]] %s4343_s11 }
  0x6a   : > { %v370_v32 = vmul.f32 %v369_v10, %v356_v3  ;;  %v372_v35 = vmul.f32 %v369_v10, %v358_v4  ;;  %v374_v46 = vmul.f32 %v369_v10, %v361_v9  ;;  %6816 = vst [vmem:[#allocation55_spill] sm:$0xff] %v4143_v61  ;;  %v421_v9 = vmul.f32 %v4126_v24, %v3929_v7  ;;  %6850 = sst [smem:[#allocation79_spill]] %s4365_s2 }
  0x6b   : > { %v426_v10 = vmul.f32 %v4109_v6, %v3929_v7  ;;  %v431_v61 = vmul.f32 %v4126_v24, %v3902_v0  ;;  %s5114_s4 = sld [smem:[#allocation5 + %s6962_s18]] }
  0x6c   : > { %v4149_v23 = vsub.f32 %v3902_v0, %v370_v32  ;;  %v4152_v3 = vsub.f32 %v3905_v1, %v372_v35  ;;  %v4155_v4 = vsub.f32 %v3929_v7, %v374_v46  ;;  %v427_v32 = vmul.f32 %v4126_v24, %v3905_v1  ;;  %v3645_v46 = vpop.eup %3644 }
  0x6d   : > { %v430_v35 = vmul.f32 %v4129_v31, %v3905_v1  ;;  %v334_v2 = vmul.f32 %v3645_v46, %v331_v50  ;;  %v6823_v50 = vstv %s3943_s23  ;;  %v422_v57 = vadd.f32 %v421_v9, %v419_v52  ;;  %6889 = sst [smem:[#allocation83_spill]] %s4704_s20  ;;  %s6933_s17 = smul.f32 %s4704_s20, %s4704_s20 }
  0x6e   : > { %6818 = vst [vmem:[#allocation57_spill] sm:$0xff] %v4149_v23  ;;  %6819 = vst [vmem:[#allocation58_spill] sm:$0xff] %v4152_v3  ;;  %v574_v18 = vadd.f32 0.5, %v4149_v23  ;;  %v616_v12 = vadd.f32 0.5, %v4152_v3  ;;  %v664_v56 = vadd.f32 0.5, %v4155_v4  ;;  %v436_v3 = vmul.f32 %v4099_v60, %v3905_v1  ;;  %s388_s26 = smul.f32 %s4794_s1, %s4794_s1 }
  0x6f   : > { %6820 = vst [vmem:[#allocation59_spill] sm:$0xff] %v4155_v4  ;;  %v6821_v23 = vstv %s3908_s9  ;;  %v337_v47 = vmul.f32 %v334_v2, %v6822_v22  ;;  %v339_v46 = vmul.f32 %v334_v2, %v6823_v50 }
  0x70   : > { %v580_v20 = vmul.f32 8.0, %v574_v18  ;;  %v622_v17 = vmul.f32 8.0, %v616_v12  ;;  %v670_v11 = vmul.f32 8.0, %v664_v56  ;;  %v335_v4 = vmul.f32 %v334_v2, %v6821_v23 }
  0x71   : > { %v4190_v12 = vsub.f32 %v3905_v1, %v337_v47  ;;  %v4193_v56 = vsub.f32 %v3929_v7, %v339_v46  ;;  %v433_v23 = vsub.f32 %v431_v61, %v432_v51  ;;  %v423_v46 = vsub.f32 0.0, %v422_v57 }
  0x72   : > { %v586_v63 = vfloor.f32 %v580_v20  ;;  %v628_v59 = vfloor.f32 %v622_v17  ;;  %v676_v58 = vfloor.f32 %v670_v11  ;;  %v4187_v18 = vsub.f32 %v3902_v0, %v335_v4 }
  0x73   : > { %6825 = vst [vmem:[#allocation61_spill] sm:$0xff] %v4190_v12  ;;  %6826 = vst [vmem:[#allocation62_spill] sm:$0xff] %v4193_v56  ;;  %v428_v20 = vsub.f32 %v426_v10, %v427_v32  ;;  %v615_v52 = vadd.f32 0.5, %v4190_v12  ;;  %v663_v17 = vadd.f32 0.5, %v4193_v56  ;;  %v438_v4 = vsub.f32 %v436_v3, %v437_v5 }
  0x74   : > { %6824 = vst [vmem:[#allocation60_spill] sm:$0xff] %v4187_v18  ;;  %v592_v2 = vmax.f32 %v586_v63, 0.0  ;;  %v634_v22 = vmax.f32 %v628_v59, 0.0  ;;  %v682_v50 = vmax.f32 %v676_v58, 0.0  ;;  %v573_v11 = vadd.f32 0.5, %v4187_v18 }
  0x75   : > { %v621_v51 = vmul.f32 8.0, %v615_v52  ;;  %v669_v61 = vmul.f32 8.0, %v663_v17  ;;  %v4202_v7 = vadd.f32 %v433_v23, %v430_v35  ;;  %v4205_v58 = vadd.s32 400, %v3936_v8 }
  0x76   : > { %v598_v9 = vmin.f32 %v592_v2, 7.0  ;;  %v640_v47 = vmin.f32 %v634_v22, 7.0  ;;  %v688_v55 = vmin.f32 %v682_v50, 7.0  ;;  %v579_v54 = vmul.f32 8.0, %v573_v11 }
  0x77   : > { %6828 = vst [vmem:[#allocation63_spill] sm:$0xff] %v4205_v58  ;;  %v4207_v10 = vadd.f32 %v428_v20, %v425_v62  ;;  %v627_v56 = vfloor.f32 %v621_v51  ;;  %v675_v5 = vfloor.f32 %v669_v61  ;;  %v4209_v3 = vadd.f32 %v438_v4, %v435_v21 }
  0x78   : > { %v3531_v63 = vtrunc.f32 %v598_v9  ;;  %v3543_v59 = vtrunc.f32 %v640_v47  ;;  %v585_v32 = vfloor.f32 %v579_v54  ;;  %v3555_v22 = vtrunc.f32 %v688_v55 }
  0x79   : > { %v4211_v50 = vsub.f32 0.0, %v423_v46  ;;  %v633_v23 = vmax.f32 %v627_v56, 0.0  ;;  %v681_v11 = vmax.f32 %v675_v5, 0.0  ;;  %v444_v52 = vsub.f32 0.0, %v4202_v7 }
  0x7a   : > { %v3532_v2 = vcvt.f32.s32 %v3531_v63  ;;  %v3544_v57 = vcvt.f32.s32 %v3543_v59  ;;  %v591_v35 = vmax.f32 %v585_v32, 0.0  ;;  %v4215_v62 = vadd.s32 408, %v3936_v8 }
  0x7b   : > { %v4218_v54 = vadd.s32 160, %v3936_v8  ;;  %v4221_v20 = vstv %s4197_s30  ;;  %v639_v4 = vmin.f32 %v633_v23, 7.0  ;;  %v687_v9 = vmin.f32 %v681_v11, 7.0 }
  0x7c   : > { %v610_v17 = vmul.u32 8, %v3532_v2  ;;  %6829 = vst [vmem:[#allocation64_spill] sm:$0xff] %v4215_v62  ;;  %6830 = vst [vmem:[#allocation65_spill] sm:$0xff] %v4221_v20  ;;  %v597_v21 = vmin.f32 %v591_v35, 7.0  ;;  %v4224_v55 = vadd.s32 168, %v3936_v8  ;;  %v3556_v56 = vcvt.f32.s32 %v3555_v22 }
  0x7d   : > { %v441_v46 = vmul.f32 %v4211_v50, %v4099_v60  ;;  %v442_v51 = vmul.f32 %v4207_v10, %v4129_v31  ;;  %v3541_v63 = vtrunc.f32 %v639_v4  ;;  %v445_v59 = vmul.f32 %v444_v52, %v4126_v24 }
  0x7e   : > { %v652_v47 = vadd.s32 %v3544_v57, %v610_v17  ;;  %v3529_v61 = vtrunc.f32 %v597_v21  ;;  %v446_v32 = vmul.f32 %v4209_v3, %v4109_v6  ;;  %v4234_v2 = vadd.s32 416, %v3936_v8 }
  0x7f   : > { %v4237_v57 = vadd.s32 424, %v3936_v8  ;;  %v4240_v22 = vadd.s32 176, %v3936_v8  ;;  %v3542_v23 = vcvt.f32.s32 %v3541_v63  ;;  %v3553_v11 = vtrunc.f32 %v687_v9 }
  0x80   : > { %v658_v5 = vmul.u32 8, %v652_v47  ;;  %6831 = vst [vmem:[#allocation66_spill] sm:$0xff] %v4234_v2  ;;  %v3530_v35 = vcvt.f32.s32 %v3529_v61  ;;  %v4243_v17 = vadd.s32 184, %v3936_v8  ;;  %v4246_v21 = vadd.s32 432, %v3936_v8 }
  0x81   : > { %6832 = vst [vmem:[#allocation67_spill] sm:$0xff] %v4237_v57  ;;  %v4249_v4 = vadd.s32 440, %v3936_v8  ;;  %v4252_v47 = vadd.s32 192, %v3936_v8  ;;  %v4255_v18 = vadd.s32 200, %v3936_v8  ;;  %v443_v61 = vadd.f32 %v442_v51, %v441_v46 }
  0x82   : > { %v700_v52 = vadd.s32 %v3556_v56, %v658_v5  ;;  %6833 = vst [vmem:[#allocation68_spill] sm:$0xff] %v4246_v21  ;;  %v609_v12 = vmul.u32 8, %v3530_v35  ;;  %v447_v63 = vadd.f32 %v446_v32, %v445_v59  ;;  %v4261_v56 = vadd.s32 448, %v3936_v8 }
  0x83   : > { %6834 = vst [vmem:[#allocation69_spill] sm:$0xff] %v4249_v4  ;;  %6835 = vst [vmem:[#allocation70_spill] sm:$0xff] %v4255_v18  ;;  %v4264_v5 = vadd.s32 456, %v3936_v8  ;;  %v452_v20 = vsub.f32 0.0, %v4209_v3  ;;  %v3554_v21 = vcvt.f32.s32 %v3553_v11  ;;  %v4268_v35 = vadd.s32 208, %v3936_v8 }
  0x84   : > { %v4258_v9 = vrot.slane %v700_v52, %v3959_v14  ;;  %6836 = vst [vmem:[#allocation71_spill] sm:$0xff] %v4261_v56  ;;  %v651_v4 = vadd.s32 %v3542_v23, %v609_v12  ;;  %v4271_v18 = vadd.s32 216, %v3936_v8  ;;  %v4281_v46 = vadd.f32 %v447_v63, %v443_v61 }
  0x85   : > { %6837 = vst [vmem:[#allocation72_spill] sm:$0xff] %v4264_v5  ;;  %v449_v51 = vmul.f32 %v4211_v50, %v4109_v6  ;;  %v450_v59 = vmul.f32 %v4202_v7, %v4129_v31  ;;  %v6652_v32 = vmov 1.0|1.0   ;;  %v453_v23 = vmul.f32 %v452_v20, %v4099_v60 }
  0x86   : > { %6838 = vst [vmem:[#allocation73_spill] sm:$0xff] %v4271_v18  ;;  %vm732_vm0 = vcmp.eq.s32.totalorder %v3936_v8, %v4258_v9  ;;  %vm738_vm1 = vcmp.eq.s32.totalorder %v3955_v13, %v4258_v9  ;;  %vm924_vm2 = vcmp.eq.s32.totalorder %v3962_v15, %v4258_v9  ;;  %vm930_vm3 = vcmp.eq.s32.totalorder %v3965_v16, %v4258_v9 }
  0x87   : > { %vm3124_vm4 = vmpackc.low %vm738_vm1, %vm732_vm0  ;;  %v657_v12 = vmul.u32 8, %v651_v4  ;;  %6839 = vst [vmem:[#allocation74_spill] sm:$0xff] %v4281_v46  ;;  %vm744_vm6 = vcmp.eq.s32.totalorder %v3974_v19, %v4258_v9  ;;  %vm750_vm7 = vcmp.eq.s32.totalorder %v3989_v25, %v4258_v9  ;;  %v454_v11 = vmul.f32 %v4207_v10, %v4126_v24 }
  0x88   : > { %3125 = vmatprep.subr.msk.bf16.mxu1 %vm3124_vm4, %v6652_v32  ;;  %vm3188_vm5 = vmpackc.low %vm930_vm3, %vm924_vm2  ;;  %vm936_vm8 = vcmp.eq.s32.totalorder %v3992_v26, %v4258_v9  ;;  %vm942_vm9 = vcmp.eq.s32.totalorder %v3999_v27, %v4258_v9  ;;  %v4304_v4 = vadd.s32 464, %v3936_v8  ;;  %vm756_vm10 = vcmp.eq.s32.totalorder %v4002_v28, %v4258_v9 }
  0x89   : > { %3189 = vmatprep.subr.msk.bf16.mxu0 %vm3188_vm5, %v6652_v32  ;;  %v699_v52 = vadd.s32 %v3554_v21, %v657_v12  ;;  %vm762_vm11 = vcmp.eq.s32.totalorder %v4005_v29, %v4258_v9  ;;  %v4311_v20 = vadd.s32 472, %v3936_v8  ;;  %v4314_v21 = vadd.s32 224, %v3936_v8  ;;  %vm4322_vm12 = vmpackc.low %vm750_vm7, %vm744_vm6 }
  0x8a   : > { %6840 = vst [vmem:[#allocation75_spill] sm:$0xff] %v4304_v4  ;;  %v4327_v12 = vadd.s32 232, %v3936_v8  ;;  %v451_v32 = vadd.f32 %v450_v59, %v449_v51  ;;  %vm4331_vm13 = vmpackc.low %vm942_vm9, %vm936_vm8  ;;  %v458_v4 = vmul.f32 %v4209_v3, %v4129_v31  ;;  %v576_v18 = vadd.f32 0.5, %v4281_v46 }
  0x8b   : > { %6841 = vst [vmem:[#allocation76_spill] sm:$0xff] %v4311_v20  ;;  %6842 = vst [vmem:[#allocation77_spill] sm:$0xff] %v4314_v21  ;;  %v4317_v61 = vrot.slane %v699_v52, %v3959_v14  ;;  %v460_v20 = vsub.f32 0.0, %v4207_v10  ;;  %v455_v52 = vadd.f32 %v454_v11, %v453_v23  ;;  %v457_v14 = vmul.f32 %v4211_v50, %v4126_v24 }
  0x8c   : > { %vm4359_vm2 = vmpackc.low %vm762_vm11, %vm756_vm10  ;;  %v6851_v31 = vmov 1.0|1.0   ;;  %vm948_vm9 = vcmp.eq.s32.totalorder %v4008_v30, %v4258_v9  ;;  %vm954_vm10 = vcmp.eq.s32.totalorder %v4023_v33, %v4258_v9  ;;  %v462_v3 = vmul.f32 %v4202_v7, %v4099_v60 }
  0x8d   : > { %vm731_vm14 = vcmp.eq.s32.totalorder %v3936_v8, %v4317_v61  ;;  %vm737_vm15 = vcmp.eq.s32.totalorder %v3955_v13, %v4317_v61  ;;  %vm923_vm0 = vcmp.eq.s32.totalorder %v3962_v15, %v4317_v61  ;;  %vm929_vm1 = vcmp.eq.s32.totalorder %v3965_v16, %v4317_v61  ;;  %v6904_v16 = vld [vmem:[#allocation52_spill] sm:$0xff] }
  0x8e   : > { %vm3126_vm3 = vmpackc.low %vm737_vm15, %vm731_vm14  ;;  %vm743_vm4 = vcmp.eq.s32.totalorder %v3974_v19, %v4317_v61  ;;  %vm749_vm5 = vcmp.eq.s32.totalorder %v3989_v25, %v4317_v61  ;;  %vm935_vm6 = vcmp.eq.s32.totalorder %v3992_v26, %v4317_v61  ;;  %vm941_vm7 = vcmp.eq.s32.totalorder %v3999_v27, %v4317_v61  ;;  %v6900_v26 = vld [vmem:[#allocation50_spill] sm:$0xff] }
  0x8f   : > { %3127 = vmatpush1.bf16.msk.msra.mxu1 %vm3126_vm3, %v6851_v31  ;;  %vm3190_vm8 = vmpackc.low %vm929_vm1, %vm923_vm0  ;;  %v461_v10 = vmul.f32 %v460_v20, %v4109_v6  ;;  %vm768_vm14 = vcmp.eq.s32.totalorder %v4026_v34, %v4258_v9  ;;  %vm774_vm15 = vcmp.eq.s32.totalorder %v4033_v36, %v4258_v9  ;;  %v4397_v7 = vadd.s32 480, %v3936_v8 }
  0x90   : > { %3191 = vmatpush1.bf16.msk.msra.mxu0 %vm3190_vm8, %v6851_v31  ;;  %3129 = vmatprep.subr.msk.bf16.mxu1 %vm4322_vm12, %v6851_v31  ;;  %vm4388_vm11 = vmpackc.low %vm749_vm5, %vm743_vm4  ;;  %v582_v60 = vmul.f32 8.0, %v576_v18  ;;  %vm755_vm0 = vcmp.eq.s32.totalorder %v4002_v28, %v4317_v61  ;;  %vm761_vm1 = vcmp.eq.s32.totalorder %v4005_v29, %v4317_v61  ;;  %v4417_v18 = vadd.s32 488, %v3936_v8 }
  0x91   : > { %3193 = vmatprep.subr.msk.bf16.mxu0 %vm4331_vm13, %v6851_v31  ;;  %vm4408_vm12 = vmpackc.low %vm941_vm7, %vm935_vm6  ;;  %v4419_v51 = vadd.f32 %v455_v52, %v451_v32  ;;  %vm947_vm3 = vcmp.eq.s32.totalorder %v4008_v30, %v4317_v61  ;;  %vm953_vm4 = vcmp.eq.s32.totalorder %v4023_v33, %v4317_v61  ;;  %v4436_v23 = vadd.s32 240, %v3936_v8  ;;  %v6892_v30 = vld [vmem:[#allocation46_spill] sm:$0xff] }
  0x92   : > { %vm4427_vm13 = vmpackc.low %vm954_vm10, %vm948_vm9  ;;  %v4439_v32 = vadd.s32 248, %v3936_v8  ;;  %vm960_vm6 = vcmp.eq.s32.totalorder %v4036_v37, %v4258_v9  ;;  %vm966_vm7 = vcmp.eq.s32.totalorder %v4039_v38, %v4258_v9  ;;  %v459_v20 = vadd.f32 %v458_v4, %v457_v14 }
  0x93   : > { %6856 = vst [vmem:[#allocation80_spill] sm:$0xff] %v4419_v51  ;;  %3131 = vmatpush1.bf16.msk.msra.mxu1 %vm4388_vm11, %v6851_v31  ;;  %vm4454_vm5 = vmpackc.low %vm774_vm15, %vm768_vm14  ;;  %v463_v21 = vadd.f32 %v462_v3, %v461_v10  ;;  %vm767_vm9 = vcmp.eq.s32.totalorder %v4026_v34, %v4317_v61  ;;  %vm773_vm10 = vcmp.eq.s32.totalorder %v4033_v36, %v4317_v61  ;;  %v588_v14 = vfloor.f32 %v582_v60 }
  0x94   : > { %3195 = vmatpush1.bf16.msk.msra.mxu0 %vm4408_vm12, %v6851_v31  ;;  %3133 = vmatprep.subr.msk.bf16.mxu1 %vm4359_vm2, %v6851_v31  ;;  %vm4477_vm8 = vmpackc.low %vm761_vm1, %vm755_vm0  ;;  %v4486_v4 = vstv %s4343_s11  ;;  %vm959_vm11 = vcmp.eq.s32.totalorder %v4036_v37, %v4317_v61  ;;  %vm965_vm14 = vcmp.eq.s32.totalorder %v4039_v38, %v4317_v61  ;;  %v618_v24 = vadd.f32 0.5, %v4419_v51  ;;  %v6883_v51 = vld [vmem:[#allocation23_spill] sm:$0xff]  ;;  %v6895_v38 = vld [vmem:[#allocation47_spill] sm:$0xff] }
  0x95   : > { %3197 = vmatprep.subr.msk.bf16.mxu0 %vm4427_vm13, %v6851_v31  ;;  %vm4497_vm2 = vmpackc.low %vm953_vm4, %vm947_vm3  ;;  %v4507_v10 = vstv %s4365_s2  ;;  %vm780_vm12 = vcmp.eq.s32.totalorder %v4043_v39, %v4258_v9  ;;  %vm786_vm0 = vcmp.eq.s32.totalorder %v4051_v41, %v4258_v9  ;;  %v4524_v50 = vadd.s32 496, %v3936_v8 }
  0x96   : > { %vm4515_vm15 = vmpackc.low %vm966_vm7, %vm960_vm6  ;;  %v4527_v60 = vadd.s32 504, %v3936_v8  ;;  %vm972_vm13 = vcmp.eq.s32.totalorder %v4054_v42, %v4258_v9  ;;  %vm978_vm3 = vcmp.eq.s32.totalorder %v4057_v43, %v4258_v9  ;;  %v4546_v59 = vadd.f32 %v463_v21, %v459_v20 }
  0x97   : > { %3135 = vmatpush1.bf16.msk.msra.mxu1 %vm4477_vm8, %v6851_v31  ;;  %vm4538_vm1 = vmpackc.low %vm773_vm10, %vm767_vm9  ;;  %v524_v63 = vmul.f32 %v4486_v4, %v3902_v0  ;;  %vm779_vm6 = vcmp.eq.s32.totalorder %v4043_v39, %v4317_v61  ;;  %vm785_vm7 = vcmp.eq.s32.totalorder %v4051_v41, %v4317_v61  ;;  %v594_v21 = vmax.f32 %v588_v14, 0.0 }
  0x98   : > { %6869 = vst [vmem:[#allocation81_spill] sm:$0xff] %v4546_v59  ;;  %3199 = vmatpush1.bf16.msk.msra.mxu0 %vm4497_vm2, %v6851_v31  ;;  %3137 = vmatprep.subr.msk.bf16.mxu1 %vm4454_vm5, %v6851_v31  ;;  %vm4562_vm4 = vmpackc.low %vm965_vm14, %vm959_vm11  ;;  %v526_v11 = vmul.f32 %v4507_v10, %v3905_v1  ;;  %vm971_vm8 = vcmp.eq.s32.totalorder %v4054_v42, %v4317_v61  ;;  %v4593_v3 = vmul.f32 8.0, %v618_v24  ;;  %v4614_v24 = vstv %s4443_s27  ;;  %v6888_v42 = vld [vmem:[#allocation45_spill] sm:$0xff] }
  0x99   : > { %3201 = vmatprep.subr.msk.bf16.mxu0 %vm4515_vm15, %v6851_v31  ;;  %vm4581_vm5 = vmpackc.low %vm786_vm0, %vm780_vm12  ;;  %vm977_vm9 = vcmp.eq.s32.totalorder %v4057_v43, %v4317_v61  ;;  %v4591_v14 = vcombine.low %v4045_v40, %v4045_v40  ;;  %vm792_vm2 = vcmp.eq.s32.totalorder %v4060_v44, %v4258_v9  ;;  %vm798_vm11 = vcmp.eq.s32.totalorder %v4065_v48, %v4258_v9  ;;  %v6886_v43 = vld [vmem:[#allocation42_spill] sm:$0xff] }
  0x9a   : > { %vm4601_vm10 = vmpackc.low %vm978_vm3, %vm972_vm13  ;;  %v4611_v40 = vcombine.low %v4062_v45, %v4062_v45  ;;  %vm984_vm15 = vcmp.eq.s32.totalorder %v4068_v49, %v4258_v9  ;;  %vm990_vm12 = vcmp.eq.s32.totalorder %v4076_v53, %v4258_v9  ;;  %v4634_v45 = vadd.f32 0.5, %v4546_v59  ;;  %v6896_v59 = vld [vmem:[#allocation48_spill] sm:$0xff] }
  0x9b   : > { %3139 = vmatpush1.bf16.msk.msra.mxu1 %vm4538_vm1, %v6851_v31  ;;  %vm4625_vm14 = vmpackc.low %vm785_vm7, %vm779_vm6  ;;  %v4637_v6 = vstv %s4463_s3  ;;  %vm791_vm1 = vcmp.eq.s32.totalorder %v4060_v44, %v4317_v61  ;;  %vm797_vm13 = vcmp.eq.s32.totalorder %v4065_v48, %v4317_v61  ;;  %v600_v20 = vmin.f32 %v594_v21, 7.0  ;;  %s4680_s3 = sld [smem:[#allocation2 + %s4296_s6]]  ;;  %v6908_v48 = vld [vmem:[#allocation53_spill] sm:$0xff]  ;;  %v6909_v44 = vld [vmem:[#allocation54_spill] sm:$0xff] }
  0x9c   : > { %3203 = vmatpush1.bf16.msk.msra.mxu0 %vm4562_vm4, %v6851_v31  ;;  %3141 = vmatprep.subr.msk.bf16.mxu1 %vm4581_vm5, %v6851_v31  ;;  %vm4651_vm0 = vmpackc.low %vm977_vm9, %vm971_vm8  ;;  %v4659_v52 = vadd.f32 %v526_v11, %v524_v63  ;;  %vm983_vm4 = vcmp.eq.s32.totalorder %v4068_v49, %v4317_v61  ;;  %vm989_vm6 = vcmp.eq.s32.totalorder %v4076_v53, %v4317_v61  ;;  %v630_v63 = vfloor.f32 %v4593_v3  ;;  %v6887_v3 = vld [vmem:[#allocation43_spill] sm:$0xff]  ;;  %v6899_v49 = vld [vmem:[#allocation49_spill] sm:$0xff] }
  0x9d   : > { %3205 = vmatprep.subr.msk.bf16.mxu0 %vm4601_vm10, %v6851_v31  ;;  %vm4670_vm3 = vmpackc.low %vm798_vm11, %vm792_vm2  ;;  %v4684_v21 = vmul.f32 %v4614_v24, %v6883_v51  ;;  %vm804_vm5 = vcmp.eq.s32.totalorder %v6886_v43, %v4258_v9  ;;  %vm810_vm8 = vcmp.eq.s32.totalorder %v6887_v3, %v4258_v9  ;;  %vm996_vm9 = vcmp.eq.s32.totalorder %v6888_v42, %v4258_v9  ;;  %v6903_v11 = vld [vmem:[#allocation51_spill] sm:$0xff] }
  0x9e   : > { %vm4692_vm7 = vmpackc.low %vm990_vm12, %vm984_vm15  ;;  %v4708_v37 = vmul.f32 %v4637_v6, %v3902_v0  ;;  %vm1002_vm2 = vcmp.eq.s32.totalorder %v6892_v30, %v4258_v9  ;;  %vm803_vm11 = vcmp.eq.s32.totalorder %v6886_v43, %v4317_v61  ;;  %vm809_vm15 = vcmp.eq.s32.totalorder %v6887_v3, %v4317_v61 }
  0x9f   : > { %3143 = vmatpush1.bf16.msk.msra.mxu1 %vm4625_vm14, %v6851_v31  ;;  %vm4719_vm10 = vmpackc.low %vm797_vm13, %vm791_vm1  ;;  %vm995_vm14 = vcmp.eq.s32.totalorder %v6888_v42, %v4317_v61  ;;  %vm1001_vm1 = vcmp.eq.s32.totalorder %v6892_v30, %v4317_v61  ;;  %v3535_v27 = vtrunc.f32 %v600_v20  ;;  %vm833_vm13 = vcmp.eq.s32.totalorder %v6904_v16, %v4317_v61  ;;  %v6915_v42 = vld [vmem:[#allocation55_spill] sm:$0xff] }
  0xa0   : > { %3207 = vmatpush1.bf16.msk.msra.mxu0 %vm4651_vm0, %v6851_v31  ;;  %3145 = vmatprep.subr.msk.bf16.mxu1 %vm4670_vm3, %v6851_v31  ;;  %vm4743_vm12 = vmpackc.low %vm989_vm6, %vm983_vm4  ;;  %vm816_vm0 = vcmp.eq.s32.totalorder %v6895_v38, %v4258_v9  ;;  %vm1008_vm4 = vcmp.eq.s32.totalorder %v6899_v49, %v4258_v9  ;;  %vm1013_vm6 = vcmp.eq.s32.totalorder %v6900_v26, %v4317_v61  ;;  %v636_v53 = vmax.f32 %v630_v63, 0.0 }
  0xa1   : > { %6882 = sst [smem:[#allocation82_spill]] %s4680_s3  ;;  %3209 = vmatprep.subr.msk.bf16.mxu0 %vm4692_vm7, %v6851_v31  ;;  %vm4762_vm3 = vmpackc.low %vm810_vm8, %vm804_vm5  ;;  %vm1007_vm8 = vcmp.eq.s32.totalorder %v6899_v49, %v4317_v61  ;;  %vm1026_vm7 = vcmp.eq.s32.totalorder %v6909_v44, %v4258_v9  ;;  %v3536_v46 = vcvt.f32.s32 %v3535_v27  ;;  %v6916_v27 = vld [vmem:[#allocation56_spill] sm:$0xff]  ;;  %v672_v30 = vmul.f32 8.0, %v4634_v45  ;;  %s6932_s13 = smul.f32 %s4680_s3, %s4680_s3 }
  0xa2   : > { %vm4780_vm5 = vmpackc.low %vm1002_vm2, %vm996_vm9  ;;  %vm1020_vm2 = vcmp.eq.s32.totalorder %v6908_v48, %v4258_v9  ;;  %v530_v49 = vadd.f32 %v4684_v21, %v4659_v52  ;;  %v534_v52 = vmul.f32 %v4507_v10, %v6883_v51  ;;  %v535_v21 = vmul.f32 %v4614_v24, %v3905_v1 }
  0xa3   : > { %3147 = vmatpush1.bf16.msk.msra.mxu1 %vm4719_vm10, %v6851_v31  ;;  %vm4805_vm9 = vmpackc.low %vm809_vm15, %vm803_vm11  ;;  %vm827_vm10 = vcmp.eq.s32.totalorder %v6903_v11, %v4317_v61  ;;  %vm1044_vm15 = vcmp.eq.s32.totalorder %v4234_v2, %v4258_v9  ;;  %v612_v33 = vmul.u32 8, %v3536_v46  ;;  %v538_v46 = vmul.f32 %v4637_v6, %v3905_v1  ;;  %s4971_s21 = sadd.f32 %s6933_s17, %s6932_s13  ;;  %s6961_s13 = sadd.s32 2, %s3876_s14 }
  0xa4   : > { %3211 = vmatpush1.bf16.msk.msra.mxu0 %vm4743_vm12, %v6851_v31  ;;  %3149 = vmatprep.subr.msk.bf16.mxu1 %vm4762_vm3, %v6851_v31  ;;  %vm4829_vm11 = vmpackc.low %vm1001_vm1, %vm995_vm14  ;;  %vm6912_vm14 = vcmp.eq.s32.totalorder %v6896_v59, %v4258_v9  ;;  %vm858_vm3 = vcmp.eq.s32.totalorder %v4224_v55, %v4258_v9  ;;  %v531_v3 = vsub.f32 0.0, %v530_v49  ;;  %v540_v43 = vmul.f32 %v4486_v4, %v6883_v51  ;;  %s5110_s15 = sld [smem:[#allocation5 + %s6961_s13]] }
  0xa5   : > { %3213 = vmatprep.subr.msk.bf16.mxu0 %vm4780_vm5, %v6851_v31  ;;  %vm4846_vm1 = vmpackc.low %vm6912_vm14, %vm816_vm0  ;;  %vm6917_vm0 = vcmp.eq.s32.totalorder %v6900_v26, %v4258_v9  ;;  %vm852_vm5 = vcmp.eq.s32.totalorder %v4218_v54, %v4258_v9  ;;  %v536_v41 = vsub.f32 %v534_v52, %v535_v21  ;;  %v543_v20 = vmul.f32 %v4637_v6, %v6883_v51  ;;  %s5059_s17 = sadd.f32 %s388_s26, %s4971_s21  ;;  %s6960_s21 = sadd.s32 3, %s4296_s6 }
  0xa6   : > { %vm4866_vm14 = vmpackc.low %vm6917_vm0, %vm1008_vm4  ;;  %vm6920_vm4 = vcmp.eq.s32.totalorder %v6895_v38, %v4317_v61  ;;  %vm6921_vm0 = vcmp.eq.s32.totalorder %v6896_v59, %v4317_v61  ;;  %v642_v59 = vmin.f32 %v636_v53, 7.0  ;;  %v539_v53 = vmul.f32 %v4614_v24, %v3902_v0  ;;  %s5106_s26 = sld [smem:[#allocation2 + %s6960_s21]]  ;;  %s2510_s21 = smul.f32 %s4030_s12, %s4030_s12 }
  0xa7   : > { %3151 = vmatpush1.bf16.msk.msra.mxu1 %vm4805_vm9, %v6851_v31  ;;  %vm4889_vm12 = vmpackc.low %vm6921_vm0, %vm6920_vm4  ;;  %vm1050_vm9 = vcmp.eq.s32.totalorder %v4237_v57, %v4258_v9  ;;  %vm1049_vm0 = vcmp.eq.s32.totalorder %v4237_v57, %v4317_v61  ;;  %v678_v38 = vfloor.f32 %v672_v30  ;;  %v6937_v30 = vld [vmem:[#allocation69_spill] sm:$0xff]  ;;  %v548_v45 = vsub.f32 0.0, %v531_v3  ;;  %6951 = sst [smem:[#allocation84_spill]] %s5059_s17 }
  0xa8   : > { %3215 = vmatpush1.bf16.msk.msra.mxu0 %vm4829_vm11, %v6851_v31  ;;  %3153 = vmatprep.subr.msk.bf16.mxu1 %vm4846_vm1, %v6851_v31  ;;  %vm4913_vm4 = vmpackc.low %vm1013_vm6, %vm1007_vm8  ;;  %vm6926_vm6 = vcmp.eq.s32.totalorder %v6903_v11, %v4258_v9  ;;  %vm6927_vm8 = vcmp.eq.s32.totalorder %v6904_v16, %v4258_v9  ;;  %vm1043_vm11 = vcmp.eq.s32.totalorder %v4234_v2, %v4317_v61  ;;  %v3547_v26 = vtrunc.f32 %v642_v59  ;;  %v6936_v59 = vld [vmem:[#allocation68_spill] sm:$0xff]  ;;  %s390_s18 = sadd.f32 1e-12, %s5059_s17  ;;  %s5153_s6 = sld [smem:[#allocation5 + %s3876_s14]] }
  0xa9   : > { %3217 = vmatprep.subr.msk.bf16.mxu0 %vm4866_vm14, %v6851_v31  ;;  %vm4933_vm1 = vmpackc.low %vm6927_vm8, %vm6926_vm6  ;;  %vm864_vm6 = vcmp.eq.s32.totalorder %v4240_v22, %v4258_v9  ;;  %v544_v11 = vmul.f32 %v4486_v4, %v3905_v1  ;;  %v545_v16 = vmul.f32 %v4507_v10, %v3902_v0  ;;  %v684_v51 = vmax.f32 %v678_v38, 0.0  ;;  %s2507_s14 = smul.f32 %s3996_s29, %s3996_s29 }
  0xaa   : > { %vm4955_vm14 = vmpackc.low %vm1026_vm7, %vm1020_vm2  ;;  %v3548_v0 = vcvt.f32.s32 %v3547_v26  ;;  %v541_v15 = vsub.f32 %v539_v53, %v540_v43  ;;  %v5036_v26 = vadd.f32 %v536_v41, %v4708_v37  ;;  %v6950_v53 = vld [vmem:[#allocation70_spill] sm:$0xff]  ;;  %vm1068_vm8 = vcmp.eq.s32.totalorder %v4261_v56, %v4258_v9  ;;  %s2526_s19 = smul.f32 %s5110_s15, %s4020_s24 }
  0xab   : > { %3155 = vmatpush1.bf16.msk.msra.mxu1 %vm4889_vm12, %v6851_v31  ;;  %vm4984_vm7 = vmpackc.low %vm833_vm13, %vm827_vm10  ;;  %vm6938_vm13 = vcmp.eq.s32.totalorder %v6908_v48, %v4317_v61  ;;  %vm6939_vm10 = vcmp.eq.s32.totalorder %v6909_v44, %v4317_v61  ;;  %v546_v43 = vsub.f32 %v544_v11, %v545_v16  ;;  %v690_v16 = vmin.f32 %v684_v51, 7.0  ;;  %s2542_s17 = smul.f32 %s4343_s11, %s3996_s29  ;;  %s7192_s11 = sld [smem:[#allocation21_spill]] }
  0xac   : > { %3219 = vmatpush1.bf16.msk.msra.mxu0 %vm4913_vm4, %v6851_v31  ;;  %3157 = vmatprep.subr.msk.bf16.mxu1 %vm4933_vm1, %v6851_v31  ;;  %vm5010_vm12 = vmpackc.low %vm6939_vm10, %vm6938_vm13  ;;  %vm6942_vm1 = vcmp.eq.s32.totalorder %v6915_v42, %v4258_v9  ;;  %vm6943_vm13 = vcmp.eq.s32.totalorder %v6916_v27, %v4258_v9  ;;  %v654_v37 = vadd.s32 %v3548_v0, %v612_v33 }
  0xad   : > { %3221 = vmatprep.subr.msk.bf16.mxu0 %vm4955_vm14, %v6851_v31  ;;  %vm5027_vm10 = vmpackc.low %vm6943_vm13, %vm6942_vm1  ;;  %vm6946_vm14 = vcmp.eq.s32.totalorder %v4205_v58, %v4258_v9  ;;  %vm6947_vm1 = vcmp.eq.s32.totalorder %v4215_v62, %v4258_v9  ;;  %v542_v41 = vadd.f32 %v541_v15, %v538_v46  ;;  %v549_v11 = vmul.f32 %v548_v45, %v4486_v4 }
  0xae   : > { %vm5046_vm13 = vmpackc.low %vm6947_vm1, %vm6946_vm14  ;;  %vm6952_vm14 = vcmp.eq.s32.totalorder %v6915_v42, %v4317_v61  ;;  %vm6953_vm1 = vcmp.eq.s32.totalorder %v6916_v27, %v4317_v61  ;;  %v547_v33 = vadd.f32 %v546_v43, %v543_v20  ;;  %v550_v46 = vmul.f32 %v5036_v26, %v4637_v6 }
  0xaf   : > { %3159 = vmatpush1.bf16.msk.msra.mxu1 %vm4984_vm7, %v6851_v31  ;;  %vm5070_vm4 = vmpackc.low %vm6953_vm1, %vm6952_vm14  ;;  %v557_v49 = vmul.f32 %v548_v45, %v4507_v10  ;;  %v562_v0 = vmul.f32 %v5036_v26, %v4614_v24  ;;  %vm6956_vm7 = vcmp.eq.s32.totalorder %v4205_v58, %v4317_v61  ;;  %vm6957_vm14 = vcmp.eq.s32.totalorder %v4215_v62, %v4317_v61 }
  0xb0   : > { %3223 = vmatpush1.bf16.msk.msra.mxu0 %vm5010_vm12, %v6851_v31  ;;  %3161 = vmatprep.subr.msk.bf16.mxu1 %vm5027_vm10, %v6851_v31  ;;  %vm5095_vm1 = vmpackc.low %vm6957_vm14, %vm6956_vm7  ;;  %vm875_vm2 = vcmp.eq.s32.totalorder %v4252_v47, %v4317_v61  ;;  %vm881_vm12 = vcmp.eq.s32.totalorder %v6950_v53, %v4317_v61  ;;  %v660_v1 = vmul.u32 8, %v654_v37  ;;  %v3559_v51 = vtrunc.f32 %v690_v16 }
  0xb1   : > { %v552_v15 = vsub.f32 0.0, %v542_v41  ;;  %v558_v52 = vmul.f32 %v542_v41, %v4637_v6  ;;  %3225 = vmatprep.subr.msk.bf16.mxu0 %vm5046_vm13, %v6851_v31  ;;  %vm5125_vm10 = vmpackc.low %vm858_vm3, %vm852_vm5  ;;  %vm1067_vm7 = vcmp.eq.s32.totalorder %v4261_v56, %v4317_v61  ;;  %v551_v21 = vadd.f32 %v550_v46, %v549_v11  ;;  %v6967_v11 = vld [vmem:[#allocation73_spill] sm:$0xff] }
  0xb2   : > { %v554_v37 = vmul.f32 %v547_v33, %v4507_v10  ;;  %v560_v16 = vsub.f32 0.0, %v547_v33  ;;  %v565_v38 = vmul.f32 %v548_v45, %v4614_v24  ;;  %vm5141_vm3 = vmpackc.low %vm1050_vm9, %vm1044_vm15  ;;  %v3560_v46 = vcvt.f32.s32 %v3559_v51 }
  0xb3   : > { %v553_v45 = vmul.f32 %v552_v15, %v4614_v24  ;;  %v559_v62 = vadd.f32 %v558_v52, %v557_v49  ;;  %v566_v58 = vmul.f32 %v547_v33, %v4637_v6  ;;  %3163 = vmatpush1.bf16.msk.msra.mxu1 %vm5070_vm4, %v6851_v31  ;;  %vm6968_vm15 = vcmp.eq.s32.totalorder %v4218_v54, %v4317_v61  ;;  %v6972_v24 = vld [vmem:[#allocation75_spill] sm:$0xff]  ;;  %v6973_v6 = vld [vmem:[#allocation76_spill] sm:$0xff]  ;;  %v5176_v15 = vld [vmem:[%s3893_s5] sm:$0x1] }
  0xb4   : > { %vm6969_vm9 = vcmp.eq.s32.totalorder %v4224_v55, %v4317_v61  ;;  %vm1080_vm5 = vcmp.eq.s32.totalorder %v6972_v24, %v4258_v9  ;;  %vm1086_vm14 = vcmp.eq.s32.totalorder %v6973_v6, %v4258_v9  ;;  %v561_v63 = vmul.f32 %v560_v16, %v4486_v4  ;;  %3227 = vmatpush1.bf16.msk.msra.mxu0 %vm5095_vm1, %v6851_v31  ;;  %vm5193_vm4 = vmpackc.low %vm1049_vm0, %vm1043_vm11 }
  0xb5   : > { %vm5164_vm13 = vmpackc.low %vm6969_vm9, %vm6968_vm15  ;;  %v568_v33 = vsub.f32 0.0, %v5036_v26  ;;  %v570_v49 = vmul.f32 %v542_v41, %v4486_v4  ;;  %v6974_v52 = vstv %s4680_s3  ;;  %3165 = vmatprep.subr.msk.bf16.mxu1 %vm5125_vm10, %v6851_v31  ;;  %vm887_vm1 = vcmp.eq.s32.totalorder %v4268_v35, %v4317_v61  ;;  %3229 = vmatprep.subr.msk.bf16.mxu0 %vm5141_vm3, %v6851_v31 }
  0xb6   : > { %v392_v44 = vmul.f32 %v5176_v15, %v6974_v52  ;;  %v702_v26 = vadd.s32 %v3560_v46, %v660_v1  ;;  %v555_v41 = vadd.f32 %v554_v37, %v553_v45  ;;  %v567_v20 = vadd.f32 %v566_v58, %v565_v38  ;;  %v5221_v38 = vld [vmem:[%s3893_s5 + $0x1] sm:$0x1]  ;;  %v5227_v46 = vld [vmem:[%s3893_s5 + $0x2] sm:$0x1]  ;;  %s2508_s5 = smul.f32 %s4020_s24, %s4020_s24 }
  0xb7   : > { %v6717_v43 = vstv %s4794_s1  ;;  %vm6977_vm0 = vcmp.eq.s32.totalorder %v4243_v17, %v4258_v9  ;;  %v563_v58 = vadd.f32 %v562_v0, %v561_v63  ;;  %v569_v3 = vmul.f32 %v568_v33, %v4507_v10  ;;  %v6985_v10 = vld [vmem:[#allocation77_spill] sm:$0xff]  ;;  %3167 = vmatpush1.bf16.msk.msra.mxu1 %vm5164_vm13, %v6851_v31 }
  0xb8   : > { %vm5211_vm11 = vmpackc.low %vm6977_vm0, %vm864_vm6  ;;  %v6980_v1 = vstv %s4704_s20  ;;  %v397_v45 = vmul.f32 %v5227_v46, %v6717_v43  ;;  %vm6981_vm6 = vcmp.eq.s32.totalorder %v6936_v59, %v4258_v9  ;;  %vm6982_vm3 = vcmp.eq.s32.totalorder %v6937_v30, %v4258_v9  ;;  %3231 = vmatpush1.bf16.msk.msra.mxu0 %vm5193_vm4, %v6851_v31  ;;  %s2509_s13 = sadd.f32 %s2508_s5, %s2507_s14  ;;  %s2528_s5 = smul.f32 %s5114_s4, %s4030_s12 }
  0xb9   : > { %v394_v37 = vmul.f32 %v5221_v38, %v6980_v1  ;;  %vm5238_vm0 = vmpackc.low %vm6982_vm3, %vm6981_vm6  ;;  %v5246_v63 = vadd.f32 %v555_v41, %v551_v21  ;;  %v402_v33 = vstv %s390_s18  ;;  %vm6987_vm6 = vcmp.eq.s32.totalorder %v4240_v22, %v4317_v61  ;;  %3169 = vmatprep.subr.msk.bf16.mxu1 %vm5211_vm11, %v6851_v31  ;;  %s2515_s18 = smul.f32 %s3882_s22, %s3908_s9 }
  0xba   : > { %vm6988_vm3 = vcmp.eq.s32.totalorder %v4243_v17, %v4317_v61  ;;  %vm1092_vm10 = vcmp.eq.s32.totalorder %v4397_v7, %v4258_v9  ;;  %v5267_v21 = vadd.f32 %v563_v58, %v559_v62  ;;  %v571_v51 = vadd.f32 %v570_v49, %v569_v3  ;;  %v6997_v58 = vld [vmem:[#allocation65_spill] sm:$0xff]  ;;  %3233 = vmatprep.subr.msk.bf16.mxu0 %vm5238_vm0, %v6851_v31  ;;  %s2511_s14 = sadd.f32 %s2510_s21, %s2509_s13  ;;  %s2532_s22 = smul.f32 %s4680_s3, %s3908_s9 }
  0xbb   : > { %6986 = vst [vmem:[#allocation23_spill] sm:$0xff] %v5246_v63  ;;  %vm5259_vm15 = vmpackc.low %vm6988_vm3, %vm6987_vm6  ;;  %v395_v41 = vadd.f32 %v394_v37, %v392_v44  ;;  %3646 = vrcp.f32 %v402_v33  ;;  %vm6992_vm13 = vcmp.eq.s32.totalorder %v6936_v59, %v4317_v61  ;;  %vm6993_vm6 = vcmp.eq.s32.totalorder %v6937_v30, %v4317_v61  ;;  %v6996_v44 = vld [vmem:[#allocation25_spill] sm:$0xff]  ;;  %s2543_s21 = smul.f32 %s4365_s2, %s4020_s24 }
  0xbc   : > { %6991 = vst [vmem:[#allocation55_spill] sm:$0xff] %v5267_v21  ;;  %vm5281_vm3 = vmpackc.low %vm6993_vm6, %vm6992_vm13  ;;  %v5290_v49 = vrot.slane %v702_v26, %v6996_v44  ;;  %v578_v4 = vadd.f32 0.5, %v5246_v63  ;;  %v399_v16 = vstv %s5106_s26  ;;  %v470_v3 = vmul.f32 %v5176_v15, %v6997_v58  ;;  %3171 = vmatpush1.bf16.msk.msra.mxu1 %vm5259_vm15, %v6851_v31  ;;  %s2525_s26 = smul.f32 %s4197_s30, %s3996_s29  ;;  %s3508_s0 = sadd.f32 -1.0, %s2511_s14 }
  0xbd   : > { %vm6998_vm11 = vcmp.eq.s32.totalorder %v4252_v47, %v4258_v9  ;;  %vm6999_vm13 = vcmp.eq.s32.totalorder %v6950_v53, %v4258_v9  ;;  %vm1091_vm4 = vcmp.eq.s32.totalorder %v4397_v7, %v4317_v61  ;;  %v5313_v1 = vadd.f32 %v571_v51, %v567_v20  ;;  %3235 = vmatpush1.bf16.msk.msra.mxu0 %vm5281_vm3, %v6851_v31  ;;  %s2544_s29 = sadd.f32 %s2543_s21, %s2542_s17  ;;  %s7193_s14 = sld [smem:[#allocation83_spill]] }
  0xbe   : > { %vm5305_vm6 = vmpackc.low %vm6999_vm13, %vm6998_vm11  ;;  %v620_v37 = vadd.f32 0.5, %v5267_v21  ;;  %v398_v0 = vadd.f32 %v397_v45, %v395_v41  ;;  %v5317_v33 = vstv %s5110_s15  ;;  %vm7003_vm0 = vcmp.eq.s32.totalorder %v4264_v5, %v4258_v9  ;;  %s2527_s7 = sadd.f32 %s2526_s19, %s2525_s26  ;;  %s7190_s19 = sld [smem:[#allocation20_spill]] }
  0xbf   : > { %7002 = vst [vmem:[#allocation56_spill] sm:$0xff] %v5313_v1  ;;  %vm5325_vm11 = vmpackc.low %vm7003_vm0, %vm1068_vm8  ;;  %vm912_vm13 = vcmp.eq.s32.totalorder %v4436_v23, %v4258_v9  ;;  %v584_v20 = vmul.f32 8.0, %v578_v4  ;;  %v472_v45 = vmul.f32 %v5221_v38, %v5317_v33  ;;  %v5336_v51 = vstv %s5114_s4  ;;  %3173 = vmatprep.subr.msk.bf16.mxu1 %vm5305_vm6, %v6851_v31  ;;  %s7191_s26 = sld [smem:[#allocation82_spill]]  ;;  %s2553_s24 = smul.f32 %s4197_s30, %s4197_s30 }
  0xc0   : > { %v5339_v41 = vstv %s5153_s6  ;;  %vm5350_vm8 = vmpackc.low %vm881_vm12, %vm875_vm2  ;;  %vm1104_vm0 = vcmp.eq.s32.totalorder %v4524_v50, %v4258_v9  ;;  %vm1110_vm9 = vcmp.eq.s32.totalorder %v4527_v60, %v4258_v9  ;;  %v626_v4 = vmul.f32 8.0, %v620_v37  ;;  %3237 = vmatprep.subr.msk.bf16.mxu0 %vm5325_vm11, %v6851_v31  ;;  %s2516_s6 = smul.f32 %s3888_s28, %s3933_s8 }
  0xc1   : > { %v668_v52 = vadd.f32 0.5, %v5313_v1  ;;  %v400_v63 = vadd.f32 %v399_v16, %v398_v0  ;;  %v475_v30 = vmul.f32 %v5227_v46, %v5336_v51  ;;  %vm7008_vm2 = vcmp.eq.s32.totalorder %v4264_v5, %v4317_v61  ;;  %vm5410_vm11 = vmpackc.low %vm1086_vm14, %vm1080_vm5  ;;  %3175 = vmatpush1.bf16.msk.msra.mxu1 %vm5350_vm8, %v6851_v31  ;;  %s2533_s28 = smul.f32 %s4704_s20, %s3933_s8  ;;  %s2529_s8 = sadd.f32 %s2528_s5, %s2527_s7 }
  0xc2   : > { %vm5373_vm12 = vmpackc.low %vm7008_vm2, %vm1067_vm7  ;;  %v590_v62 = vfloor.f32 %v584_v20  ;;  %v473_v16 = vadd.f32 %v472_v45, %v470_v3  ;;  %v479_v26 = vmul.f32 %v5176_v15, %v5339_v41  ;;  %v480_v0 = vmul.f32 %v5227_v46, %v5317_v33  ;;  %s2517_s16 = sadd.f32 %s2516_s6, %s2515_s18  ;;  %s2535_s18 = smul.f32 %s4794_s1, %s3943_s23 }
  0xc3   : > { %vm7011_vm7 = vcmp.eq.s32.totalorder %v4268_v35, %v4258_v9  ;;  %vm7012_vm6 = vcmp.eq.s32.totalorder %v6967_v11, %v4258_v9  ;;  %vm1103_vm3 = vcmp.eq.s32.totalorder %v4524_v50, %v4317_v61  ;;  %vm1109_vm15 = vcmp.eq.s32.totalorder %v4527_v60, %v4317_v61  ;;  %3239 = vmatpush1.bf16.msk.msra.mxu0 %vm5373_vm12, %v6851_v31  ;;  %s2534_s9 = sadd.f32 %s2533_s28, %s2532_s22  ;;  %s7188_s6 = sld [smem:[#allocation24_spill]] }
  0xc4   : > { %vm5394_vm2 = vmpackc.low %vm7012_vm6, %vm7011_vm7  ;;  %v632_v3 = vfloor.f32 %v626_v4  ;;  %v674_v20 = vmul.f32 8.0, %v668_v52  ;;  %v401_v43 = vmul.f32 2.0, %v400_v63  ;;  %v481_v45 = vmul.f32 %v5221_v38, %v5336_v51  ;;  %3241 = vmatprep.subr.msk.bf16.mxu0 %vm5410_vm11, %v6851_v31  ;;  %s6509_s13 = sadd.f32 %s2518_s25, %s2517_s16  ;;  %s2554_s16 = smul.f32 %s5110_s15, %s5110_s15 }
  0xc5   : > { %vm734_vm7 = vcmp.eq.s32.totalorder %v3936_v8, %v5290_v49  ;;  %vm740_vm6 = vcmp.eq.s32.totalorder %v3955_v13, %v5290_v49  ;;  %v596_v63 = vmax.f32 %v590_v62, 0.0  ;;  %v476_v4 = vadd.f32 %v475_v30, %v473_v16  ;;  %3177 = vmatprep.subr.msk.bf16.mxu1 %vm5394_vm2, %v6851_v31  ;;  %v3647_v1 = vpop.eup %3646  ;;  %s2513_s25 = smul.f32 %s3508_s0, %s3508_s0  ;;  %s2536_s2 = sadd.f32 %s2535_s18, %s2534_s9 }
  0xc6   : > { %v484_v52 = vmul.f32 %v5221_v38, %v5339_v41  ;;  %v485_v56 = vmul.f32 %v5176_v15, %v5336_v51  ;;  %vm7017_vm14 = vcmp.eq.s32.totalorder %v6967_v11, %v4317_v61  ;;  %v638_v30 = vmax.f32 %v632_v3, 0.0  ;;  %s2520_s22 = smul.f32 %s6509_s13, %s6509_s13  ;;  %s7194_s23 = sld [smem:[#allocation78_spill]] }
  0xc7   : > { %vm5431_vm5 = vmpackc.low %vm7017_vm14, %vm887_vm1  ;;  %v680_v62 = vfloor.f32 %v674_v20  ;;  %v482_v16 = vsub.f32 %v480_v0, %v481_v45  ;;  %v486_v57 = vmul.f32 %v5227_v46, %v6997_v58  ;;  %vm7020_vm1 = vcmp.eq.s32.totalorder %v6972_v24, %v4317_v61  ;;  %s6522_s28 = smul.f32 %s2529_s8, %s2529_s8  ;;  %s7195_s7 = sld [smem:[#allocation79_spill]] }
  0xc8   : > { %vm7021_vm8 = vcmp.eq.s32.totalorder %v6973_v6, %v4317_v61  ;;  %v602_v0 = vmin.f32 %v596_v63, 7.0  ;;  %v477_v3 = vsub.f32 0.0, %v476_v4  ;;  %v489_v37 = vmul.f32 %v5227_v46, %v5339_v41  ;;  %3179 = vmatpush1.bf16.msk.msra.mxu1 %vm5431_vm5, %v6851_v31  ;;  %s2555_s17 = sadd.f32 %s2554_s16, %s2553_s24  ;;  %s7196_s5 = sld [smem:[#allocation22_spill]] }
  0xc9   : > { %vm5449_vm14 = vmpackc.low %vm7021_vm8, %vm7020_vm1  ;;  %v490_v20 = vmul.f32 %v5221_v38, %v6997_v58  ;;  %vm7024_vm12 = vcmp.eq.s32.totalorder %v6985_v10, %v4258_v9  ;;  %vm7025_vm2 = vcmp.eq.s32.totalorder %v4327_v12, %v4258_v9  ;;  %v644_v63 = vmin.f32 %v638_v30, 7.0  ;;  %s2556_s21 = smul.f32 %s5114_s4, %s5114_s4 }
  0xca   : > { %vm5466_vm1 = vmpackc.low %vm7025_vm2, %vm7024_vm12  ;;  %v686_v4 = vmax.f32 %v680_v62, 0.0  ;;  %v5470_v6 = vadd.f32 %v482_v16, %v479_v26  ;;  %v487_v24 = vsub.f32 %v485_v56, %v486_v57  ;;  %vm7028_vm11 = vcmp.eq.s32.totalorder %v4417_v18, %v4258_v9  ;;  %3243 = vmatpush1.bf16.msk.msra.mxu0 %vm5449_vm14, %v6851_v31  ;;  %s2537_s0 = smul.f32 %s2536_s2, %s2536_s2 }
  0xcb   : > { %vm5478_vm8 = vmpackc.low %vm7028_vm11, %vm1092_vm10  ;;  %v3539_v2 = vtrunc.f32 %v602_v0  ;;  %v404_v48 = vmul.f32 %v3647_v1, %v401_v43  ;;  %v491_v26 = vmul.f32 %v5176_v15, %v5317_v33  ;;  %v494_v30 = vsub.f32 0.0, %v477_v3  ;;  %3181 = vmatprep.subr.msk.bf16.mxu1 %vm5466_vm1, %v6851_v31  ;;  %s2562_s9 = smul.f32 %s7193_s14, %s7192_s11  ;;  %s2557_s18 = sadd.f32 %s2556_s21, %s2555_s17 }
  0xcc   : > { %vm7031_vm12 = vcmp.eq.s32.totalorder %v6985_v10, %v4317_v61  ;;  %vm7032_vm10 = vcmp.eq.s32.totalorder %v4327_v12, %v4317_v61  ;;  %v3551_v56 = vtrunc.f32 %v644_v63  ;;  %v692_v43 = vmin.f32 %v686_v4, 7.0  ;;  %3245 = vmatprep.subr.msk.bf16.mxu0 %vm5478_vm8, %v6851_v31  ;;  %vm5543_vm1 = vmpackc.low %vm1110_vm9, %vm1104_vm0  ;;  %s2571_s8 = smul.f32 %s7194_s23, %s4197_s30  ;;  %s7197_s21 = sld [smem:[#allocation12_spill]] }
  0xcd   : > { %vm5493_vm2 = vmpackc.low %vm7032_vm10, %vm7031_vm12  ;;  %v5497_v62 = vadd.f32 %v487_v24, %v484_v52  ;;  %v496_v16 = vmul.f32 %v5470_v6, %v5339_v41  ;;  %vm7035_vm5 = vcmp.eq.s32.totalorder %v4417_v18, %v4317_v61  ;;  %v3540_v24 = vcvt.f32.s32 %v3539_v2  ;;  %s3509_s2 = sadd.f32 -1.0, %s2557_s18  ;;  %s2586_s16 = smul.f32 %s7194_s23, %s7194_s23 }
  0xce   : > { %vm5513_vm11 = vmpackc.low %vm7035_vm5, %vm1091_vm4  ;;  %v7038_v52 = vstv %s4680_s3  ;;  %v7039_v3 = vstv %s4704_s20  ;;  %v7040_v1 = vstv %s4794_s1  ;;  %vm7041_vm4 = vcmp.eq.s32.totalorder %v4439_v32, %v4258_v9  ;;  %3183 = vmatpush1.bf16.msk.msra.mxu1 %vm5493_vm2, %v6851_v31  ;;  %s7189_s20 = sld [smem:[#allocation84_spill]]  ;;  %s2545_s3 = smul.f32 %s4443_s27, %s4030_s12 }
  0xcf   : > { %v405_v0 = vmul.f32 %v404_v48, %v7038_v52  ;;  %v407_v21 = vmul.f32 %v404_v48, %v7039_v3  ;;  %v409_v63 = vmul.f32 %v404_v48, %v7040_v1  ;;  %vm5532_vm14 = vmpackc.low %vm7041_vm4, %vm912_vm13  ;;  %v3552_v2 = vcvt.f32.s32 %v3551_v56  ;;  %3247 = vmatpush1.bf16.msk.msra.mxu0 %vm5513_vm11, %v6851_v31  ;;  %s2559_s14 = smul.f32 %s3509_s2, %s3509_s2 }
  0xd0   : > { %v3563_v4 = vtrunc.f32 %v692_v43  ;;  %v492_v52 = vsub.f32 %v490_v20, %v491_v26  ;;  %v495_v3 = vmul.f32 %v494_v30, %v6997_v58  ;;  %v614_v5 = vmul.u32 8, %v3540_v24  ;;  %3185 = vmatprep.subr.msk.bf16.mxu1 %vm5532_vm14, %v6851_v31  ;;  %vm5582_vm8 = vmpackc.low %vm1109_vm15, %vm1103_vm3  ;;  %3249 = vmatprep.subr.msk.bf16.mxu0 %vm5543_vm1, %v6851_v31  ;;  %s2546_s12 = sadd.f32 %s2545_s3, %s2544_s29  ;;  %s2572_s29 = smul.f32 %s7195_s7, %s5110_s15 }
  0xd1   : > { %v5548_v1 = vsub.f32 %v5176_v15, %v405_v0  ;;  %v5551_v56 = vsub.f32 %v5221_v38, %v407_v21  ;;  %v5554_v20 = vsub.f32 %v5227_v46, %v409_v63  ;;  %vm7047_vm9 = vcmp.eq.s32.totalorder %v4436_v23, %v4317_v61  ;;  %vm3252_vm15 = vmpackc.low %vm740_vm6, %vm734_vm7  ;;  %s2531_s3 = sadd.f32 %s6522_s28, %s2513_s25  ;;  %s2587_s30 = smul.f32 %s7195_s7, %s7195_s7 }
  0xd2   : > { %vm7048_vm13 = vcmp.eq.s32.totalorder %v4439_v32, %v4317_v61  ;;  %v3564_v15 = vcvt.f32.s32 %v3563_v4  ;;  %v493_v38 = vadd.f32 %v492_v52, %v489_v37  ;;  %v497_v26 = vadd.f32 %v496_v16, %v495_v3  ;;  %s6532_s13 = smul.f32 %s2546_s12, %s2546_s12 }
  0xd3   : > { %7046 = vst [vmem:[#allocation70_spill] sm:$0xff] %v5554_v20  ;;  %vm5565_vm0 = vmpackc.low %vm7048_vm13, %vm7047_vm9  ;;  %v498_v46 = vsub.f32 0.0, %v5497_v62  ;;  %v656_v37 = vadd.s32 %v3552_v2, %v614_v5  ;;  %v575_v43 = vadd.f32 0.5, %v5548_v1  ;;  %v617_v16 = vadd.f32 0.5, %v5551_v56  ;;  %3251 = vmatpush1.bf16.msk.msra.mxu0 %vm5582_vm8, %v6851_v31  ;;  %s2589_s12 = smul.f32 %s4443_s27, %s4443_s27 }
  0xd4   : > { %v665_v59 = vadd.f32 0.5, %v5554_v20  ;;  %v500_v24 = vmul.f32 %v493_v38, %v5317_v33  ;;  %v503_v0 = vmul.f32 %v494_v30, %v5317_v33  ;;  %v504_v21 = vmul.f32 %v5497_v62, %v5339_v41  ;;  %3187 = vmatpush1.bf16.msk.msra.mxu1 %vm5565_vm0, %v6851_v31 }
  0xd5   : > { %v499_v61 = vmul.f32 %v498_v46, %v5336_v51  ;;  %v662_v63 = vmul.u32 8, %v656_v37  ;;  %v581_v45 = vmul.f32 8.0, %v575_v43  ;;  %v623_v2 = vmul.f32 8.0, %v617_v16  ;;  %3253 = vmatprep.subr.msk.bf16.mxu1 %vm3252_vm15, %v6851_v31 }
  0xd6   : > { %v671_v4 = vmul.f32 8.0, %v665_v59  ;;  %v505_v3 = vadd.f32 %v504_v21, %v503_v0  ;;  %v506_v48 = vsub.f32 0.0, %v493_v38  ;;  %v508_v5 = vmul.f32 %v5470_v6, %v5336_v51  ;;  %2163 = vmatmul.mubr.bf16.vlgmr.msra.gmra.mrb[0].mxu0 %v4611_v40 }
  0xd7   : > { %v501_v52 = vadd.f32 %v500_v24, %v499_v61  ;;  %v704_v46 = vadd.s32 %v3564_v15, %v662_v63  ;;  %v587_v37 = vfloor.f32 %v581_v45  ;;  %v629_v43 = vfloor.f32 %v623_v2  ;;  %2122 = vmatmul.mubr.bf16.vlgmr.msra.gmra.mrb[0].mxu1 %v4591_v14 }
  0xd8   : > { %v677_v16 = vfloor.f32 %v671_v4  ;;  %v507_v9 = vmul.f32 %v506_v48, %v6997_v58  ;;  %v511_v61 = vmul.f32 %v494_v30, %v5336_v51  ;;  %v512_v24 = vmul.f32 %v493_v38, %v5339_v41  ;;  %v7053_v51 = vld [vmem:[#allocation40_spill] sm:$0xff] }
  0xd9   : > { %v5612_v59 = vadd.f32 %v501_v52, %v497_v26  ;;  %v5619_v0 = vrot.slane %v704_v46, %v6996_v44  ;;  %v593_v57 = vmax.f32 %v587_v37, 0.0  ;;  %v635_v21 = vmax.f32 %v629_v43, 0.0  ;;  %2203 = vmatprep.mubr.bf16.mxu1 %v7053_v51  ;;  %2285 = vmatprep.mubr.bf16.mxu0 %v7053_v51 }
  0xda   : > { %v683_v20 = vmax.f32 %v677_v16, 0.0  ;;  %v509_v15 = vadd.f32 %v508_v5, %v507_v9  ;;  %v513_v63 = vadd.f32 %v512_v24, %v511_v61  ;;  %v514_v26 = vsub.f32 0.0, %v5470_v6 }
  0xdb   : > { %v516_v45 = vmul.f32 %v5497_v62, %v6997_v58  ;;  %vm736_vm3 = vcmp.eq.s32.totalorder %v3936_v8, %v5619_v0  ;;  %vm742_vm7 = vcmp.eq.s32.totalorder %v3955_v13, %v5619_v0  ;;  %v599_v41 = vmin.f32 %v593_v57, 7.0 }
  0xdc   : > { %v641_v30 = vmin.f32 %v635_v21, 7.0  ;;  %vm3380_vm6 = vmpackc.low %vm742_vm7, %vm736_vm3  ;;  %v689_v38 = vmin.f32 %v683_v20, 7.0  ;;  %v5631_v2 = vadd.f32 %v509_v15, %v505_v3  ;;  %v515_v6 = vmul.f32 %v514_v26, %v5317_v33 }
  0xdd   : > { %v577_v58 = vadd.f32 0.5, %v5612_v59  ;;  %3381 = vmatprep.subr.msk.bf16.mxu0 %vm3380_vm6, %v6851_v31  ;;  %v3533_v62 = vtrunc.f32 %v599_v41  ;;  %vm746_vm12 = vcmp.eq.s32.totalorder %v3974_v19, %v5290_v49  ;;  %vm752_vm10 = vcmp.eq.s32.totalorder %v3989_v25, %v5290_v49 }
  0xde   : > { %v3545_v4 = vtrunc.f32 %v641_v30  ;;  %v517_v52 = vadd.f32 %v516_v45, %v515_v6  ;;  %v619_v5 = vadd.f32 0.5, %v5631_v2  ;;  %v3557_v43 = vtrunc.f32 %v689_v38  ;;  %vm3256_vm11 = vmpackc.low %vm752_vm10, %vm746_vm12 }
  0xdf   : > { %v583_v48 = vmul.f32 8.0, %v577_v58  ;;  %v3534_v46 = vcvt.f32.s32 %v3533_v62  ;;  %vm758_vm9 = vcmp.eq.s32.totalorder %v4002_v28, %v5290_v49  ;;  %vm764_vm13 = vcmp.eq.s32.totalorder %v4005_v29, %v5290_v49 }
  0xe0   : > { %v3546_v37 = vcvt.f32.s32 %v3545_v4  ;;  %v5637_v16 = vadd.f32 %v517_v52, %v513_v63  ;;  %v625_v3 = vmul.f32 8.0, %v619_v5  ;;  %v3558_v21 = vcvt.f32.s32 %v3557_v43  ;;  %vm3260_vm3 = vmpackc.low %vm764_vm13, %vm758_vm9 }
  0xe1   : > { %v589_v20 = vfloor.f32 %v583_v48  ;;  %v611_v9 = vmul.u32 8, %v3534_v46  ;;  %vm748_vm0 = vcmp.eq.s32.totalorder %v3974_v19, %v5619_v0  ;;  %vm754_vm8 = vcmp.eq.s32.totalorder %v3989_v25, %v5619_v0 }
  0xe2   : > { %v631_v33 = vfloor.f32 %v625_v3  ;;  %v667_v24 = vadd.f32 0.5, %v5637_v16  ;;  %vm770_vm12 = vcmp.eq.s32.totalorder %v4026_v34, %v5290_v49  ;;  %vm776_vm10 = vcmp.eq.s32.totalorder %v4033_v36, %v5290_v49 }
  0xe3   : > { %v595_v61 = vmax.f32 %v589_v20, 0.0  ;;  %v653_v57 = vadd.s32 %v3546_v37, %v611_v9  ;;  %v7140_v9 = vmov 0 }
  0xe4   : > { %v637_v26 = vmax.f32 %v631_v33, 0.0  ;;  %v673_v45 = vmul.f32 8.0, %v667_v24  ;;  %v7069_v24 = vmov 0 }
  0xe5   : > { %v601_v15 = vmin.f32 %v595_v61, 7.0  ;;  %v659_v51 = vmul.u32 8, %v653_v57  ;;  %v7056_v61 = vld [vmem:[#allocation34_spill] sm:$0xff]  ;;  %v7072_v57 = vld [vmem:[#allocation52_spill] sm:$0xff] }
  0xe6   : > { %v643_v30 = vmin.f32 %v637_v26, 7.0  ;;  %v679_v6 = vfloor.f32 %v673_v45  ;;  %v7079_v26 = vmov 0  ;;  %v7082_v45 = vmov 0 }
  0xe7   : > { %v3537_v41 = vtrunc.f32 %v601_v15  ;;  %v701_v58 = vadd.s32 %v3558_v21, %v659_v51  ;;  %v7073_v21 = vmov 0  ;;  %v7076_v15 = vmov 0  ;;  %v7113_v51 = vld [vmem:[#allocation32_spill] sm:$0xff] }
  0xe8   : > { %v3549_v38 = vtrunc.f32 %v643_v30  ;;  %v685_v62 = vmax.f32 %v679_v6, 0.0  ;;  %v7115_v30 = vmov 0  ;;  %v7118_v6 = vld [vmem:[#allocation35_spill] sm:$0xff] }
  0xe9   : > { %v3538_v63 = vcvt.f32.s32 %v3537_v41  ;;  %v5645_v4 = vrot.slane %v701_v58, %v6996_v44  ;;  %v7114_v41 = vld [vmem:[#allocation33_spill] sm:$0xff]  ;;  %v7119_v58 = vld [vmem:[#allocation36_spill] sm:$0xff] }
  0xea   : > { %v3550_v48 = vcvt.f32.s32 %v3549_v38  ;;  %v691_v5 = vmin.f32 %v685_v62, 7.0  ;;  %v7124_v38 = vld [vmem:[#allocation41_spill] sm:$0xff]  ;;  %v7125_v62 = vmov 0 }
  0xeb   : > { %v613_v52 = vmul.u32 8, %v3538_v63  ;;  %vm733_vm2 = vcmp.eq.s32.totalorder %v3936_v8, %v5645_v4  ;;  %vm739_vm5 = vcmp.eq.s32.totalorder %v3955_v13, %v5645_v4  ;;  %vm745_vm4 = vcmp.eq.s32.totalorder %v3974_v19, %v5645_v4 }
  0xec   : > { %vm751_vm14 = vcmp.eq.s32.totalorder %v3989_v25, %v5645_v4  ;;  %vm3254_vm1 = vmpackc.low %vm739_vm5, %vm733_vm2  ;;  %v3561_v37 = vtrunc.f32 %v691_v5  ;;  %vm757_vm7 = vcmp.eq.s32.totalorder %v4002_v28, %v5645_v4  ;;  %vm763_vm6 = vcmp.eq.s32.totalorder %v4005_v29, %v5645_v4 }
  0xed   : > { %v655_v46 = vadd.s32 %v3550_v48, %v613_v52  ;;  %3255 = vmatpush1.bf16.msk.msra.mxu1 %vm3254_vm1, %v6851_v31  ;;  %vm3258_vm15 = vmpackc.low %vm751_vm14, %vm745_vm4  ;;  %vm782_vm5 = vcmp.eq.s32.totalorder %v4043_v39, %v5290_v49  ;;  %vm769_vm1 = vcmp.eq.s32.totalorder %v4026_v34, %v5645_v4  ;;  %vm775_vm9 = vcmp.eq.s32.totalorder %v4033_v36, %v5645_v4  ;;  %v7128_v52 = vld [vmem:[#allocation45_spill] sm:$0xff]  ;;  %v7129_v48 = vld [vmem:[#allocation46_spill] sm:$0xff] }
  0xee   : > { %v3562_v20 = vcvt.f32.s32 %v3561_v37  ;;  %3257 = vmatprep.subr.msk.bf16.mxu1 %vm3256_vm11, %v6851_v31  ;;  %vm5673_vm2 = vmpackc.low %vm754_vm8, %vm748_vm0  ;;  %vm788_vm11 = vcmp.eq.s32.totalorder %v7056_v61, %v5290_v49  ;;  %v7120_v63 = vmov 0  ;;  %v7130_v5 = vmov 0  ;;  %v7134_v37 = vld [vmem:[#allocation50_spill] sm:$0xff] }
  0xef   : > { %v661_v43 = vmul.u32 8, %v655_v46  ;;  %vm3262_vm4 = vmpackc.low %vm763_vm6, %vm757_vm7  ;;  %vm760_vm6 = vcmp.eq.s32.totalorder %v4002_v28, %v5619_v0  ;;  %v7133_v46 = vld [vmem:[#allocation49_spill] sm:$0xff] }
  0xf0   : > { %vm3264_vm14 = vmpackc.low %vm776_vm10, %vm770_vm12  ;;  %vm766_vm12 = vcmp.eq.s32.totalorder %v4005_v29, %v5619_v0 }
  0xf1   : > { %v703_v3 = vadd.s32 %v3562_v20, %v661_v43  ;;  %3259 = vmatpush1.bf16.msk.msra.mxu1 %vm3258_vm15, %v6851_v31  ;;  %vm3266_vm10 = vmpackc.low %vm775_vm9, %vm769_vm1  ;;  %vm772_vm9 = vcmp.eq.s32.totalorder %v4026_v34, %v5619_v0  ;;  %v7135_v43 = vmov 0  ;;  %v7138_v20 = vld [vmem:[#allocation53_spill] sm:$0xff] }
  0xf2   : > { %3261 = vmatprep.subr.msk.bf16.mxu1 %vm3260_vm3, %v6851_v31  ;;  %vm5698_vm3 = vmpackc.low %vm788_vm11, %vm782_vm5 }
  0xf3   : > { %v5683_v33 = vrot.slane %v703_v3, %v6996_v44  ;;  %v7139_v3 = vld [vmem:[#allocation54_spill] sm:$0xff]  ;;  %v7144_v44 = vld [vmem:[#allocation64_spill] sm:$0xff] }
  0xf5   : > { %vm735_vm13 = vcmp.eq.s32.totalorder %v3936_v8, %v5683_v33  ;;  %vm741_vm0 = vcmp.eq.s32.totalorder %v3955_v13, %v5683_v33  ;;  %vm747_vm8 = vcmp.eq.s32.totalorder %v3974_v19, %v5683_v33  ;;  %vm753_vm15 = vcmp.eq.s32.totalorder %v3989_v25, %v5683_v33  ;;  %3263 = vmatpush1.bf16.msk.msra.mxu1 %vm3262_vm4, %v6851_v31  ;;  %v7059_v8 = vld [vmem:[#allocation37_spill] sm:$0xff]  ;;  %v7060_v13 = vld [vmem:[#allocation38_spill] sm:$0xff]  ;;  %v7149_v19 = vld [vmem:[#allocation67_spill] sm:$0xff] }
  0xf6   : > { %vm3382_vm7 = vmpackc.low %vm741_vm0, %vm735_vm13  ;;  %3265 = vmatprep.subr.msk.bf16.mxu1 %vm3264_vm14, %v6851_v31  ;;  %vm794_vm5 = vcmp.eq.s32.totalorder %v7059_v8, %v5290_v49  ;;  %vm800_vm11 = vcmp.eq.s32.totalorder %v7060_v13, %v5290_v49  ;;  %vm781_vm0 = vcmp.eq.s32.totalorder %v4043_v39, %v5645_v4  ;;  %vm787_vm4 = vcmp.eq.s32.totalorder %v7056_v61, %v5645_v4  ;;  %v7063_v25 = vld [vmem:[#allocation42_spill] sm:$0xff] }
  0xf7   : > { %3383 = vmatpush1.bf16.msk.msra.mxu0 %vm3382_vm7, %v6851_v31  ;;  %vm3386_vm13 = vmpackc.low %vm753_vm15, %vm747_vm8  ;;  %vm759_vm14 = vcmp.eq.s32.totalorder %v4002_v28, %v5683_v33  ;;  %vm765_vm1 = vcmp.eq.s32.totalorder %v4005_v29, %v5683_v33  ;;  %v7064_v28 = vld [vmem:[#allocation43_spill] sm:$0xff]  ;;  %v7154_v29 = vld [vmem:[#allocation69_spill] sm:$0xff] }
  0xf8   : > { %3385 = vmatprep.subr.msk.bf16.mxu0 %vm5673_vm2, %v6851_v31  ;;  %vm3388_vm7 = vmpackc.low %vm766_vm12, %vm760_vm6  ;;  %vm778_vm2 = vcmp.eq.s32.totalorder %v4033_v36, %v5619_v0  ;;  %vm806_vm6 = vcmp.eq.s32.totalorder %v7063_v25, %v5290_v49  ;;  %vm812_vm12 = vcmp.eq.s32.totalorder %v7064_v28, %v5290_v49 }
  0xf9   : > { %3267 = vmatpush1.bf16.msk.msra.mxu1 %vm3266_vm10, %v6851_v31  ;;  %vm5729_vm8 = vmpackc.low %vm800_vm11, %vm794_vm5  ;;  %vm793_vm5 = vcmp.eq.s32.totalorder %v7059_v8, %v5645_v4  ;;  %vm799_vm11 = vcmp.eq.s32.totalorder %v7060_v13, %v5645_v4 }
  0xfa   : > { %3269 = vmatprep.subr.msk.bf16.mxu1 %vm5698_vm3, %v6851_v31  ;;  %vm3270_vm15 = vmpackc.low %vm787_vm4, %vm781_vm0  ;;  %vm771_vm3 = vcmp.eq.s32.totalorder %v4026_v34, %v5683_v33  ;;  %vm777_vm0 = vcmp.eq.s32.totalorder %v4033_v36, %v5683_v33  ;;  %vm784_vm4 = vcmp.eq.s32.totalorder %v4043_v39, %v5619_v0  ;;  %v7067_v34 = vld [vmem:[#allocation47_spill] sm:$0xff]  ;;  %v7068_v36 = vld [vmem:[#allocation48_spill] sm:$0xff] }
  0xfb   : > { %3387 = vmatpush1.bf16.msk.msra.mxu0 %vm3386_vm13, %v6851_v31  ;;  %vm3390_vm10 = vmpackc.low %vm765_vm1, %vm759_vm14 }
  0xfc   : > { %3389 = vmatprep.subr.msk.bf16.mxu0 %vm3388_vm7, %v6851_v31  ;;  %vm3392_vm13 = vmpackc.low %vm778_vm2, %vm772_vm9  ;;  %vm790_vm7 = vcmp.eq.s32.totalorder %v7056_v61, %v5619_v0  ;;  %vm805_vm9 = vcmp.eq.s32.totalorder %v7063_v25, %v5645_v4  ;;  %vm811_vm2 = vcmp.eq.s32.totalorder %v7064_v28, %v5645_v4 }
  0xfd   : > { %3271 = vmatpush1.bf16.msk.msra.mxu1 %vm3270_vm15, %v6851_v31  ;;  %vm5755_vm14 = vmpackc.low %vm812_vm12, %vm806_vm6  ;;  %vm818_vm6 = vcmp.eq.s32.totalorder %v7067_v34, %v5290_v49  ;;  %vm824_vm12 = vcmp.eq.s32.totalorder %v7068_v36, %v5290_v49 }
  0xfe   : > { %3273 = vmatprep.subr.msk.bf16.mxu1 %vm5729_vm8, %v6851_v31  ;;  %vm3274_vm1 = vmpackc.low %vm799_vm11, %vm793_vm5  ;;  %vm783_vm8 = vcmp.eq.s32.totalorder %v4043_v39, %v5683_v33  ;;  %vm789_vm5 = vcmp.eq.s32.totalorder %v7056_v61, %v5683_v33  ;;  %vm796_vm11 = vcmp.eq.s32.totalorder %v7059_v8, %v5619_v0  ;;  %v7071_v39 = vld [vmem:[#allocation51_spill] sm:$0xff] }
  0xff   : > { %3391 = vmatpush1.bf16.msk.msra.mxu0 %vm3390_vm10, %v6851_v31  ;;  %vm3394_vm15 = vmpackc.low %vm777_vm0, %vm771_vm3  ;;  %vm795_vm0 = vcmp.eq.s32.totalorder %v7059_v8, %v5683_v33  ;;  %v7143_v61 = vld [vmem:[#allocation63_spill] sm:$0xff]  ;;  %v7145_v8 = vmov 0 }
 0x100   : > { %3393 = vmatprep.subr.msk.bf16.mxu0 %vm3392_vm13, %v6851_v31  ;;  %vm3396_vm10 = vmpackc.low %vm790_vm7, %vm784_vm4  ;;  %vm802_vm13 = vcmp.eq.s32.totalorder %v7060_v13, %v5619_v0  ;;  %vm801_vm4 = vcmp.eq.s32.totalorder %v7060_v13, %v5683_v33  ;;  %v7148_v13 = vld [vmem:[#allocation66_spill] sm:$0xff] }
 0x101   : > { %3275 = vmatpush1.bf16.msk.msra.mxu1 %vm3274_vm1, %v6851_v31  ;;  %vm5781_vm3 = vmpackc.low %vm811_vm2, %vm805_vm9  ;;  %vm817_vm9 = vcmp.eq.s32.totalorder %v7067_v34, %v5645_v4  ;;  %vm823_vm2 = vcmp.eq.s32.totalorder %v7068_v36, %v5645_v4 }
 0x102   : > { %v7070_v24 = vsel %vm5781_vm3, 4294967295, %v7069_v24  ;;  %3277 = vmatprep.subr.msk.bf16.mxu1 %vm5755_vm14, %v6851_v31  ;;  %vm3280_vm7 = vmpackc.low %vm824_vm12, %vm818_vm6  ;;  %vm830_vm3 = vcmp.eq.s32.totalorder %v7071_v39, %v5290_v49  ;;  %vm836_vm14 = vcmp.eq.s32.totalorder %v7072_v57, %v5290_v49  ;;  %vm808_vm12 = vcmp.eq.s32.totalorder %v7063_v25, %v5619_v0 }
 0x103   : > { %3395 = vmatpush1.bf16.msk.msra.mxu0 %vm3394_vm15, %v6851_v31  ;;  %vm3398_vm1 = vmpackc.low %vm789_vm5, %vm783_vm8  ;;  %vm7075_vm8 = vnez %v7070_v24  ;;  %vm807_vm5 = vcmp.eq.s32.totalorder %v7063_v25, %v5683_v33  ;;  %v7150_v25 = vmov 0  ;;  %v7159_v24 = vld [vmem:[#allocation72_spill] sm:$0xff] }
 0x104   : > { %3397 = vmatprep.subr.msk.bf16.mxu0 %vm3396_vm10, %v6851_v31  ;;  %vm3400_vm15 = vmpackc.low %vm802_vm13, %vm796_vm11  ;;  %vm814_vm10 = vcmp.eq.s32.totalorder %v7064_v28, %v5619_v0  ;;  %vm813_vm11 = vcmp.eq.s32.totalorder %v7064_v28, %v5683_v33  ;;  %v7153_v28 = vld [vmem:[#allocation68_spill] sm:$0xff] }
 0x105   : > { %vm5802_vm6 = vmpackc.low %vm801_vm4, %vm795_vm0  ;;  %3279 = vmatpush1.bf16.msk.msra.mxu1 %vm7075_vm8, %v6851_v31  ;;  %vm829_vm4 = vcmp.eq.s32.totalorder %v7071_v39, %v5645_v4  ;;  %vm835_vm8 = vcmp.eq.s32.totalorder %v7072_v57, %v5645_v4 }
 0x106   : > { %v7074_v21 = vsel %vm5802_vm6, 4294967295, %v7073_v21  ;;  %3281 = vmatprep.subr.msk.bf16.mxu1 %vm3280_vm7, %v6851_v31  ;;  %vm3282_vm13 = vmpackc.low %vm823_vm2, %vm817_vm9  ;;  %vm848_vm7 = vcmp.eq.s32.totalorder %v6916_v27, %v5290_v49  ;;  %vm826_vm9 = vcmp.eq.s32.totalorder %v7068_v36, %v5619_v0 }
 0x107   : > { %3399 = vmatpush1.bf16.msk.msra.mxu0 %vm3398_vm1, %v6851_v31  ;;  %vm3284_vm0 = vmpackc.low %vm836_vm14, %vm830_vm3  ;;  %vm842_vm1 = vcmp.eq.s32.totalorder %v6915_v42, %v5290_v49  ;;  %vm820_vm3 = vcmp.eq.s32.totalorder %v7067_v34, %v5619_v0  ;;  %vm819_vm14 = vcmp.eq.s32.totalorder %v7067_v34, %v5683_v33  ;;  %v7155_v34 = vmov 0 }
 0x108   : > { %3401 = vmatprep.subr.msk.bf16.mxu0 %vm3400_vm15, %v6851_v31  ;;  %vm3404_vm6 = vmpackc.low %vm814_vm10, %vm808_vm12  ;;  %vm7078_vm15 = vnez %v7074_v21  ;;  %vm825_vm12 = vcmp.eq.s32.totalorder %v7068_v36, %v5683_v33  ;;  %v7158_v36 = vld [vmem:[#allocation71_spill] sm:$0xff]  ;;  %v7164_v21 = vld [vmem:[#allocation76_spill] sm:$0xff] }
 0x109   : > { %vm5828_vm2 = vmpackc.low %vm813_vm11, %vm807_vm5  ;;  %3283 = vmatpush1.bf16.msk.msra.mxu1 %vm3282_vm13, %v6851_v31  ;;  %vm841_vm11 = vcmp.eq.s32.totalorder %v6915_v42, %v5645_v4  ;;  %vm847_vm13 = vcmp.eq.s32.totalorder %v6916_v27, %v5645_v4 }
 0x10a   : > { %v7077_v15 = vsel %vm5828_vm2, 4294967295, %v7076_v15  ;;  %3285 = vmatprep.subr.msk.bf16.mxu1 %vm3284_vm0, %v6851_v31  ;;  %vm3286_vm10 = vmpackc.low %vm835_vm8, %vm829_vm4  ;;  %vm860_vm0 = vcmp.eq.s32.totalorder %v4224_v55, %v5290_v49  ;;  %vm838_vm8 = vcmp.eq.s32.totalorder %v7072_v57, %v5619_v0 }
 0x10b   : > { %3403 = vmatpush1.bf16.msk.msra.mxu0 %vm7078_vm15, %v6851_v31  ;;  %vm3288_vm5 = vmpackc.low %vm848_vm7, %vm842_vm1  ;;  %vm854_vm15 = vcmp.eq.s32.totalorder %v4218_v54, %v5290_v49  ;;  %vm7081_vm1 = vnez %v7077_v15  ;;  %vm831_vm7 = vcmp.eq.s32.totalorder %v7071_v39, %v5683_v33  ;;  %v7165_v15 = vmov 0 }
 0x10c   : > { %3405 = vmatprep.subr.msk.bf16.mxu0 %vm3404_vm6, %v6851_v31  ;;  %vm3408_vm2 = vmpackc.low %vm826_vm9, %vm820_vm3  ;;  %vm832_vm6 = vcmp.eq.s32.totalorder %v7071_v39, %v5619_v0  ;;  %vm837_vm3 = vcmp.eq.s32.totalorder %v7072_v57, %v5683_v33  ;;  %v7160_v39 = vmov 0  ;;  %v7163_v57 = vld [vmem:[#allocation75_spill] sm:$0xff] }
 0x10d   : > { %vm5854_vm4 = vmpackc.low %vm825_vm12, %vm819_vm14  ;;  %3287 = vmatpush1.bf16.msk.msra.mxu1 %vm3286_vm10, %v6851_v31  ;;  %vm853_vm12 = vcmp.eq.s32.totalorder %v4218_v54, %v5645_v4  ;;  %vm859_vm10 = vcmp.eq.s32.totalorder %v4224_v55, %v5645_v4 }
 0x10e   : > { %v7080_v26 = vsel %vm5854_vm4, 4294967295, %v7079_v26  ;;  %3289 = vmatprep.subr.msk.bf16.mxu1 %vm3288_vm5, %v6851_v31  ;;  %vm3290_vm9 = vmpackc.low %vm847_vm13, %vm841_vm11  ;;  %vm872_vm5 = vcmp.eq.s32.totalorder %v4243_v17, %v5290_v49  ;;  %vm850_vm13 = vcmp.eq.s32.totalorder %v6916_v27, %v5619_v0 }
 0x10f   : > { %3407 = vmatpush1.bf16.msk.msra.mxu0 %vm7081_vm1, %v6851_v31  ;;  %vm3292_vm14 = vmpackc.low %vm860_vm0, %vm854_vm15  ;;  %vm866_vm1 = vcmp.eq.s32.totalorder %v4240_v22, %v5290_v49  ;;  %vm7084_vm15 = vnez %v7080_v26  ;;  %vm843_vm0 = vcmp.eq.s32.totalorder %v6915_v42, %v5683_v33  ;;  %v7168_v26 = vmov 0 }
 0x110   : > { %3409 = vmatprep.subr.msk.bf16.mxu0 %vm3408_vm2, %v6851_v31  ;;  %vm3412_vm4 = vmpackc.low %vm838_vm8, %vm832_vm6  ;;  %vm844_vm2 = vcmp.eq.s32.totalorder %v6915_v42, %v5619_v0  ;;  %vm849_vm6 = vcmp.eq.s32.totalorder %v6916_v27, %v5683_v33  ;;  %v7085_v42 = vmov 0  ;;  %v7102_v27 = vld [vmem:[#allocation28_spill] sm:$0xff] }
 0x111   : > { %vm5880_vm11 = vmpackc.low %vm837_vm3, %vm831_vm7  ;;  %3291 = vmatpush1.bf16.msk.msra.mxu1 %vm3290_vm9, %v6851_v31  ;;  %vm865_vm3 = vcmp.eq.s32.totalorder %v4240_v22, %v5645_v4  ;;  %vm871_vm9 = vcmp.eq.s32.totalorder %v4243_v17, %v5645_v4 }
 0x112   : > { %v7083_v45 = vsel %vm5880_vm11, 4294967295, %v7082_v45  ;;  %3293 = vmatprep.subr.msk.bf16.mxu1 %vm3292_vm14, %v6851_v31  ;;  %vm3294_vm8 = vmpackc.low %vm859_vm10, %vm853_vm12  ;;  %vm884_vm14 = vcmp.eq.s32.totalorder %v6950_v53, %v5290_v49  ;;  %vm862_vm12 = vcmp.eq.s32.totalorder %v4224_v55, %v5619_v0 }
 0x113   : > { %3411 = vmatpush1.bf16.msk.msra.mxu0 %vm7084_vm15, %v6851_v31  ;;  %vm3296_vm7 = vmpackc.low %vm872_vm5, %vm866_vm1  ;;  %vm878_vm15 = vcmp.eq.s32.totalorder %v4252_v47, %v5290_v49  ;;  %vm7087_vm1 = vnez %v7083_v45  ;;  %vm855_vm5 = vcmp.eq.s32.totalorder %v4218_v54, %v5683_v33  ;;  %v7171_v45 = vmov 0 }
 0x114   : > { %3413 = vmatprep.subr.msk.bf16.mxu0 %vm3412_vm4, %v6851_v31  ;;  %vm3416_vm11 = vmpackc.low %vm850_vm13, %vm844_vm2  ;;  %vm856_vm4 = vcmp.eq.s32.totalorder %v4218_v54, %v5619_v0  ;;  %vm861_vm2 = vcmp.eq.s32.totalorder %v4224_v55, %v5683_v33  ;;  %v7088_v54 = vmov 0  ;;  %v7091_v55 = vmov 0 }
 0x115   : > { %vm5906_vm10 = vmpackc.low %vm849_vm6, %vm843_vm0  ;;  %3295 = vmatpush1.bf16.msk.msra.mxu1 %vm3294_vm8, %v6851_v31  ;;  %vm877_vm6 = vcmp.eq.s32.totalorder %v4252_v47, %v5645_v4  ;;  %vm883_vm8 = vcmp.eq.s32.totalorder %v6950_v53, %v5645_v4 }
 0x116   : > { %v7086_v42 = vsel %vm5906_vm10, 4294967295, %v7085_v42  ;;  %3297 = vmatprep.subr.msk.bf16.mxu1 %vm3296_vm7, %v6851_v31  ;;  %vm3298_vm13 = vmpackc.low %vm871_vm9, %vm865_vm3  ;;  %vm896_vm7 = vcmp.eq.s32.totalorder %v6967_v11, %v5290_v49  ;;  %vm874_vm9 = vcmp.eq.s32.totalorder %v4243_v17, %v5619_v0 }
 0x117   : > { %3415 = vmatpush1.bf16.msk.msra.mxu0 %vm7087_vm1, %v6851_v31  ;;  %vm3300_vm0 = vmpackc.low %vm884_vm14, %vm878_vm15  ;;  %vm890_vm1 = vcmp.eq.s32.totalorder %v4268_v35, %v5290_v49  ;;  %vm7090_vm15 = vnez %v7086_v42  ;;  %vm867_vm14 = vcmp.eq.s32.totalorder %v4240_v22, %v5683_v33 }
 0x118   : > { %3417 = vmatprep.subr.msk.bf16.mxu0 %vm3416_vm11, %v6851_v31  ;;  %vm3420_vm10 = vmpackc.low %vm862_vm12, %vm856_vm4  ;;  %vm868_vm11 = vcmp.eq.s32.totalorder %v4240_v22, %v5619_v0  ;;  %vm873_vm4 = vcmp.eq.s32.totalorder %v4243_v17, %v5683_v33  ;;  %v7094_v22 = vmov 0  ;;  %v7097_v17 = vld [vmem:[#allocation26_spill] sm:$0xff] }
 0x119   : > { %vm5932_vm3 = vmpackc.low %vm861_vm2, %vm855_vm5  ;;  %3299 = vmatpush1.bf16.msk.msra.mxu1 %vm3298_vm13, %v6851_v31  ;;  %vm889_vm2 = vcmp.eq.s32.totalorder %v4268_v35, %v5645_v4  ;;  %vm895_vm13 = vcmp.eq.s32.totalorder %v6967_v11, %v5645_v4 }
 0x11a   : > { %v7089_v54 = vsel %vm5932_vm3, 4294967295, %v7088_v54  ;;  %3301 = vmatprep.subr.msk.bf16.mxu1 %vm3300_vm0, %v6851_v31  ;;  %vm3302_vm12 = vmpackc.low %vm883_vm8, %vm877_vm6  ;;  %vm908_vm0 = vcmp.eq.s32.totalorder %v4327_v12, %v5290_v49  ;;  %vm886_vm8 = vcmp.eq.s32.totalorder %v6950_v53, %v5619_v0 }
 0x11b   : > { %3419 = vmatpush1.bf16.msk.msra.mxu0 %vm7090_vm15, %v6851_v31  ;;  %vm3304_vm5 = vmpackc.low %vm896_vm7, %vm890_vm1  ;;  %vm902_vm15 = vcmp.eq.s32.totalorder %v6985_v10, %v5290_v49  ;;  %vm7093_vm1 = vnez %v7089_v54  ;;  %vm879_vm7 = vcmp.eq.s32.totalorder %v4252_v47, %v5683_v33 }
 0x11c   : > { %3421 = vmatprep.subr.msk.bf16.mxu0 %vm3420_vm10, %v6851_v31  ;;  %vm3424_vm3 = vmpackc.low %vm874_vm9, %vm868_vm11  ;;  %vm880_vm10 = vcmp.eq.s32.totalorder %v4252_v47, %v5619_v0  ;;  %vm885_vm11 = vcmp.eq.s32.totalorder %v6950_v53, %v5683_v33  ;;  %v7098_v47 = vld [vmem:[#allocation27_spill] sm:$0xff]  ;;  %v7103_v53 = vld [vmem:[#allocation29_spill] sm:$0xff] }
 0x11d   : > { %vm5958_vm6 = vmpackc.low %vm873_vm4, %vm867_vm14  ;;  %3303 = vmatpush1.bf16.msk.msra.mxu1 %vm3302_vm12, %v6851_v31  ;;  %vm901_vm4 = vcmp.eq.s32.totalorder %v6985_v10, %v5645_v4  ;;  %vm907_vm12 = vcmp.eq.s32.totalorder %v4327_v12, %v5645_v4 }
 0x11e   : > { %v7092_v55 = vsel %vm5958_vm6, 4294967295, %v7091_v55  ;;  %3305 = vmatprep.subr.msk.bf16.mxu1 %vm3304_vm5, %v6851_v31  ;;  %vm3306_vm9 = vmpackc.low %vm895_vm13, %vm889_vm2  ;;  %vm920_vm5 = vcmp.eq.s32.totalorder %v4439_v32, %v5290_v49  ;;  %vm898_vm13 = vcmp.eq.s32.totalorder %v6967_v11, %v5619_v0 }
 0x11f   : > { %3423 = vmatpush1.bf16.msk.msra.mxu0 %vm7093_vm1, %v6851_v31  ;;  %vm3308_vm14 = vmpackc.low %vm908_vm0, %vm902_vm15  ;;  %vm914_vm1 = vcmp.eq.s32.totalorder %v4436_v23, %v5290_v49  ;;  %vm7096_vm15 = vnez %v7092_v55  ;;  %vm891_vm0 = vcmp.eq.s32.totalorder %v4268_v35, %v5683_v33 }
 0x120   : > { %3425 = vmatprep.subr.msk.bf16.mxu0 %vm3424_vm3, %v6851_v31  ;;  %vm3428_vm6 = vmpackc.low %vm886_vm8, %vm880_vm10  ;;  %vm892_vm3 = vcmp.eq.s32.totalorder %v4268_v35, %v5619_v0  ;;  %vm897_vm10 = vcmp.eq.s32.totalorder %v6967_v11, %v5683_v33  ;;  %v7099_v35 = vmov 0  ;;  %v7109_v11 = vmov 0 }
 0x121   : > { %vm5984_vm2 = vmpackc.low %vm885_vm11, %vm879_vm7  ;;  %3307 = vmatpush1.bf16.msk.msra.mxu1 %vm3306_vm9, %v6851_v31  ;;  %vm913_vm11 = vcmp.eq.s32.totalorder %v4436_v23, %v5645_v4  ;;  %vm919_vm9 = vcmp.eq.s32.totalorder %v4439_v32, %v5645_v4 }
 0x122   : > { %v7095_v22 = vsel %vm5984_vm2, 4294967295, %v7094_v22  ;;  %3309 = vmatprep.subr.msk.bf16.mxu1 %vm3308_vm14, %v6851_v31  ;;  %vm3310_vm8 = vmpackc.low %vm907_vm12, %vm901_vm4  ;;  %vm932_vm14 = vcmp.eq.s32.totalorder %v7098_v47, %v5290_v49  ;;  %vm910_vm12 = vcmp.eq.s32.totalorder %v4327_v12, %v5619_v0 }
 0x123   : > { %3427 = vmatpush1.bf16.msk.msra.mxu0 %vm7096_vm15, %v6851_v31  ;;  %vm3312_vm7 = vmpackc.low %vm920_vm5, %vm914_vm1  ;;  %vm926_vm15 = vcmp.eq.s32.totalorder %v7097_v17, %v5290_v49  ;;  %vm7101_vm1 = vnez %v7095_v22  ;;  %vm903_vm5 = vcmp.eq.s32.totalorder %v6985_v10, %v5683_v33 }
 0x124   : > { %3429 = vmatprep.subr.msk.bf16.mxu0 %vm3428_vm6, %v6851_v31  ;;  %vm3432_vm2 = vmpackc.low %vm898_vm13, %vm892_vm3  ;;  %vm904_vm6 = vcmp.eq.s32.totalorder %v6985_v10, %v5619_v0  ;;  %vm909_vm3 = vcmp.eq.s32.totalorder %v4327_v12, %v5683_v33  ;;  %v7104_v12 = vmov 0  ;;  %v7111_v10 = vld [vmem:[#allocation44_spill] sm:$0xff] }
 0x125   : > { %vm6010_vm4 = vmpackc.low %vm897_vm10, %vm891_vm0  ;;  %3311 = vmatpush1.bf16.msk.msra.mxu1 %vm3310_vm8, %v6851_v31  ;;  %vm925_vm10 = vcmp.eq.s32.totalorder %v7097_v17, %v5645_v4  ;;  %vm931_vm8 = vcmp.eq.s32.totalorder %v7098_v47, %v5645_v4 }
 0x126   : > { %v7100_v35 = vsel %vm6010_vm4, 4294967295, %v7099_v35  ;;  %3313 = vmatprep.subr.msk.bf16.mxu1 %vm3312_vm7, %v6851_v31  ;;  %vm3314_vm13 = vmpackc.low %vm919_vm9, %vm913_vm11  ;;  %vm944_vm7 = vcmp.eq.s32.totalorder %v7103_v53, %v5290_v49  ;;  %vm922_vm11 = vcmp.eq.s32.totalorder %v4439_v32, %v5619_v0 }
 0x127   : > { %3431 = vmatpush1.bf16.msk.msra.mxu0 %vm7101_vm1, %v6851_v31  ;;  %vm3316_vm0 = vmpackc.low %vm932_vm14, %vm926_vm15  ;;  %vm938_vm1 = vcmp.eq.s32.totalorder %v7102_v27, %v5290_v49  ;;  %vm7106_vm15 = vnez %v7100_v35  ;;  %vm915_vm14 = vcmp.eq.s32.totalorder %v4436_v23, %v5683_v33 }
 0x128   : > { %3433 = vmatprep.subr.msk.bf16.mxu0 %vm3432_vm2, %v6851_v31  ;;  %vm3436_vm4 = vmpackc.low %vm910_vm12, %vm904_vm6  ;;  %vm916_vm2 = vcmp.eq.s32.totalorder %v4436_v23, %v5619_v0  ;;  %vm921_vm6 = vcmp.eq.s32.totalorder %v4439_v32, %v5683_v33  ;;  %v7107_v23 = vld [vmem:[#allocation30_spill] sm:$0xff]  ;;  %v7108_v32 = vld [vmem:[#allocation31_spill] sm:$0xff] }
 0x129   : > { %vm6036_vm9 = vmpackc.low %vm909_vm3, %vm903_vm5  ;;  %3315 = vmatpush1.bf16.msk.msra.mxu1 %vm3314_vm13, %v6851_v31  ;;  %vm937_vm3 = vcmp.eq.s32.totalorder %v7102_v27, %v5645_v4  ;;  %vm943_vm13 = vcmp.eq.s32.totalorder %v7103_v53, %v5645_v4 }
 0x12a   : > { %v7105_v12 = vsel %vm6036_vm9, 4294967295, %v7104_v12  ;;  %3317 = vmatprep.subr.msk.bf16.mxu1 %vm3316_vm0, %v6851_v31  ;;  %vm3318_vm12 = vmpackc.low %vm931_vm8, %vm925_vm10  ;;  %vm956_vm0 = vcmp.eq.s32.totalorder %v7108_v32, %v5290_v49  ;;  %vm934_vm10 = vcmp.eq.s32.totalorder %v7098_v47, %v5619_v0 }
 0x12b   : > { %3435 = vmatpush1.bf16.msk.msra.mxu0 %vm7106_vm15, %v6851_v31  ;;  %vm3320_vm5 = vmpackc.low %vm944_vm7, %vm938_vm1  ;;  %vm950_vm15 = vcmp.eq.s32.totalorder %v7107_v23, %v5290_v49  ;;  %vm7112_vm1 = vnez %v7105_v12  ;;  %vm927_vm7 = vcmp.eq.s32.totalorder %v7097_v17, %v5683_v33 }
 0x12c   : > { %3437 = vmatprep.subr.msk.bf16.mxu0 %vm3436_vm4, %v6851_v31  ;;  %vm3440_vm9 = vmpackc.low %vm922_vm11, %vm916_vm2  ;;  %2204 = vmatmul.mubr.bf16.vlgmr.msra.gmra.mrb[4].mxu1 %v4591_v14  ;;  %vm928_vm4 = vcmp.eq.s32.totalorder %v7097_v17, %v5619_v0  ;;  %vm933_vm2 = vcmp.eq.s32.totalorder %v7098_v47, %v5683_v33 }
 0x12d   : > { %vm6063_vm8 = vmpackc.low %vm921_vm6, %vm915_vm14  ;;  %3319 = vmatpush1.bf16.msk.msra.mxu1 %vm3318_vm12, %v6851_v31  ;;  %2244 = vmatprep.mubr.bf16.mxu1 %v7111_v10  ;;  %vm949_vm6 = vcmp.eq.s32.totalorder %v7107_v23, %v5645_v4  ;;  %vm955_vm12 = vcmp.eq.s32.totalorder %v7108_v32, %v5645_v4 }
 0x12e   : > { %v7110_v11 = vsel %vm6063_vm8, 4294967295, %v7109_v11  ;;  %3321 = vmatprep.subr.msk.bf16.mxu1 %vm3320_vm5, %v6851_v31  ;;  %vm3322_vm11 = vmpackc.low %vm943_vm13, %vm937_vm3  ;;  %vm962_vm8 = vcmp.eq.s32.totalorder %v7113_v51, %v5290_v49  ;;  %vm968_vm5 = vcmp.eq.s32.totalorder %v7114_v41, %v5290_v49  ;;  %vm946_vm13 = vcmp.eq.s32.totalorder %v7103_v53, %v5619_v0 }
 0x12f   : > { %3439 = vmatpush1.bf16.msk.msra.mxu0 %vm7112_vm1, %v6851_v31  ;;  %vm3324_vm14 = vmpackc.low %vm956_vm0, %vm950_vm15  ;;  %vm7117_vm15 = vnez %v7110_v11  ;;  %vm939_vm0 = vcmp.eq.s32.totalorder %v7102_v27, %v5683_v33  ;;  %v7177_v11 = vld [vmem:[#allocation61_spill] sm:$0xff] }
 0x130   : > { %3441 = vmatprep.subr.msk.bf16.mxu0 %vm3440_vm9, %v6851_v31  ;;  %vm3444_vm1 = vmpackc.low %vm934_vm10, %vm928_vm4  ;;  %vm940_vm9 = vcmp.eq.s32.totalorder %v7102_v27, %v5619_v0  ;;  %vm945_vm4 = vcmp.eq.s32.totalorder %v7103_v53, %v5683_v33  ;;  %v7175_v27 = vld [vmem:[#allocation60_spill] sm:$0xff] }
 0x131   : > { %vm6093_vm3 = vmpackc.low %vm933_vm2, %vm927_vm7  ;;  %3323 = vmatpush1.bf16.msk.msra.mxu1 %vm3322_vm11, %v6851_v31  ;;  %vm961_vm2 = vcmp.eq.s32.totalorder %v7113_v51, %v5645_v4  ;;  %vm967_vm11 = vcmp.eq.s32.totalorder %v7114_v41, %v5645_v4 }
 0x132   : > { %v7116_v30 = vsel %vm6093_vm3, 4294967295, %v7115_v30  ;;  %3325 = vmatprep.subr.msk.bf16.mxu1 %vm3324_vm14, %v6851_v31  ;;  %vm3326_vm10 = vmpackc.low %vm955_vm12, %vm949_vm6  ;;  %vm980_vm14 = vcmp.eq.s32.totalorder %v7119_v58, %v5290_v49  ;;  %vm958_vm12 = vcmp.eq.s32.totalorder %v7108_v32, %v5619_v0 }
 0x133   : > { %3443 = vmatpush1.bf16.msk.msra.mxu0 %vm7117_vm15, %v6851_v31  ;;  %vm3328_vm7 = vmpackc.low %vm968_vm5, %vm962_vm8  ;;  %vm974_vm15 = vcmp.eq.s32.totalorder %v7118_v6, %v5290_v49  ;;  %vm952_vm8 = vcmp.eq.s32.totalorder %v7107_v23, %v5619_v0  ;;  %vm951_vm5 = vcmp.eq.s32.totalorder %v7107_v23, %v5683_v33 }
 0x134   : > { %3445 = vmatprep.subr.msk.bf16.mxu0 %vm3444_vm1, %v6851_v31  ;;  %vm3448_vm3 = vmpackc.low %vm946_vm13, %vm940_vm9  ;;  %vm7122_vm1 = vnez %v7116_v30  ;;  %vm957_vm9 = vcmp.eq.s32.totalorder %v7108_v32, %v5683_v33  ;;  %v7179_v30 = vld [vmem:[#allocation58_spill] sm:$0xff] }
 0x135   : > { %vm6120_vm6 = vmpackc.low %vm945_vm4, %vm939_vm0  ;;  %3327 = vmatpush1.bf16.msk.msra.mxu1 %vm3326_vm10, %v6851_v31  ;;  %vm973_vm4 = vcmp.eq.s32.totalorder %v7118_v6, %v5645_v4  ;;  %vm979_vm10 = vcmp.eq.s32.totalorder %v7119_v58, %v5645_v4 }
 0x136   : > { %2286 = vmatmul.mubr.bf16.vlgmr.msra.gmra.mrb[4].mxu0 %v4591_v14  ;;  %v7121_v63 = vsel %vm6120_vm6, 4294967295, %v7120_v63  ;;  %3329 = vmatprep.subr.msk.bf16.mxu1 %vm3328_vm7, %v6851_v31  ;;  %vm3330_vm13 = vmpackc.low %vm967_vm11, %vm961_vm2  ;;  %v7123_v14 = vld [vmem:[#allocation39_spill] sm:$0xff]  ;;  %vm992_vm7 = vcmp.eq.s32.totalorder %v7124_v38, %v5290_v49  ;;  %vm970_vm11 = vcmp.eq.s32.totalorder %v7114_v41, %v5619_v0 }
 0x137   : > { %3447 = vmatpush1.bf16.msk.msra.mxu0 %vm7122_vm1, %v6851_v31  ;;  %vm3332_vm0 = vmpackc.low %vm980_vm14, %vm974_vm15  ;;  %2326 = vmatprep.mubr.bf16.mxu0 %v7111_v10  ;;  %vm986_vm6 = vcmp.eq.s32.totalorder %v7123_v14, %v5290_v49  ;;  %vm7127_vm15 = vnez %v7121_v63  ;;  %vm963_vm14 = vcmp.eq.s32.totalorder %v7113_v51, %v5683_v33 }
 0x138   : > { %3449 = vmatprep.subr.msk.bf16.mxu0 %vm3448_vm3, %v6851_v31  ;;  %vm3452_vm1 = vmpackc.low %vm958_vm12, %vm952_vm8  ;;  %vm964_vm3 = vcmp.eq.s32.totalorder %v7113_v51, %v5619_v0  ;;  %vm969_vm8 = vcmp.eq.s32.totalorder %v7114_v41, %v5683_v33  ;;  %v7178_v51 = vld [vmem:[#allocation62_spill] sm:$0xff] }
 0x139   : > { %vm6147_vm2 = vmpackc.low %vm957_vm9, %vm951_vm5  ;;  %3331 = vmatpush1.bf16.msk.msra.mxu1 %vm3330_vm13, %v6851_v31  ;;  %vm985_vm9 = vcmp.eq.s32.totalorder %v7123_v14, %v5645_v4  ;;  %vm991_vm13 = vcmp.eq.s32.totalorder %v7124_v38, %v5645_v4 }
 0x13a   : > { %v7126_v62 = vsel %vm6147_vm2, 4294967295, %v7125_v62  ;;  %3333 = vmatprep.subr.msk.bf16.mxu1 %vm3332_vm0, %v6851_v31  ;;  %vm3334_vm12 = vmpackc.low %vm979_vm10, %vm973_vm4  ;;  %vm1004_vm0 = vcmp.eq.s32.totalorder %v7129_v48, %v5290_v49  ;;  %vm982_vm10 = vcmp.eq.s32.totalorder %v7119_v58, %v5619_v0 }
 0x13b   : > { %3451 = vmatpush1.bf16.msk.msra.mxu0 %vm7127_vm15, %v6851_v31  ;;  %vm3336_vm5 = vmpackc.low %vm992_vm7, %vm986_vm6  ;;  %vm998_vm15 = vcmp.eq.s32.totalorder %v7128_v52, %v5290_v49  ;;  %vm976_vm6 = vcmp.eq.s32.totalorder %v7118_v6, %v5619_v0  ;;  %vm975_vm7 = vcmp.eq.s32.totalorder %v7118_v6, %v5683_v33 }
 0x13c   : > { %3453 = vmatprep.subr.msk.bf16.mxu0 %vm3452_vm1, %v6851_v31  ;;  %vm3456_vm2 = vmpackc.low %vm970_vm11, %vm964_vm3  ;;  %vm7132_vm1 = vnez %v7126_v62  ;;  %vm981_vm3 = vcmp.eq.s32.totalorder %v7119_v58, %v5683_v33 }
 0x13d   : > { %vm6173_vm4 = vmpackc.low %vm969_vm8, %vm963_vm14  ;;  %3335 = vmatpush1.bf16.msk.msra.mxu1 %vm3334_vm12, %v6851_v31  ;;  %vm997_vm8 = vcmp.eq.s32.totalorder %v7128_v52, %v5645_v4  ;;  %vm1003_vm12 = vcmp.eq.s32.totalorder %v7129_v48, %v5645_v4 }
 0x13e   : > { %v7131_v5 = vsel %vm6173_vm4, 4294967295, %v7130_v5  ;;  %3337 = vmatprep.subr.msk.bf16.mxu1 %vm3336_vm5, %v6851_v31  ;;  %vm3338_vm11 = vmpackc.low %vm991_vm13, %vm985_vm9  ;;  %vm1016_vm5 = vcmp.eq.s32.totalorder %v7134_v37, %v5290_v49  ;;  %vm994_vm13 = vcmp.eq.s32.totalorder %v7124_v38, %v5619_v0 }
 0x13f   : > { %3455 = vmatpush1.bf16.msk.msra.mxu0 %vm7132_vm1, %v6851_v31  ;;  %vm3340_vm14 = vmpackc.low %vm1004_vm0, %vm998_vm15  ;;  %vm1010_vm1 = vcmp.eq.s32.totalorder %v7133_v46, %v5290_v49  ;;  %vm7137_vm15 = vnez %v7131_v5  ;;  %vm987_vm0 = vcmp.eq.s32.totalorder %v7123_v14, %v5683_v33 }
 0x140   : > { %3457 = vmatprep.subr.msk.bf16.mxu0 %vm3456_vm2, %v6851_v31  ;;  %vm3460_vm4 = vmpackc.low %vm982_vm10, %vm976_vm6  ;;  %vm988_vm2 = vcmp.eq.s32.totalorder %v7123_v14, %v5619_v0  ;;  %vm993_vm6 = vcmp.eq.s32.totalorder %v7124_v38, %v5683_v33  ;;  %v7180_v14 = vld [vmem:[#allocation59_spill] sm:$0xff] }
 0x141   : > { %vm6199_vm9 = vmpackc.low %vm981_vm3, %vm975_vm7  ;;  %3339 = vmatpush1.bf16.msk.msra.mxu1 %vm3338_vm11, %v6851_v31  ;;  %vm1009_vm3 = vcmp.eq.s32.totalorder %v7133_v46, %v5645_v4  ;;  %vm1015_vm11 = vcmp.eq.s32.totalorder %v7134_v37, %v5645_v4 }
 0x142   : > { %v7136_v43 = vsel %vm6199_vm9, 4294967295, %v7135_v43  ;;  %3341 = vmatprep.subr.msk.bf16.mxu1 %vm3340_vm14, %v6851_v31  ;;  %vm3342_vm10 = vmpackc.low %vm1003_vm12, %vm997_vm8  ;;  %vm1028_vm14 = vcmp.eq.s32.totalorder %v7139_v3, %v5290_v49  ;;  %vm1006_vm12 = vcmp.eq.s32.totalorder %v7129_v48, %v5619_v0 }
 0x143   : > { %3459 = vmatpush1.bf16.msk.msra.mxu0 %vm7137_vm15, %v6851_v31  ;;  %vm3344_vm7 = vmpackc.low %vm1016_vm5, %vm1010_vm1  ;;  %vm1022_vm15 = vcmp.eq.s32.totalorder %v7138_v20, %v5290_v49  ;;  %vm7142_vm1 = vnez %v7136_v43  ;;  %vm999_vm5 = vcmp.eq.s32.totalorder %v7128_v52, %v5683_v33 }
 0x144   : > { %3461 = vmatprep.subr.msk.bf16.mxu0 %vm3460_vm4, %v6851_v31  ;;  %vm3464_vm9 = vmpackc.low %vm994_vm13, %vm988_vm2  ;;  %vm1000_vm4 = vcmp.eq.s32.totalorder %v7128_v52, %v5619_v0  ;;  %vm1005_vm2 = vcmp.eq.s32.totalorder %v7129_v48, %v5683_v33 }
 0x145   : > { %vm6225_vm8 = vmpackc.low %vm993_vm6, %vm987_vm0  ;;  %3343 = vmatpush1.bf16.msk.msra.mxu1 %vm3342_vm10, %v6851_v31  ;;  %vm1021_vm6 = vcmp.eq.s32.totalorder %v7138_v20, %v5645_v4  ;;  %vm1027_vm10 = vcmp.eq.s32.totalorder %v7139_v3, %v5645_v4 }
 0x146   : > { %v7141_v9 = vsel %vm6225_vm8, 4294967295, %v7140_v9  ;;  %3345 = vmatprep.subr.msk.bf16.mxu1 %vm3344_vm7, %v6851_v31  ;;  %vm3346_vm13 = vmpackc.low %vm1015_vm11, %vm1009_vm3  ;;  %vm1040_vm7 = vcmp.eq.s32.totalorder %v7144_v44, %v5290_v49  ;;  %vm1018_vm11 = vcmp.eq.s32.totalorder %v7134_v37, %v5619_v0 }
 0x147   : > { %3463 = vmatpush1.bf16.msk.msra.mxu0 %vm7142_vm1, %v6851_v31  ;;  %vm3348_vm0 = vmpackc.low %vm1028_vm14, %vm1022_vm15  ;;  %vm1034_vm1 = vcmp.eq.s32.totalorder %v7143_v61, %v5290_v49  ;;  %vm7147_vm15 = vnez %v7141_v9  ;;  %vm1011_vm14 = vcmp.eq.s32.totalorder %v7133_v46, %v5683_v33 }
 0x148   : > { %3465 = vmatprep.subr.msk.bf16.mxu0 %vm3464_vm9, %v6851_v31  ;;  %vm3468_vm8 = vmpackc.low %vm1006_vm12, %vm1000_vm4  ;;  %vm1012_vm9 = vcmp.eq.s32.totalorder %v7133_v46, %v5619_v0  ;;  %vm1017_vm4 = vcmp.eq.s32.totalorder %v7134_v37, %v5683_v33 }
 0x149   : > { %vm6251_vm3 = vmpackc.low %vm1005_vm2, %vm999_vm5  ;;  %3347 = vmatpush1.bf16.msk.msra.mxu1 %vm3346_vm13, %v6851_v31  ;;  %vm1033_vm2 = vcmp.eq.s32.totalorder %v7143_v61, %v5645_v4  ;;  %vm1039_vm13 = vcmp.eq.s32.totalorder %v7144_v44, %v5645_v4 }
 0x14a   : > { %v7146_v8 = vsel %vm6251_vm3, 4294967295, %v7145_v8  ;;  %3349 = vmatprep.subr.msk.bf16.mxu1 %vm3348_vm0, %v6851_v31  ;;  %vm3350_vm12 = vmpackc.low %vm1027_vm10, %vm1021_vm6  ;;  %vm1052_vm0 = vcmp.eq.s32.totalorder %v7149_v19, %v5290_v49  ;;  %vm1030_vm10 = vcmp.eq.s32.totalorder %v7139_v3, %v5619_v0 }
 0x14b   : > { %3467 = vmatpush1.bf16.msk.msra.mxu0 %vm7147_vm15, %v6851_v31  ;;  %vm3352_vm5 = vmpackc.low %vm1040_vm7, %vm1034_vm1  ;;  %vm1046_vm15 = vcmp.eq.s32.totalorder %v7148_v13, %v5290_v49  ;;  %vm7152_vm1 = vnez %v7146_v8  ;;  %vm1023_vm7 = vcmp.eq.s32.totalorder %v7138_v20, %v5683_v33 }
 0x14c   : > { %3469 = vmatprep.subr.msk.bf16.mxu0 %vm3468_vm8, %v6851_v31  ;;  %vm3472_vm3 = vmpackc.low %vm1018_vm11, %vm1012_vm9  ;;  %vm1024_vm8 = vcmp.eq.s32.totalorder %v7138_v20, %v5619_v0  ;;  %vm1029_vm9 = vcmp.eq.s32.totalorder %v7139_v3, %v5683_v33 }
 0x14d   : > { %vm6277_vm6 = vmpackc.low %vm1017_vm4, %vm1011_vm14  ;;  %3351 = vmatpush1.bf16.msk.msra.mxu1 %vm3350_vm12, %v6851_v31  ;;  %vm1045_vm4 = vcmp.eq.s32.totalorder %v7148_v13, %v5645_v4  ;;  %vm1051_vm12 = vcmp.eq.s32.totalorder %v7149_v19, %v5645_v4 }
 0x14e   : > { %v7151_v25 = vsel %vm6277_vm6, 4294967295, %v7150_v25  ;;  %3353 = vmatprep.subr.msk.bf16.mxu1 %vm3352_vm5, %v6851_v31  ;;  %vm3354_vm11 = vmpackc.low %vm1039_vm13, %vm1033_vm2  ;;  %vm1064_vm5 = vcmp.eq.s32.totalorder %v7154_v29, %v5290_v49  ;;  %vm1042_vm13 = vcmp.eq.s32.totalorder %v7144_v44, %v5619_v0 }
 0x14f   : > { %3471 = vmatpush1.bf16.msk.msra.mxu0 %vm7152_vm1, %v6851_v31  ;;  %vm3356_vm14 = vmpackc.low %vm1052_vm0, %vm1046_vm15  ;;  %vm1058_vm1 = vcmp.eq.s32.totalorder %v7153_v28, %v5290_v49  ;;  %vm7157_vm15 = vnez %v7151_v25  ;;  %vm1035_vm0 = vcmp.eq.s32.totalorder %v7143_v61, %v5683_v33 }
 0x150   : > { %3473 = vmatprep.subr.msk.bf16.mxu0 %vm3472_vm3, %v6851_v31  ;;  %vm3476_vm6 = vmpackc.low %vm1030_vm10, %vm1024_vm8  ;;  %vm1036_vm3 = vcmp.eq.s32.totalorder %v7143_v61, %v5619_v0  ;;  %vm1041_vm8 = vcmp.eq.s32.totalorder %v7144_v44, %v5683_v33 }
 0x151   : > { %vm6303_vm2 = vmpackc.low %vm1029_vm9, %vm1023_vm7  ;;  %3355 = vmatpush1.bf16.msk.msra.mxu1 %vm3354_vm11, %v6851_v31  ;;  %vm1057_vm9 = vcmp.eq.s32.totalorder %v7153_v28, %v5645_v4  ;;  %vm1063_vm11 = vcmp.eq.s32.totalorder %v7154_v29, %v5645_v4 }
 0x152   : > { %v7156_v34 = vsel %vm6303_vm2, 4294967295, %v7155_v34  ;;  %3357 = vmatprep.subr.msk.bf16.mxu1 %vm3356_vm14, %v6851_v31  ;;  %vm3358_vm10 = vmpackc.low %vm1051_vm12, %vm1045_vm4  ;;  %vm1076_vm14 = vcmp.eq.s32.totalorder %v7159_v24, %v5290_v49  ;;  %vm1054_vm12 = vcmp.eq.s32.totalorder %v7149_v19, %v5619_v0 }
 0x153   : > { %3475 = vmatpush1.bf16.msk.msra.mxu0 %vm7157_vm15, %v6851_v31  ;;  %vm3360_vm7 = vmpackc.low %vm1064_vm5, %vm1058_vm1  ;;  %vm1070_vm15 = vcmp.eq.s32.totalorder %v7158_v36, %v5290_v49  ;;  %vm7162_vm1 = vnez %v7156_v34  ;;  %vm1047_vm5 = vcmp.eq.s32.totalorder %v7148_v13, %v5683_v33 }
 0x154   : > { %3477 = vmatprep.subr.msk.bf16.mxu0 %vm3476_vm6, %v6851_v31  ;;  %vm3480_vm2 = vmpackc.low %vm1042_vm13, %vm1036_vm3  ;;  %vm1048_vm6 = vcmp.eq.s32.totalorder %v7148_v13, %v5619_v0  ;;  %vm1053_vm3 = vcmp.eq.s32.totalorder %v7149_v19, %v5683_v33 }
 0x155   : > { %vm6329_vm4 = vmpackc.low %vm1041_vm8, %vm1035_vm0  ;;  %3359 = vmatpush1.bf16.msk.msra.mxu1 %vm3358_vm10, %v6851_v31  ;;  %vm1069_vm8 = vcmp.eq.s32.totalorder %v7158_v36, %v5645_v4  ;;  %vm1075_vm10 = vcmp.eq.s32.totalorder %v7159_v24, %v5645_v4 }
 0x156   : > { %v7161_v39 = vsel %vm6329_vm4, 4294967295, %v7160_v39  ;;  %3361 = vmatprep.subr.msk.bf16.mxu1 %vm3360_vm7, %v6851_v31  ;;  %vm3362_vm13 = vmpackc.low %vm1063_vm11, %vm1057_vm9  ;;  %vm1088_vm7 = vcmp.eq.s32.totalorder %v7164_v21, %v5290_v49  ;;  %vm1066_vm11 = vcmp.eq.s32.totalorder %v7154_v29, %v5619_v0 }
 0x157   : > { %3479 = vmatpush1.bf16.msk.msra.mxu0 %vm7162_vm1, %v6851_v31  ;;  %vm3364_vm0 = vmpackc.low %vm1076_vm14, %vm1070_vm15  ;;  %vm1082_vm1 = vcmp.eq.s32.totalorder %v7163_v57, %v5290_v49  ;;  %vm7167_vm15 = vnez %v7161_v39  ;;  %vm1059_vm14 = vcmp.eq.s32.totalorder %v7153_v28, %v5683_v33  ;;  %v7181_v39 = vld [vmem:[#allocation74_spill] sm:$0xff] }
 0x158   : > { %3481 = vmatprep.subr.msk.bf16.mxu0 %vm3480_vm2, %v6851_v31  ;;  %vm3484_vm4 = vmpackc.low %vm1054_vm12, %vm1048_vm6  ;;  %vm1060_vm2 = vcmp.eq.s32.totalorder %v7153_v28, %v5619_v0  ;;  %vm1065_vm6 = vcmp.eq.s32.totalorder %v7154_v29, %v5683_v33 }
 0x159   : > { %vm6355_vm9 = vmpackc.low %vm1053_vm3, %vm1047_vm5  ;;  %3363 = vmatpush1.bf16.msk.msra.mxu1 %vm3362_vm13, %v6851_v31  ;;  %vm1081_vm3 = vcmp.eq.s32.totalorder %v7163_v57, %v5645_v4  ;;  %vm1087_vm13 = vcmp.eq.s32.totalorder %v7164_v21, %v5645_v4 }
 0x15a   : > { %v7166_v15 = vsel %vm6355_vm9, 4294967295, %v7165_v15  ;;  %3365 = vmatprep.subr.msk.bf16.mxu1 %vm3364_vm0, %v6851_v31  ;;  %vm3366_vm12 = vmpackc.low %vm1075_vm10, %vm1069_vm8  ;;  %vm1100_vm0 = vcmp.eq.s32.totalorder %v4417_v18, %v5290_v49  ;;  %vm1078_vm10 = vcmp.eq.s32.totalorder %v7159_v24, %v5619_v0 }
 0x15b   : > { %3483 = vmatpush1.bf16.msk.msra.mxu0 %vm7167_vm15, %v6851_v31  ;;  %vm3368_vm5 = vmpackc.low %vm1088_vm7, %vm1082_vm1  ;;  %vm1094_vm15 = vcmp.eq.s32.totalorder %v4397_v7, %v5290_v49  ;;  %vm7170_vm1 = vnez %v7166_v15  ;;  %vm1071_vm7 = vcmp.eq.s32.totalorder %v7158_v36, %v5683_v33 }
 0x15c   : > { %3485 = vmatprep.subr.msk.bf16.mxu0 %vm3484_vm4, %v6851_v31  ;;  %vm3488_vm9 = vmpackc.low %vm1066_vm11, %vm1060_vm2  ;;  %vm1072_vm4 = vcmp.eq.s32.totalorder %v7158_v36, %v5619_v0  ;;  %vm1077_vm2 = vcmp.eq.s32.totalorder %v7159_v24, %v5683_v33 }
 0x15d   : > { %vm6381_vm8 = vmpackc.low %vm1065_vm6, %vm1059_vm14  ;;  %3367 = vmatpush1.bf16.msk.msra.mxu1 %vm3366_vm12, %v6851_v31  ;;  %vm1093_vm6 = vcmp.eq.s32.totalorder %v4397_v7, %v5645_v4  ;;  %vm1099_vm12 = vcmp.eq.s32.totalorder %v4417_v18, %v5645_v4 }
 0x15e   : > { %v7169_v26 = vsel %vm6381_vm8, 4294967295, %v7168_v26  ;;  %3369 = vmatprep.subr.msk.bf16.mxu1 %vm3368_vm5, %v6851_v31  ;;  %vm3370_vm11 = vmpackc.low %vm1087_vm13, %vm1081_vm3  ;;  %vm1112_vm5 = vcmp.eq.s32.totalorder %v4527_v60, %v5290_v49  ;;  %vm1090_vm13 = vcmp.eq.s32.totalorder %v7164_v21, %v5619_v0 }
 0x15f   : > { %3487 = vmatpush1.bf16.msk.msra.mxu0 %vm7170_vm1, %v6851_v31  ;;  %vm3372_vm14 = vmpackc.low %vm1100_vm0, %vm1094_vm15  ;;  %vm1106_vm1 = vcmp.eq.s32.totalorder %v4524_v50, %v5290_v49  ;;  %vm7173_vm15 = vnez %v7169_v26 }
 0x160   : > { %3489 = vmatprep.subr.msk.bf16.mxu0 %vm3488_vm9, %v6851_v31  ;;  %vm3492_vm8 = vmpackc.low %vm1078_vm10, %vm1072_vm4  ;;  %vm1084_vm9 = vcmp.eq.s32.totalorder %v7163_v57, %v5619_v0  ;;  %vm1105_vm10 = vcmp.eq.s32.totalorder %v4524_v50, %v5645_v4 }
 0x161   : > { %vm6407_vm3 = vmpackc.low %vm1077_vm2, %vm1071_vm7  ;;  %3371 = vmatpush1.bf16.msk.msra.mxu1 %vm3370_vm11, %v6851_v31  ;;  %vm1111_vm7 = vcmp.eq.s32.totalorder %v4527_v60, %v5645_v4  ;;  %vm1083_vm11 = vcmp.eq.s32.totalorder %v7163_v57, %v5683_v33 }
 0x162   : > { %v7172_v45 = vsel %vm6407_vm3, 4294967295, %v7171_v45  ;;  %3373 = vmatprep.subr.msk.bf16.mxu1 %vm3372_vm14, %v6851_v31  ;;  %vm3374_vm0 = vmpackc.low %vm1099_vm12, %vm1093_vm6  ;;  %vm1089_vm3 = vcmp.eq.s32.totalorder %v7164_v21, %v5683_v33  ;;  %vm1096_vm14 = vcmp.eq.s32.totalorder %v4397_v7, %v5619_v0 }
 0x163   : > { %3491 = vmatpush1.bf16.msk.msra.mxu0 %vm7173_vm15, %v6851_v31  ;;  %vm3376_vm4 = vmpackc.low %vm1112_vm5, %vm1106_vm1  ;;  %vm7174_vm6 = vnez %v7172_v45  ;;  %vm1108_vm15 = vcmp.eq.s32.totalorder %v4524_v50, %v5619_v0  ;;  %v7182_v45 = vld [vmem:[#allocation70_spill] sm:$0xff] }
 0x164   : > { %3493 = vmatprep.subr.msk.bf16.mxu0 %vm3492_vm8, %v6851_v31  ;;  %vm3496_vm2 = vmpackc.low %vm1090_vm13, %vm1084_vm9  ;;  %vm1102_vm8 = vcmp.eq.s32.totalorder %v4417_v18, %v5619_v0  ;;  %vm1095_vm9 = vcmp.eq.s32.totalorder %v4397_v7, %v5683_v33  ;;  %vm1101_vm13 = vcmp.eq.s32.totalorder %v4417_v18, %v5683_v33 }
 0x165   : > { %3375 = vmatpush1.bf16.msk.msra.mxu1 %vm3374_vm0, %v6851_v31  ;;  %vm3378_vm12 = vmpackc.low %vm1111_vm7, %vm1105_vm10  ;;  %vm1114_vm0 = vcmp.eq.s32.totalorder %v4527_v60, %v5619_v0  ;;  %vm1107_vm10 = vcmp.eq.s32.totalorder %v4524_v50, %v5683_v33  ;;  %vm1113_vm7 = vcmp.eq.s32.totalorder %v4527_v60, %v5683_v33 }
 0x166   : > { %3377 = vmatprep.subr.msk.bf16.mxu1 %vm3376_vm4, %v6851_v31  ;;  %vm3498_vm1 = vmpackc.low %vm1089_vm3, %vm1083_vm11  ;;  %vm2437_vm11 = vcmask 1040384  }
 0x167   : > { %3495 = vmatpush1.bf16.msk.msra.mxu0 %vm7174_vm6, %v6851_v31  ;;  %vm3500_vm5 = vmpackc.low %vm1102_vm8, %vm1096_vm14 }
 0x168   : > { %3497 = vmatprep.subr.msk.bf16.mxu0 %vm3496_vm2, %v6851_v31  ;;  %vm3502_vm3 = vmpackc.low %vm1101_vm13, %vm1095_vm9  ;;  %vm2618_vm13 = vcmask 57344  }
 0x169   : > { %3379 = vmatpush1.bf16.msk.msra.mxu1 %vm3378_vm12, %v6851_v31  ;;  %vm3504_vm4 = vmpackc.low %vm1114_vm0, %vm1108_vm15 }
 0x16a   : > { %vm3506_vm2 = vmpackc.low %vm1113_vm7, %vm1107_vm10 }
 0x16b   : > { %3499 = vmatpush1.bf16.msk.msra.mxu0 %vm3498_vm1, %v6851_v31 }
 0x16c   : > { %3501 = vmatprep.subr.msk.bf16.mxu0 %vm3500_vm5, %v6851_v31  ;;  %2245 = vmatmul.mubr.bf16.vlgmr.msra.gmra.mrb[4].mxu1 %v4611_v40 }
 0x16f   : > { %3503 = vmatpush1.bf16.msk.msra.mxu0 %vm3502_vm3, %v6851_v31 }
 0x170   : > { %3505 = vmatprep.subr.msk.bf16.mxu0 %vm3504_vm4, %v6851_v31 }
 0x173   : > { %3507 = vmatpush1.bf16.msk.msra.mxu0 %vm3506_vm2, %v6851_v31 }
 0x176   : > { %2327 = vmatmul.mubr.bf16.vlgmr.msra.gmra.mrb[4].mxu0 %v4611_v40  ;;  %v7176_v40 = vld [vmem:[#allocation57_spill] sm:$0xff] }
 0x1a9   : > { %v2164_v18 = vpop.f32.mrb[0].mxu0 }
 0x1aa   : > { %v2123_v7 = vpop.f32.mrb[0].mxu1  ;;  %v2166_v4 = vpop.f32.mrb[1].mxu0 }
 0x1ab   : > { %v2125_v49 = vpop.f32.mrb[1].mxu1  ;;  %v2165_v0 = vadd.f32 %v2164_v18, %v2123_v7  ;;  %v2168_v60 = vpop.f32.mrb[2].mxu0  ;;  %v7183_v18 = vld [vmem:[#allocation80_spill] sm:$0xff] }
 0x1ac   : > { %v2127_v50 = vpop.f32.mrb[2].mxu1  ;;  %v2167_v42 = vadd.f32 %v2166_v4, %v2125_v49  ;;  %v2169_v55 = vpop.f32.mrb[3].mxu0 }
 0x1ad   : > { %v2128_v54 = vpop.f32.mrb[3].mxu1  ;;  %v2341_v33 = vrot.slane %v2165_v0, 3 }
 0x1ae   : > { %v2342_v22 = vrot.slane %v2167_v42, 3 }
 0x1af   : > { %v2353_v17 = vadd.f32 %v2341_v33, %v2165_v0  ;;  %v7184_v0 = vld [vmem:[#allocation81_spill] sm:$0xff] }
 0x1b0   : > { %v2354_v47 = vadd.f32 %v2342_v22, %v2167_v42 }
 0x1b1   : > { %v2377_v35 = vrot.slane %v2353_v17, 1  ;;  %v2359_v53 = vsub.f32 %v7175_v27, %v2353_v17  ;;  %v2407_v31 = vrot.slane %v2353_v17, 2 }
 0x1b2   : > { %v2378_v12 = vrot.slane %v2354_v47, 1  ;;  %v2360_v23 = vsub.f32 %v7176_v40, %v2354_v47  ;;  %v2408_v32 = vrot.slane %v2354_v47, 2 }
 0x1b3   : > { %v2389_v10 = vsub.f32 %v7177_v11, %v2377_v35  ;;  %v2419_v41 = vsub.f32 %v7178_v51, %v2407_v31  ;;  %v2365_v58 = vmul.f32 %v2359_v53, %v2359_v53 }
 0x1b4   : > { %v2390_v6 = vsub.f32 %v7179_v30, %v2378_v12  ;;  %v2420_v38 = vsub.f32 %v7180_v14, %v2408_v32  ;;  %v2366_v62 = vmul.f32 %v2360_v23, %v2360_v23 }
 0x1b5   : > { %v2395_v63 = vmul.f32 %v2389_v10, %v2389_v10  ;;  %v2425_v5 = vmul.f32 %v2419_v41, %v2419_v41  ;;  %v7185_v41 = vld [vmem:[#allocation23_spill] sm:$0xff] }
 0x1b6   : > { %v2396_v52 = vmul.f32 %v2390_v6, %v2390_v6  ;;  %v2426_v43 = vmul.f32 %v2420_v38, %v2420_v38 }
 0x1b7   : > { %v2401_v48 = vadd.f32 %v2395_v63, %v2365_v58 }
 0x1b8   : > { %v2402_v46 = vadd.f32 %v2396_v52, %v2366_v62  ;;  %v7186_v62 = vld [vmem:[#allocation55_spill] sm:$0xff] }
 0x1b9   : > { %v2431_v37 = vadd.f32 %v2425_v5, %v2401_v48  ;;  %v7187_v48 = vld [vmem:[#allocation56_spill] sm:$0xff] }
 0x1ba   : > { %v2432_v3 = vadd.f32 %v2426_v43, %v2402_v46 }
 0x1bb   : > { %v2438_v20 = vsel %vm2437_vm11, %v2431_v37, 0.0 }
 0x1bc   : > { %2439 = vadd.xlane.f32.xlu0 %v2438_v20  ;;  %v2448_v9 = vsel %vm2437_vm11, %v2432_v3, 0.0 }
 0x1c0   : > { %2449 = vadd.xlane.f32.xlu0 %v2448_v9 }
 0x23f   : > { %v2246_v61 = vpop.f32.mrb[4].mxu1 }
 0x240   : > { %v2343_v44 = vrot.slane %v2246_v61, 3  ;;  %v2248_v8 = vpop.f32.mrb[5].mxu1 }
 0x241   : > { %v2344_v13 = vrot.slane %v2248_v8, 3  ;;  %v2250_v19 = vpop.f32.mrb[6].mxu1 }
 0x242   : > { %v2355_v25 = vadd.f32 %v2343_v44, %v2246_v61  ;;  %v2251_v28 = vpop.f32.mrb[7].mxu1 }
 0x243   : > { %v2356_v29 = vadd.f32 %v2344_v13, %v2248_v8 }
 0x244   : > { %v2379_v34 = vrot.slane %v2355_v25, 1  ;;  %v2361_v36 = vsub.f32 %v5548_v1, %v2355_v25  ;;  %v2409_v24 = vrot.slane %v2355_v25, 2 }
 0x245   : > { %v2362_v57 = vsub.f32 %v7181_v39, %v2356_v29  ;;  %v2380_v21 = vrot.slane %v2356_v29, 1  ;;  %v2410_v15 = vrot.slane %v2356_v29, 2 }
 0x246   : > { %v2391_v26 = vsub.f32 %v5551_v56, %v2379_v34  ;;  %v2421_v7 = vsub.f32 %v7182_v45, %v2409_v24  ;;  %v2367_v42 = vmul.f32 %v2361_v36, %v2361_v36 }
 0x247   : > { %v2392_v49 = vsub.f32 %v7183_v18, %v2380_v21  ;;  %v2422_v4 = vsub.f32 %v7184_v0, %v2410_v15  ;;  %v2368_v55 = vmul.f32 %v2362_v57, %v2362_v57 }
 0x248   : > { %v2397_v54 = vmul.f32 %v2391_v26, %v2391_v26  ;;  %v2427_v35 = vmul.f32 %v2421_v7, %v2421_v7 }
 0x249   : > { %v2328_v50 = vpop.f32.mrb[4].mxu0  ;;  %v2398_v1 = vmul.f32 %v2392_v49, %v2392_v49  ;;  %v2428_v31 = vmul.f32 %v2422_v4, %v2422_v4  ;;  %v2440_v23 = vpop.xlane.xlu0 %2439 }
 0x24a   : > { %v2345_v60 = vrot.slane %v2328_v50, 3  ;;  %v2330_v33 = vpop.f32.mrb[5].mxu0  ;;  %v2403_v47 = vadd.f32 %v2397_v54, %v2367_v42  ;;  %v2441_v46 = vrot.slane %v2440_v23, 4 }
 0x24b   : > { %v2346_v22 = vrot.slane %v2330_v33, 3  ;;  %v2332_v17 = vpop.f32.mrb[6].mxu0  ;;  %v2404_v56 = vadd.f32 %v2398_v1, %v2368_v55 }
 0x24c   : > { %v2357_v27 = vadd.f32 %v2345_v60, %v2328_v50  ;;  %v2333_v53 = vpop.f32.mrb[7].mxu0  ;;  %v2433_v40 = vadd.f32 %v2427_v35, %v2403_v47  ;;  %v2442_v44 = vadd.f32 %v2441_v46, %v2440_v23 }
 0x24d   : > { %v2358_v12 = vadd.f32 %v2346_v22, %v2330_v33  ;;  %v2434_v51 = vadd.f32 %v2428_v31, %v2404_v56 }
 0x24e   : > { %v2363_v32 = vsub.f32 %v5612_v59, %v2357_v27  ;;  %v2381_v11 = vrot.slane %v2357_v27, 1  ;;  %v2411_v10 = vrot.slane %v2357_v27, 2  ;;  %v2458_v63 = vsel %vm2437_vm11, %v2433_v40, 0.0  ;;  %v2450_v59 = vpop.xlane.xlu0 %2449 }
 0x24f   : > { %v2364_v30 = vsub.f32 %v7185_v41, %v2358_v12  ;;  %v2382_v6 = vrot.slane %v2358_v12, 1  ;;  %v2412_v58 = vrot.slane %v2358_v12, 2  ;;  %2459 = vadd.xlane.f32.xlu1 %v2458_v63  ;;  %v2451_v20 = vrot.slane %v2450_v59, 4 }
 0x250   : > { %v2393_v14 = vsub.f32 %v5631_v2, %v2381_v11  ;;  %v2423_v38 = vsub.f32 %v5637_v16, %v2411_v10  ;;  %v2369_v37 = vmul.f32 %v2363_v32, %v2363_v32  ;;  %v2468_v3 = vsel %vm2437_vm11, %v2434_v51, 0.0 }
 0x251   : > { %v2394_v52 = vsub.f32 %v7186_v62, %v2382_v6  ;;  %v2424_v5 = vsub.f32 %v7187_v48, %v2412_v58  ;;  %v2370_v9 = vmul.f32 %v2364_v30, %v2364_v30  ;;  %v2452_v2 = vadd.f32 %v2451_v20, %v2450_v59 }
 0x252   : > { %v2399_v43 = vmul.f32 %v2393_v14, %v2393_v14  ;;  %v2429_v13 = vmul.f32 %v2423_v38, %v2423_v38  ;;  %v2443_v25 = vrot.slane %v2442_v44, 2  ;;  %v2498_v30 = vstv %s4013_s10  ;;  %s2561_s10 = smul.f32 %s7191_s26, %s7190_s19  ;;  %s2573_s19 = sadd.f32 %s2572_s29, %s2571_s8 }
 0x253   : > { %v2400_v61 = vmul.f32 %v2394_v52, %v2394_v52  ;;  %2469 = vadd.xlane.f32.xlu1 %v2468_v3  ;;  %v2430_v19 = vmul.f32 %v2424_v5, %v2424_v5  ;;  %v2453_v29 = vrot.slane %v2452_v2, 2  ;;  %3648 = vrcp.f32 %v2498_v30  ;;  %s2574_s26 = smul.f32 %s4443_s27, %s5114_s4  ;;  %s7199_s8 = sld [smem:[#allocation15_spill]] }
 0x254   : > { %v2405_v8 = vadd.f32 %v2399_v43, %v2369_v37  ;;  %v2444_v36 = vadd.f32 %v2443_v25, %v2442_v44  ;;  %v2501_v6 = vstv %s7188_s6  ;;  %v2504_v58 = vstv %s7189_s20  ;;  %s2563_s24 = sadd.f32 %s2562_s9, %s2561_s10  ;;  %s2564_s6 = smul.f32 %s4794_s1, %s7196_s5 }
 0x255   : > { %v2406_v16 = vadd.f32 %v2400_v61, %v2370_v9  ;;  %v2454_v39 = vadd.f32 %v2453_v29, %v2452_v2  ;;  %3650 = vrcp.f32 %v2501_v6  ;;  %s2548_s20 = sadd.f32 %s6532_s13, %s2531_s3  ;;  %v2521_v14 = vstv %s2520_s22 }
 0x256   : > { %v2435_v28 = vadd.f32 %v2429_v13, %v2405_v8  ;;  %v2445_v21 = vrot.slane %v2444_v36, 1  ;;  %3652 = vrcp.f32 %v2504_v58  ;;  %v2538_v38 = vstv %s2537_s0  ;;  %s2565_s11 = sadd.f32 %s2564_s6, %s2563_s24 }
 0x257   : > { %v2436_v34 = vadd.f32 %v2430_v19, %v2406_v16  ;;  %v2455_v15 = vrot.slane %v2454_v39, 1  ;;  %s2552_s15 = sadd.f32 %s2548_s20, %s6522_s28  ;;  %v7198_v19 = vlaneseq  ;;  %s7200_s20 = sld [smem:[#allocation18_spill]] }
 0x258   : > { %v2478_v24 = vsel %vm2437_vm11, %v2435_v28, 0.0  ;;  %v2446_v26 = vadd.f32 %v2445_v21, %v2444_v36  ;;  %s2566_s1 = smul.f32 %s2565_s11, %s2565_s11  ;;  %s2575_s25 = sadd.f32 %s2574_s26, %s2573_s19 }
 0x259   : > { %2479 = vadd.xlane.f32.xlu0 %v2478_v24  ;;  %v2488_v57 = vsel %vm2437_vm11, %v2436_v34, 0.0  ;;  %v2456_v45 = vadd.f32 %v2455_v15, %v2454_v39  ;;  %s2588_s22 = sadd.f32 %s2587_s30, %s2586_s16  ;;  %v2597_v25 = vand.u32 127, %v7198_v19  ;;  %s3511_s24 = sshll.u32 %s7199_s8, 4 }
 0x25a   : > { %2489 = vadd.xlane.f32.xlu1 %v2488_v57  ;;  %3565 = vpush %v2446_v26  ;;  %s2560_s4 = sadd.f32 %s2559_s14, %s2552_s15  ;;  %v2567_v43 = vstv %s2566_s1  ;;  %s2576_s17 = smul.f32 %s2575_s25, %s2575_s25 }
 0x25b   : > { %3567 = vpush %v2456_v45  ;;  %s2590_s23 = sadd.f32 %s2589_s12, %s2588_s22  ;;  %vm2598_vm14 = vcmp.eq.s32.totalorder %v2597_v25, 0  ;;  %vm2601_vm8 = vcmp.eq.s32.totalorder %v2597_v25, 1  ;;  %vm2604_vm6 = vcmp.eq.s32.totalorder %v2597_v25, 2  ;;  %vm2607_vm12 = vcmp.eq.s32.totalorder %v2597_v25, 3  ;;  %s7201_s16 = sld [smem:[#allocation89_spill]] }
 0x25c   : > { %s2577_s28 = sadd.f32 %s2576_s17, %s2560_s4  ;;  %vm2610_vm1 = vcmp.eq.s32.totalorder %v2597_v25, 4  ;;  %vm2613_vm5 = vcmp.eq.s32.totalorder %v2597_v25, 5  ;;  %vm2616_vm9 = vcmp.eq.s32.totalorder %v2597_v25, 6  ;;  %s3762_s22 = smov [#allocation7]  }
 0x25d   : > { %v3649_v63 = vpop.eup %3648  ;;  %s3510_s7 = sadd.f32 -1.0, %s2590_s23  ;;  %p7203_p12 = scmp.ne.s32.totalorder %s7200_s20, 0 }
 0x25e   : > { %v2522_v52 = vmul.f32 %v3649_v63, %v2521_v14  ;;  %v2539_v48 = vmul.f32 %v3649_v63, %v2538_v38  ;;  %s2581_s5 = sadd.f32 %s2577_s28, %s6532_s13  ;;  %s228_s13 = sand.u32 1, %s7197_s21  }
 0x25f   : > { %v3651_v62 = vpop.eup %3650  ;;  %s2592_s0 = smul.f32 %s3510_s7, %s3510_s7  ;;  %s229_s2 = scalar_lea.vmem [#allocation7], %s228_s13 }
 0x260   : > { %v3653_v5 = vpop.eup %3652  ;;  %v2523_v46 = vmul.f32 %v3651_v62, %v2522_v52  ;;  %v2549_v37 = vmul.f32 %v3651_v62, %v2521_v14  ;;  %v2568_v9 = vmul.f32 %v3651_v62, %v2567_v43  ;;  %s2585_s27 = sadd.f32 %s2581_s5, %s2576_s17  ;;  %s2633_s19 = sshll.u32 %s229_s2, 4  ;;  %s6562_s19 = int_to_ptr.vmem [resolvable:$true] %s2633_s19 }
 0x261   : > { %v2540_v59 = vmul.f32 %v3653_v5, %v2539_v48  ;;  %v2578_v8 = vmul.f32 %v3653_v5, %v2538_v38  ;;  %v2582_v16 = vmul.f32 %v3653_v5, %v2567_v43  ;;  %s7202_s30 = smov %s7201_s16  ;;  %s6560_s15 = scalar_lea.hbm %s7201_s16, %s3511_s24 }
 0x262   : > { %v2550_v3 = vmul.f32 %v3649_v63, %v2549_v37  ;;  %v2569_v44 = vmul.f32 %v3653_v5, %v2568_v9  ;;  %s2593_s3 = sadd.f32 %s2592_s0, %s2585_s27  ;;  %s2621_s1 = scalar_lea.sflag [#allocation3], %s228_s13 }
 0x263   : > { %v2541_v20 = vadd.f32 %v2540_v59, %v2523_v46  ;;  %v2579_v2 = vmul.f32 %v3649_v63, %v2578_v8  ;;  %v2583_v29 = vmul.f32 %v3651_v62, %v2582_v16  ;;  %s3687_s25 = scalar_lea.vmem %s6562_s19, 16  ;;  %s3691_s12 = sshll.u32 %s3762_s22, 4  ;;  %s3692_s12 = int_to_ptr.vmem [resolvable:$false] %s3691_s12 }
 0x264   : > { %v2594_v26 = vstv %s2593_s3  ;;  %p3688_p10 = scmp.ne.s32.totalorder %s6562_s19, %s3687_s25  ;;  %s3693_s4 = scalar_lea.vmem %s3692_s12, 32 }
 0x265   : > { %v2551_v61 = vadd.f32 %v2550_v3, %v2541_v20  ;;  %p3694_p8 = scmp.lt.s32.totalorder %s6562_s19, %s3692_s12  ;;  %p3695_p11 = scmp.lt.s32.totalorder %s3693_s4, %s3687_s25 }
 0x266   : > { %p3689_p0 = pnand %p3688_p10, %p7203_p12 }
 0x267   : > { %v2570_v13 = vadd.f32 %v2569_v44, %v2551_v61  ;;  %p3696_p13 = por %p3695_p11, %p3694_p8 }
 0x268   : > { %p3690_p7 = pneg %p3689_p0 }
 0x269   : > { %v2580_v28 = vadd.f32 %v2579_v2, %v2570_v13 }
 0x26a   : > { %p3697_p1 = pnand %p3696_p13, %p3690_p7 }
 0x26b   : > { %v2584_v21 = vadd.f32 %v2583_v29, %v2580_v28 }
 0x28b   : > { %s3566_s10 = spop %3565 }
 0x28c   : > { %s3568_s9 = spop %3567  ;;  %v2599_v34 = vstv %s3566_s10 }
 0x28d   : > { %v2602_v36 = vstv %s3568_s9  ;;  %v2600_v39 = vsel %vm2598_vm14, %v2599_v34, 0.0 }
 0x28e   : > { %v2603_v15 = vsel %vm2601_vm8, %v2602_v36, %v2600_v39 }
 0x2dc   : > { %v2460_v7 = vpop.xlane.xlu1 %2459 }
 0x2dd   : > { %v2461_v18 = vrot.slane %v2460_v7, 4 }
 0x2df   : > { %v2462_v49 = vadd.f32 %v2461_v18, %v2460_v7  ;;  %v2595_v18 = vadd.f32 %v2594_v26, %v2584_v21 }
 0x2e0   : > { %v2470_v0 = vpop.xlane.xlu1 %2469 }
 0x2e1   : > { %v2463_v4 = vrot.slane %v2462_v49, 2  ;;  %v2471_v50 = vrot.slane %v2470_v0, 4 }
 0x2e3   : > { %v2472_v42 = vadd.f32 %v2471_v50, %v2470_v0  ;;  %v2464_v54 = vadd.f32 %v2463_v4, %v2462_v49 }
 0x2e5   : > { %v2473_v33 = vrot.slane %v2472_v42, 2  ;;  %v2465_v55 = vrot.slane %v2464_v54, 1 }
 0x2e6   : > { %v2480_v60 = vpop.xlane.xlu0 %2479 }
 0x2e7   : > { %v2481_v1 = vrot.slane %v2480_v60, 4  ;;  %v2490_v22 = vpop.xlane.xlu1 %2489  ;;  %v2466_v47 = vadd.f32 %v2465_v55, %v2464_v54  ;;  %v2474_v35 = vadd.f32 %v2473_v33, %v2472_v42 }
 0x2e8   : > { %v2491_v17 = vrot.slane %v2490_v22, 4 }
 0x2e9   : > { %v2482_v27 = vadd.f32 %v2481_v1, %v2480_v60  ;;  %3569 = vpush %v2466_v47  ;;  %v2475_v56 = vrot.slane %v2474_v35, 1 }
 0x2ea   : > { %v2492_v53 = vadd.f32 %v2491_v17, %v2490_v22 }
 0x2eb   : > { %v2483_v31 = vrot.slane %v2482_v27, 2  ;;  %v2476_v40 = vadd.f32 %v2475_v56, %v2474_v35 }
 0x2ec   : > { %v2493_v12 = vrot.slane %v2492_v53, 2 }
 0x2ed   : > { %v2484_v23 = vadd.f32 %v2483_v31, %v2482_v27  ;;  %3571 = vpush %v2476_v40 }
 0x2ee   : > { %v2494_v32 = vadd.f32 %v2493_v12, %v2492_v53 }
 0x2ef   : > { %v2485_v11 = vrot.slane %v2484_v23, 1 }
 0x2f0   : > { %v2495_v10 = vrot.slane %v2494_v32, 1 }
 0x2f1   : > { %v2486_v51 = vadd.f32 %v2485_v11, %v2484_v23 }
 0x2f2   : > { %v2496_v41 = vadd.f32 %v2495_v10, %v2494_v32 }
 0x2f3   : > { %3573 = vpush %v2486_v51 }
 0x2f4   : > { %3575 = vpush %v2496_v41 }
 0x31a   : > { %s3570_s18 = spop %3569 }
 0x31b   : > { %v2605_v24 = vstv %s3570_s18 }
 0x31c   : > { %v2606_v45 = vsel %vm2604_vm6, %v2605_v24, %v2603_v15 }
 0x31e   : > { %s3572_s29 = spop %3571 }
 0x31f   : > { %v2608_v57 = vstv %s3572_s29 }
 0x320   : > { %v2609_v7 = vsel %vm2607_vm12, %v2608_v57, %v2606_v45 }
 0x324   : > { %s3574_s6 = spop %3573 }
 0x325   : > { %v2611_v49 = vstv %s3574_s6  ;;  %s3576_s11 = spop %3575 }
 0x326   : > { %v2612_v0 = vsel %vm2610_vm1, %v2611_v49, %v2609_v7  ;;  %v2614_v4 = vstv %s3576_s11 }
 0x327   : > { %v2615_v50 = vsel %vm2613_vm5, %v2614_v4, %v2612_v0 }
 0x328   : > { %v2617_v42 = vsel %vm2616_vm9, %v2595_v18, %v2615_v50 }
 0x329   : > { %2619 = vst.msk [vmem:[%s229_s2] sm:$0x1] %vm2618_vm13, %v2617_v42 }
 0x32a   : > { %3700 = shalt.err (!%p3697_p1)
}
 0x32b   : > { %s3701_s17 = scalar_lea.hbm %s6560_s15, 16  ;;  %s3705_s7 = scalar_lea.hbm %s7202_s30, 32 }
 0x32c   : > { %p3702_p2 = scmp.ne.s32.totalorder %s6560_s15, %s3701_s17  ;;  %p3706_p9 = scmp.lt.u32.totalorder %s6560_s15, %s7202_s30 }
 0x32d   : > { %p3707_p5 = scmp.lt.u32.totalorder %s3705_s7, %s3701_s17  ;;  %p3709_p10 = scmp.lt.u32.totalorder %s3701_s17, %s6560_s15 }
 0x32e   : > { %p3703_p3 = pnand %p3702_p2, %p7203_p12 }
 0x32f   : > { %p3708_p6 = por %p3707_p5, %p3706_p9 }
 0x330   : > { %p3704_p4 = pneg %p3703_p3 }
 0x331   : > { %p3710_p0 = por %p3709_p10, %p3708_p6 }
 0x333   : > { %p3711_p7 = pnand %p3710_p0, %p3704_p4 }
 0x335   : > { %3714 = shalt.err (!%p3711_p7)
}
 0x336   : > { %3585 = dma.vmem_to_hbm [thread:$0]  (%p7203_p12), %s6562_s19, 16, %s6560_s15, %s2621_s1  }
 0x337 PF: > { %s7204_s27 = sld [smem:[#allocation14_spill]]  ;;  %s7205_s0 = sld [smem:[#allocation11_spill]] }
 0x338   : > { %s7206_s10 = sld [smem:[#allocation19_spill]] }
 0x33d   : > { %p3602_p8 = scmp.ge.s32.totalorder %s7204_s27, 2  ;;  %s2645_s9 = sand.u32 1, %s7205_s0  }
 0x33e   : > { %p7207_p11 = scmp.ne.s32.totalorder %s7206_s10, 0  ;;  %s2646_s18 = scalar_lea.sflag [#allocation3], %s2645_s9 }
 0x340   : > { %p3595_p13 = pnand %p3602_p8, %p7207_p11 }
 0x342   : > { %3740 = dma.done.wait (!%p3595_p13), %s2646_s18, 16  }
 0x343   : > { %3742 = vsyncadd (!%p3595_p13), %s2646_s18, 4294967280  ;;  %s7208_s18 = sld [smem:[#allocation16_spill]]  ;;  %s7209_s15 = sld [smem:[#allocation12_spill]] }
 0x344   : > { %s7210_s16 = sld [smem:[#allocation13_spill]]  ;;  %s7211_s17 = sld [smem:[#allocation17_spill]] }
 0x349   : > { %p16_p1 = scmp.ge.s32.totalorder %s7208_s18, 4  }
 0x34b   :  { %18 = sbr.rel (!%p16_p1) target bundleno = 11 (0xb), region = 83 }
 0x352   :  { %2650 = vsyncpa [#allocation3], 1 }
 0x353   :  { %2652 = vsyncpa [#allocation3 + $0x1], 1 }
 0x354   :  { %2653 = vsyncpa [#allocation4], 1 }
 0x355   :  { %2655 = vsyncpa [#allocation4 + $0x1], 1 }
 0x356   :  { %2656 = vsyncpa [#allocation6], 1 }

</bundles_post_ra>
